<compile_context>
chip_gen: v7x
topology: tpu7x:2x2x1
jax: 0.10.0
libtpu: 0.0.40
codegen_flags: <defaults>
</compile_context>

<pallas_src>
import math

import numpy as np
import jax
import jax.numpy as jnp
from jax.experimental import pallas as pl
from jax.experimental.pallas import tpu as pltpu

EPS = 1e-5  # PyTorch BatchNorm2d default eps

_LAYER_SPECS = [
    ("pw", 576, 256),
    ("dw", 256, 256),
    ("pw", 256, 512),   # -> conv8_2
    ("pw", 512, 128),
    ("dw", 128, 128),
    ("pw", 128, 256),   # -> conv9_2
    ("pw", 256, 128),
    ("dw", 128, 128),
    ("pw", 128, 256),   # -> conv10_2
    ("pw", 256, 64),
    ("dw", 64, 64),
    ("pw", 64, 128),    # -> conv11_2
]
_OUT_LAYERS = (2, 5, 8, 11)


def _spatial_plan(H, W):
    """Per-layer (h_in, w_in, h_out, w_out) for the 12-layer chain."""
    plan = []
    h, w = H, W
    for kind, _, _ in _LAYER_SPECS:
        if kind == "pw":
            plan.append((h, w, h, w))
        else:  # 3x3, stride 2, pad 1
            ho, wo = (h + 1) // 2, (w + 1) // 2
            plan.append((h, w, ho, wo))
            h, w = ho, wo
    return plan


def _relu6(x):
    return jnp.minimum(jnp.maximum(x, 0.0), 6.0)


def _dw_gather_matrix(h, w):
    """Constant (9*Ho*Wo, H*W) 0/1 matrix for a 3x3 / stride-2 / pad-1 depthwise conv.

    Row (k*P + i*Wo + j) selects input pixel (2i + di - 1, 2j + dj - 1) for tap
    k = 3*di + dj; rows that fall in the zero padding are all-zero.  G @ x_flat then
    yields the 9 shifted/strided activation slabs stacked along M in one MXU matmul.
    """
    ho, wo = (h + 1) // 2, (w + 1) // 2
    P = ho * wo
    g = np.zeros((9 * P, h * w), np.float32)
    for di in range(3):
        for dj in range(3):
            k = 3 * di + dj
            for i in range(ho):
                r = 2 * i + di - 1
                if not (0 <= r < h):
                    continue
                for j in range(wo):
                    c = 2 * j + dj - 1
                    if 0 <= c < w:
                        g[k * P + i * wo + j, r * w + c] = 1.0
    return g


def _make_fused_kernel(H, W):
    plan = _spatial_plan(H, W)

    def kernel(*refs):
        # refs = [x] + per-layer params (pw: w, b | dw: w, b, gather) + 4 out refs
        x_ref = refs[0]
        idx = 1
        layer_refs = []
        for kind, _, _ in _LAYER_SPECS:
            n = 2 if kind == "pw" else 3
            layer_refs.append(refs[idx:idx + n])
            idx += n
        out_refs = refs[idx:idx + len(_OUT_LAYERS)]

        out_i = 0
        y = x_ref[0]                                   # (H*W, 576) bf16, NHWC-flat
        for li, (kind, cin, cout) in enumerate(_LAYER_SPECS):
            _, _, h_out, w_out = plan[li]
            if kind == "pw":
                # ---- 1x1 conv (+ folded BN scale) + bias + ReLU6 on the MXU ----
                w_ref, b_ref = layer_refs[li]
                acc = jnp.dot(y.astype(jnp.bfloat16), w_ref[...],
                              preferred_element_type=jnp.float32)   # (HW, Cout) f32
                y = _relu6(acc + b_ref[...])
                if li in _OUT_LAYERS:
                    o_ref = out_refs[out_i]
                    out_i += 1
                    o_ref[0] = y.astype(o_ref.dtype)   # f32 value keeps feeding chain
            else:
                # ---- depthwise 3x3, stride 2, pad 1 (+ folded BN) + ReLU6 ----
                # One f32 MXU matmul gathers all 9 shifted taps (exact: 0/1 matrix),
                # then 9 per-channel multiply-adds on the VPU.
                w_ref, b_ref, g_ref = layer_refs[li]
                P = h_out * w_out
                taps = jnp.dot(g_ref[...], y,
                               preferred_element_type=jnp.float32)  # (9*P, C) f32
                w9 = w_ref[...]                                     # (9, C) BN-folded
                acc = taps[0:P, :] * w9[0:1, :]
                for k in range(1, 9):
                    acc = acc + taps[k * P:(k + 1) * P, :] * w9[k:k + 1, :]
                y = _relu6(acc + b_ref[...])                        # (P, C) f32

    return kernel


def _build_fused_call(N, H, W, out_dtype):
    plan = _spatial_plan(H, W)
    kernel = _make_fused_kernel(H, W)

    in_specs = [pl.BlockSpec((1, H * W, _LAYER_SPECS[0][1]), lambda n: (n, 0, 0))]
    for li, (kind, cin, cout) in enumerate(_LAYER_SPECS):
        h_in, w_in, h_out, w_out = plan[li]
        if kind == "pw":
            in_specs.append(pl.BlockSpec((cin, cout), lambda n: (0, 0)))
            in_specs.append(pl.BlockSpec((1, cout), lambda n: (0, 0)))
        else:
            in_specs.append(pl.BlockSpec((9, cout), lambda n: (0, 0)))
            in_specs.append(pl.BlockSpec((1, cout), lambda n: (0, 0)))
            in_specs.append(pl.BlockSpec((9 * h_out * w_out, h_in * w_in),
                                         lambda n: (0, 0)))

    out_shapes, out_specs = [], []
    for li in _OUT_LAYERS:
        _, _, ho, wo = plan[li]
        cout = _LAYER_SPECS[li][2]
        out_shapes.append(jax.ShapeDtypeStruct((N, ho * wo, cout), out_dtype))
        out_specs.append(pl.BlockSpec((1, ho * wo, cout), lambda n: (n, 0, 0)))

    grid_spec = pltpu.PrefetchScalarGridSpec(
        num_scalar_prefetch=0,
        grid=(N,),
        in_specs=in_specs,
        out_specs=tuple(out_specs),
        scratch_shapes=(),
    )
    return pl.pallas_call(
        kernel,
        out_shape=tuple(out_shapes),
        grid_spec=grid_spec,
        compiler_params=pltpu.CompilerParams(
            dimension_semantics=("parallel",)),   # batch-parallel across TCs on v7x
    )
    # TODO(synk): for v7x with N == 1 a second parallel axis over Cout halves of the
    # heavy matmuls would keep both TensorCores busy; not implemented here.


# -----------------------------------------------------------------------------
# Parameters (deterministic, mirrors AuxiliaryConvolutions.__init__; eval-mode BN
# folded into the conv weights and a per-channel bias).
# -----------------------------------------------------------------------------
def make_params(key):
    params = []
    for kind, cin, cout in _LAYER_SPECS:
        key, wk = jax.random.split(key)
        # BatchNorm2d at init: gamma=1, beta=0, running_mean=0, running_var=1.
        gamma = jnp.ones((cout,), jnp.float32)
        beta = jnp.zeros((cout,), jnp.float32)
        mean = jnp.zeros((cout,), jnp.float32)
        var = jnp.ones((cout,), jnp.float32)
        scale = gamma / jnp.sqrt(var + EPS)
        bias = (beta - mean * scale).reshape(1, cout)
        if kind == "pw":
            std = math.sqrt(2.0 / (cout * 1 * 1))        # kaiming_normal_, fan_out
            w = jax.random.normal(wk, (cin, cout), jnp.float32) * std
            w = (w * scale[None, :]).astype(jnp.bfloat16)  # fold BN; bf16 MXU operand
        else:
            std = math.sqrt(2.0 / (cout * 3 * 3))
            # tap layout: row k = 3*di + dj  (PyTorch weight[c, 0, di, dj] -> w[k, c])
            w = jax.random.normal(wk, (9, cout), jnp.float32) * std
            w = w * scale[None, :]                         # fold BN; keep f32
        params.append((w, bias))
    return params


# -----------------------------------------------------------------------------
# Forward pass (semantics of AuxiliaryConvolutions.forward): NCHW in -> NCHW outs
# -----------------------------------------------------------------------------
def auxiliary_convolutions(conv7_feats_nchw, params):
    N, C, H, W = conv7_feats_nchw.shape
    assert C == _LAYER_SPECS[0][1], "conv7 feature map must have 576 channels"
    plan = _spatial_plan(H, W)

    # One tiny XLA transpose + bf16 cast outside the kernel: halves the largest
    # HBM->VMEM DMA and keeps the layer-0 matmul free of an in-kernel XLU transpose.
    x = jnp.transpose(conv7_feats_nchw.reshape(N, C, H * W), (0, 2, 1))
    x = x.astype(jnp.bfloat16)                       # (N, HW, 576)

    flat = []
    for li, ((w, b), (kind, _, _)) in enumerate(zip(params, _LAYER_SPECS)):
        flat.append(w)
        flat.append(b)
        if kind == "dw":
            h_in, w_in, _, _ = plan[li]
            flat.append(jnp.asarray(_dw_gather_matrix(h_in, w_in)))

    call = _build_fused_call(N, H, W, conv7_feats_nchw.dtype)
    outs = call(x, *flat)

    results = []
    for oi, li in enumerate(_OUT_LAYERS):
        _, _, ho, wo = plan[li]
        cout = _LAYER_SPECS[li][2]
        y = outs[oi].reshape(N, ho, wo, cout)
        results.append(jnp.transpose(y, (0, 3, 1, 2)))   # tiny outputs -> NCHW
    return tuple(results)
    # TODO(synk): training-mode BatchNorm (batch statistics + running-stat update)
    # is not implemented; BN is folded in eval mode.


if __name__ == "__main__":
    key = jax.random.PRNGKey(0)
    pkey, xkey = jax.random.split(key)
    params = make_params(pkey)

    # conv7 feature map: batch=2, channels=576 (fixed by the module), spatial 16x16
    x = jax.random.normal(xkey, (2, 576, 16, 16), jnp.float32)

    fwd = jax.jit(lambda inp: auxiliary_convolutions(inp, params))
    conv8_2, conv9_2, conv10_2, conv11_2 = fwd(x)
    jax.block_until_ready((conv8_2, conv9_2, conv10_2, conv11_2))

    assert conv8_2.shape == (2, 512, 8, 8)
    assert conv9_2.shape == (2, 256, 4, 4)
    assert conv10_2.shape == (2, 256, 2, 2)
    assert conv11_2.shape == (2, 128, 1, 1)
    for o in (conv8_2, conv9_2, conv10_2, conv11_2):   # ReLU6 range invariant
        assert float(jnp.min(o)) >= 0.0 and float(jnp.max(o)) <= 6.0 + 1e-3
    print("KERNEL_OK")
</pallas_src>

<mosaic_0001>
module attributes {stable_mosaic.version = 11 : i64} {
  func.func @kernel(%arg0: i32, %arg1: memref<1x256x576xbf16, #tpu.memory_space<vmem>>, %arg2: memref<576x256xbf16, #tpu.memory_space<vmem>>, %arg3: memref<1x256xf32, #tpu.memory_space<vmem>>, %arg4: memref<9x256xf32, #tpu.memory_space<vmem>>, %arg5: memref<1x256xf32, #tpu.memory_space<vmem>>, %arg6: memref<576x256xf32, #tpu.memory_space<vmem>>, %arg7: memref<256x512xbf16, #tpu.memory_space<vmem>>, %arg8: memref<1x512xf32, #tpu.memory_space<vmem>>, %arg9: memref<512x128xbf16, #tpu.memory_space<vmem>>, %arg10: memref<1x128xf32, #tpu.memory_space<vmem>>, %arg11: memref<9x128xf32, #tpu.memory_space<vmem>>, %arg12: memref<1x128xf32, #tpu.memory_space<vmem>>, %arg13: memref<144x64xf32, #tpu.memory_space<vmem>>, %arg14: memref<128x256xbf16, #tpu.memory_space<vmem>>, %arg15: memref<1x256xf32, #tpu.memory_space<vmem>>, %arg16: memref<256x128xbf16, #tpu.memory_space<vmem>>, %arg17: memref<1x128xf32, #tpu.memory_space<vmem>>, %arg18: memref<9x128xf32, #tpu.memory_space<vmem>>, %arg19: memref<1x128xf32, #tpu.memory_space<vmem>>, %arg20: memref<36x16xf32, #tpu.memory_space<vmem>>, %arg21: memref<128x256xbf16, #tpu.memory_space<vmem>>, %arg22: memref<1x256xf32, #tpu.memory_space<vmem>>, %arg23: memref<256x64xbf16, #tpu.memory_space<vmem>>, %arg24: memref<1x64xf32, #tpu.memory_space<vmem>>, %arg25: memref<9x64xf32, #tpu.memory_space<vmem>>, %arg26: memref<1x64xf32, #tpu.memory_space<vmem>>, %arg27: memref<9x4xf32, #tpu.memory_space<vmem>>, %arg28: memref<64x128xbf16, #tpu.memory_space<vmem>>, %arg29: memref<1x128xf32, #tpu.memory_space<vmem>>, %arg30: memref<1x64x512xf32, #tpu.memory_space<vmem>>, %arg31: memref<1x16x256xf32, #tpu.memory_space<vmem>>, %arg32: memref<1x4x256xf32, #tpu.memory_space<vmem>>, %arg33: memref<1x1x128xf32, #tpu.memory_space<vmem>>) attributes {dimension_semantics = [#tpu.dimension_semantics<parallel>], iteration_bounds = array<i64: 2>, scalar_prefetch = 0 : i64, scratch_operands = 0 : i64, tpu.core_type = #tpu.core_type<tc>, window_params = [{transform_indices = @transform_0, window_bounds = array<i64: 1, 256, 576>}, {pipeline_mode = #tpu.pipeline_mode<synchronous>, transform_indices = @transform_1, window_bounds = array<i64: 576, 256>}, {pipeline_mode = #tpu.pipeline_mode<synchronous>, transform_indices = @transform_2, window_bounds = array<i64: 1, 256>}, {pipeline_mode = #tpu.pipeline_mode<synchronous>, transform_indices = @transform_3, window_bounds = array<i64: 9, 256>}, {pipeline_mode = #tpu.pipeline_mode<synchronous>, transform_indices = @transform_4, window_bounds = array<i64: 1, 256>}, {pipeline_mode = #tpu.pipeline_mode<synchronous>, transform_indices = @transform_5, window_bounds = array<i64: 576, 256>}, {pipeline_mode = #tpu.pipeline_mode<synchronous>, transform_indices = @transform_6, window_bounds = array<i64: 256, 512>}, {pipeline_mode = #tpu.pipeline_mode<synchronous>, transform_indices = @transform_7, window_bounds = array<i64: 1, 512>}, {pipeline_mode = #tpu.pipeline_mode<synchronous>, transform_indices = @transform_8, window_bounds = array<i64: 512, 128>}, {pipeline_mode = #tpu.pipeline_mode<synchronous>, transform_indices = @transform_9, window_bounds = array<i64: 1, 128>}, {pipeline_mode = #tpu.pipeline_mode<synchronous>, transform_indices = @transform_10, window_bounds = array<i64: 9, 128>}, {pipeline_mode = #tpu.pipeline_mode<synchronous>, transform_indices = @transform_11, window_bounds = array<i64: 1, 128>}, {pipeline_mode = #tpu.pipeline_mode<synchronous>, transform_indices = @transform_12, window_bounds = array<i64: 144, 64>}, {pipeline_mode = #tpu.pipeline_mode<synchronous>, transform_indices = @transform_13, window_bounds = array<i64: 128, 256>}, {pipeline_mode = #tpu.pipeline_mode<synchronous>, transform_indices = @transform_14, window_bounds = array<i64: 1, 256>}, {pipeline_mode = #tpu.pipeline_mode<synchronous>, transform_indices = @transform_15, window_bounds = array<i64: 256, 128>}, {pipeline_mode = #tpu.pipeline_mode<synchronous>, transform_indices = @transform_16, window_bounds = array<i64: 1, 128>}, {pipeline_mode = #tpu.pipeline_mode<synchronous>, transform_indices = @transform_17, window_bounds = array<i64: 9, 128>}, {pipeline_mode = #tpu.pipeline_mode<synchronous>, transform_indices = @transform_18, window_bounds = array<i64: 1, 128>}, {pipeline_mode = #tpu.pipeline_mode<synchronous>, transform_indices = @transform_19, window_bounds = array<i64: 36, 16>}, {pipeline_mode = #tpu.pipeline_mode<synchronous>, transform_indices = @transform_20, window_bounds = array<i64: 128, 256>}, {pipeline_mode = #tpu.pipeline_mode<synchronous>, transform_indices = @transform_21, window_bounds = array<i64: 1, 256>}, {pipeline_mode = #tpu.pipeline_mode<synchronous>, transform_indices = @transform_22, window_bounds = array<i64: 256, 64>}, {pipeline_mode = #tpu.pipeline_mode<synchronous>, transform_indices = @transform_23, window_bounds = array<i64: 1, 64>}, {pipeline_mode = #tpu.pipeline_mode<synchronous>, transform_indices = @transform_24, window_bounds = array<i64: 9, 64>}, {pipeline_mode = #tpu.pipeline_mode<synchronous>, transform_indices = @transform_25, window_bounds = array<i64: 1, 64>}, {pipeline_mode = #tpu.pipeline_mode<synchronous>, transform_indices = @transform_26, window_bounds = array<i64: 9, 4>}, {pipeline_mode = #tpu.pipeline_mode<synchronous>, transform_indices = @transform_27, window_bounds = array<i64: 64, 128>}, {pipeline_mode = #tpu.pipeline_mode<synchronous>, transform_indices = @transform_28, window_bounds = array<i64: 1, 128>}, {transform_indices = @transform_29, window_bounds = array<i64: 1, 64, 512>}, {transform_indices = @transform_30, window_bounds = array<i64: 1, 16, 256>}, {transform_indices = @transform_31, window_bounds = array<i64: 1, 4, 256>}, {transform_indices = @transform_32, window_bounds = array<i64: 1, 1, 128>}]} {
    %c0 = arith.constant 0 : index
    %c0_0 = arith.constant 0 : index
    %c0_1 = arith.constant 0 : index
    %0 = vector.load %arg1[%c0, %c0_0, %c0_1] : memref<1x256x576xbf16, #tpu.memory_space<vmem>>, vector<1x256x576xbf16>
    %1 = vector.shape_cast %0 : vector<1x256x576xbf16> to vector<256x576xbf16>
    %c0_2 = arith.constant 0 : index
    %c0_3 = arith.constant 0 : index
    %2 = vector.load %arg2[%c0_2, %c0_3] : memref<576x256xbf16, #tpu.memory_space<vmem>>, vector<576x256xbf16>
    %cst = arith.constant dense<0.000000e+00> : vector<256x256xf32>
    %3 = tpu.matmul %1, %2, %cst {dimension_numbers = #tpu.dot_dimension_numbers<[1], [0], [0], [1], [0, 0, 1, 1], [], []>} : vector<256x576xbf16>, vector<576x256xbf16>, vector<256x256xf32> -> vector<256x256xf32>
    %c0_4 = arith.constant 0 : index
    %c0_5 = arith.constant 0 : index
    %4 = vector.load %arg3[%c0_4, %c0_5] : memref<1x256xf32, #tpu.memory_space<vmem>>, vector<1x256xf32>
    %5 = vector.broadcast %4 : vector<1x256xf32> to vector<256x256xf32>
    %6 = arith.addf %3, %5 : vector<256x256xf32>
    %cst_6 = arith.constant 0.000000e+00 : f32
    %7 = vector.broadcast %cst_6 : f32 to vector<256x256xf32>
    %8 = arith.maximumf %6, %7 : vector<256x256xf32>
    %cst_7 = arith.constant 6.000000e+00 : f32
    %9 = vector.broadcast %cst_7 : f32 to vector<256x256xf32>
    %10 = arith.minimumf %8, %9 : vector<256x256xf32>
    %c0_8 = arith.constant 0 : index
    %c0_9 = arith.constant 0 : index
    %11 = vector.load %arg6[%c0_8, %c0_9] : memref<576x256xf32, #tpu.memory_space<vmem>>, vector<576x256xf32>
    %cst_10 = arith.constant dense<0.000000e+00> : vector<576x256xf32>
    %12 = tpu.matmul %11, %10, %cst_10 {dimension_numbers = #tpu.dot_dimension_numbers<[1], [0], [0], [1], [0, 0, 1, 1], [], []>} : vector<576x256xf32>, vector<256x256xf32>, vector<576x256xf32> -> vector<576x256xf32>
    %c0_11 = arith.constant 0 : index
    %c0_12 = arith.constant 0 : index
    %13 = vector.load %arg4[%c0_11, %c0_12] : memref<9x256xf32, #tpu.memory_space<vmem>>, vector<9x256xf32>
    %14 = vector.extract_strided_slice %12 {offsets = [0, 0], sizes = [64, 256], strides = [1, 1]} : vector<576x256xf32> to vector<64x256xf32>
    %15 = vector.extract_strided_slice %13 {offsets = [0, 0], sizes = [1, 256], strides = [1, 1]} : vector<9x256xf32> to vector<1x256xf32>
    %16 = vector.broadcast %15 : vector<1x256xf32> to vector<64x256xf32>
    %17 = arith.mulf %14, %16 : vector<64x256xf32>
    %18 = vector.extract_strided_slice %12 {offsets = [64, 0], sizes = [64, 256], strides = [1, 1]} : vector<576x256xf32> to vector<64x256xf32>
    %19 = vector.extract_strided_slice %13 {offsets = [1, 0], sizes = [1, 256], strides = [1, 1]} : vector<9x256xf32> to vector<1x256xf32>
    %20 = vector.broadcast %19 : vector<1x256xf32> to vector<64x256xf32>
    %21 = arith.mulf %18, %20 : vector<64x256xf32>
    %22 = arith.addf %17, %21 : vector<64x256xf32>
    %23 = vector.extract_strided_slice %12 {offsets = [128, 0], sizes = [64, 256], strides = [1, 1]} : vector<576x256xf32> to vector<64x256xf32>
    %24 = vector.extract_strided_slice %13 {offsets = [2, 0], sizes = [1, 256], strides = [1, 1]} : vector<9x256xf32> to vector<1x256xf32>
    %25 = vector.broadcast %24 : vector<1x256xf32> to vector<64x256xf32>
    %26 = arith.mulf %23, %25 : vector<64x256xf32>
    %27 = arith.addf %22, %26 : vector<64x256xf32>
    %28 = vector.extract_strided_slice %12 {offsets = [192, 0], sizes = [64, 256], strides = [1, 1]} : vector<576x256xf32> to vector<64x256xf32>
    %29 = vector.extract_strided_slice %13 {offsets = [3, 0], sizes = [1, 256], strides = [1, 1]} : vector<9x256xf32> to vector<1x256xf32>
    %30 = vector.broadcast %29 : vector<1x256xf32> to vector<64x256xf32>
    %31 = arith.mulf %28, %30 : vector<64x256xf32>
    %32 = arith.addf %27, %31 : vector<64x256xf32>
    %33 = vector.extract_strided_slice %12 {offsets = [256, 0], sizes = [64, 256], strides = [1, 1]} : vector<576x256xf32> to vector<64x256xf32>
    %34 = vector.extract_strided_slice %13 {offsets = [4, 0], sizes = [1, 256], strides = [1, 1]} : vector<9x256xf32> to vector<1x256xf32>
    %35 = vector.broadcast %34 : vector<1x256xf32> to vector<64x256xf32>
    %36 = arith.mulf %33, %35 : vector<64x256xf32>
    %37 = arith.addf %32, %36 : vector<64x256xf32>
    %38 = vector.extract_strided_slice %12 {offsets = [320, 0], sizes = [64, 256], strides = [1, 1]} : vector<576x256xf32> to vector<64x256xf32>
    %39 = vector.extract_strided_slice %13 {offsets = [5, 0], sizes = [1, 256], strides = [1, 1]} : vector<9x256xf32> to vector<1x256xf32>
    %40 = vector.broadcast %39 : vector<1x256xf32> to vector<64x256xf32>
    %41 = arith.mulf %38, %40 : vector<64x256xf32>
    %42 = arith.addf %37, %41 : vector<64x256xf32>
    %43 = vector.extract_strided_slice %12 {offsets = [384, 0], sizes = [64, 256], strides = [1, 1]} : vector<576x256xf32> to vector<64x256xf32>
    %44 = vector.extract_strided_slice %13 {offsets = [6, 0], sizes = [1, 256], strides = [1, 1]} : vector<9x256xf32> to vector<1x256xf32>
    %45 = vector.broadcast %44 : vector<1x256xf32> to vector<64x256xf32>
    %46 = arith.mulf %43, %45 : vector<64x256xf32>
    %47 = arith.addf %42, %46 : vector<64x256xf32>
    %48 = vector.extract_strided_slice %12 {offsets = [448, 0], sizes = [64, 256], strides = [1, 1]} : vector<576x256xf32> to vector<64x256xf32>
    %49 = vector.extract_strided_slice %13 {offsets = [7, 0], sizes = [1, 256], strides = [1, 1]} : vector<9x256xf32> to vector<1x256xf32>
    %50 = vector.broadcast %49 : vector<1x256xf32> to vector<64x256xf32>
    %51 = arith.mulf %48, %50 : vector<64x256xf32>
    %52 = arith.addf %47, %51 : vector<64x256xf32>
    %53 = vector.extract_strided_slice %12 {offsets = [512, 0], sizes = [64, 256], strides = [1, 1]} : vector<576x256xf32> to vector<64x256xf32>
    %54 = vector.extract_strided_slice %13 {offsets = [8, 0], sizes = [1, 256], strides = [1, 1]} : vector<9x256xf32> to vector<1x256xf32>
    %55 = vector.broadcast %54 : vector<1x256xf32> to vector<64x256xf32>
    %56 = arith.mulf %53, %55 : vector<64x256xf32>
    %57 = arith.addf %52, %56 : vector<64x256xf32>
    %c0_13 = arith.constant 0 : index
    %c0_14 = arith.constant 0 : index
    %58 = vector.load %arg5[%c0_13, %c0_14] : memref<1x256xf32, #tpu.memory_space<vmem>>, vector<1x256xf32>
    %59 = vector.broadcast %58 : vector<1x256xf32> to vector<64x256xf32>
    %60 = arith.addf %57, %59 : vector<64x256xf32>
    %cst_15 = arith.constant 0.000000e+00 : f32
    %61 = vector.broadcast %cst_15 : f32 to vector<64x256xf32>
    %62 = arith.maximumf %60, %61 : vector<64x256xf32>
    %cst_16 = arith.constant 6.000000e+00 : f32
    %63 = vector.broadcast %cst_16 : f32 to vector<64x256xf32>
    %64 = arith.minimumf %62, %63 : vector<64x256xf32>
    %65 = arith.truncf %64 : vector<64x256xf32> to vector<64x256xbf16>
    %c0_17 = arith.constant 0 : index
    %c0_18 = arith.constant 0 : index
    %66 = vector.load %arg7[%c0_17, %c0_18] : memref<256x512xbf16, #tpu.memory_space<vmem>>, vector<256x512xbf16>
    %cst_19 = arith.constant dense<0.000000e+00> : vector<64x512xf32>
    %67 = tpu.matmul %65, %66, %cst_19 {dimension_numbers = #tpu.dot_dimension_numbers<[1], [0], [0], [1], [0, 0, 1, 1], [], []>} : vector<64x256xbf16>, vector<256x512xbf16>, vector<64x512xf32> -> vector<64x512xf32>
    %c0_20 = arith.constant 0 : index
    %c0_21 = arith.constant 0 : index
    %68 = vector.load %arg8[%c0_20, %c0_21] : memref<1x512xf32, #tpu.memory_space<vmem>>, vector<1x512xf32>
    %69 = vector.broadcast %68 : vector<1x512xf32> to vector<64x512xf32>
    %70 = arith.addf %67, %69 : vector<64x512xf32>
    %cst_22 = arith.constant 0.000000e+00 : f32
    %71 = vector.broadcast %cst_22 : f32 to vector<64x512xf32>
    %72 = arith.maximumf %70, %71 : vector<64x512xf32>
    %cst_23 = arith.constant 6.000000e+00 : f32
    %73 = vector.broadcast %cst_23 : f32 to vector<64x512xf32>
    %74 = arith.minimumf %72, %73 : vector<64x512xf32>
    %c0_24 = arith.constant 0 : index
    %c0_25 = arith.constant 0 : index
    %c0_26 = arith.constant 0 : index
    %75 = vector.load %arg30[%c0_24, %c0_25, %c0_26] : memref<1x64x512xf32, #tpu.memory_space<vmem>>, vector<1x64x512xf32>
    %76 = vector.shape_cast %75 : vector<1x64x512xf32> to vector<64x512xf32>
    %77 = vector.shape_cast %74 : vector<64x512xf32> to vector<1x64x512xf32>
    tpu.vector_store %arg30[%c0_24, %c0_25, %c0_26], %77 {strides = array<i32>} : memref<1x64x512xf32, #tpu.memory_space<vmem>>, vector<1x64x512xf32>,
    %78 = arith.truncf %74 : vector<64x512xf32> to vector<64x512xbf16>
    %c0_27 = arith.constant 0 : index
    %c0_28 = arith.constant 0 : index
    %79 = vector.load %arg9[%c0_27, %c0_28] : memref<512x128xbf16, #tpu.memory_space<vmem>>, vector<512x128xbf16>
    %cst_29 = arith.constant dense<0.000000e+00> : vector<64x128xf32>
    %80 = tpu.matmul %78, %79, %cst_29 {dimension_numbers = #tpu.dot_dimension_numbers<[1], [0], [0], [1], [0, 0, 1, 1], [], []>} : vector<64x512xbf16>, vector<512x128xbf16>, vector<64x128xf32> -> vector<64x128xf32>
    %c0_30 = arith.constant 0 : index
    %c0_31 = arith.constant 0 : index
    %81 = vector.load %arg10[%c0_30, %c0_31] : memref<1x128xf32, #tpu.memory_space<vmem>>, vector<1x128xf32>
    %82 = vector.broadcast %81 : vector<1x128xf32> to vector<64x128xf32>
    %83 = arith.addf %80, %82 : vector<64x128xf32>
    %cst_32 = arith.constant 0.000000e+00 : f32
    %84 = vector.broadcast %cst_32 : f32 to vector<64x128xf32>
    %85 = arith.maximumf %83, %84 : vector<64x128xf32>
    %cst_33 = arith.constant 6.000000e+00 : f32
    %86 = vector.broadcast %cst_33 : f32 to vector<64x128xf32>
    %87 = arith.minimumf %85, %86 : vector<64x128xf32>
    %c0_34 = arith.constant 0 : index
    %c0_35 = arith.constant 0 : index
    %88 = vector.load %arg13[%c0_34, %c0_35] : memref<144x64xf32, #tpu.memory_space<vmem>>, vector<144x64xf32>
    %cst_36 = arith.constant dense<0.000000e+00> : vector<144x128xf32>
    %89 = tpu.matmul %88, %87, %cst_36 {dimension_numbers = #tpu.dot_dimension_numbers<[1], [0], [0], [1], [0, 0, 1, 1], [], []>} : vector<144x64xf32>, vector<64x128xf32>, vector<144x128xf32> -> vector<144x128xf32>
    %c0_37 = arith.constant 0 : index
    %c0_38 = arith.constant 0 : index
    %90 = vector.load %arg11[%c0_37, %c0_38] : memref<9x128xf32, #tpu.memory_space<vmem>>, vector<9x128xf32>
    %91 = vector.extract_strided_slice %89 {offsets = [0, 0], sizes = [16, 128], strides = [1, 1]} : vector<144x128xf32> to vector<16x128xf32>
    %92 = vector.extract_strided_slice %90 {offsets = [0, 0], sizes = [1, 128], strides = [1, 1]} : vector<9x128xf32> to vector<1x128xf32>
    %93 = vector.broadcast %92 : vector<1x128xf32> to vector<16x128xf32>
    %94 = arith.mulf %91, %93 : vector<16x128xf32>
    %95 = vector.extract_strided_slice %89 {offsets = [16, 0], sizes = [16, 128], strides = [1, 1]} : vector<144x128xf32> to vector<16x128xf32>
    %96 = vector.extract_strided_slice %90 {offsets = [1, 0], sizes = [1, 128], strides = [1, 1]} : vector<9x128xf32> to vector<1x128xf32>
    %97 = vector.broadcast %96 : vector<1x128xf32> to vector<16x128xf32>
    %98 = arith.mulf %95, %97 : vector<16x128xf32>
    %99 = arith.addf %94, %98 : vector<16x128xf32>
    %100 = vector.extract_strided_slice %89 {offsets = [32, 0], sizes = [16, 128], strides = [1, 1]} : vector<144x128xf32> to vector<16x128xf32>
    %101 = vector.extract_strided_slice %90 {offsets = [2, 0], sizes = [1, 128], strides = [1, 1]} : vector<9x128xf32> to vector<1x128xf32>
    %102 = vector.broadcast %101 : vector<1x128xf32> to vector<16x128xf32>
    %103 = arith.mulf %100, %102 : vector<16x128xf32>
    %104 = arith.addf %99, %103 : vector<16x128xf32>
    %105 = vector.extract_strided_slice %89 {offsets = [48, 0], sizes = [16, 128], strides = [1, 1]} : vector<144x128xf32> to vector<16x128xf32>
    %106 = vector.extract_strided_slice %90 {offsets = [3, 0], sizes = [1, 128], strides = [1, 1]} : vector<9x128xf32> to vector<1x128xf32>
    %107 = vector.broadcast %106 : vector<1x128xf32> to vector<16x128xf32>
    %108 = arith.mulf %105, %107 : vector<16x128xf32>
    %109 = arith.addf %104, %108 : vector<16x128xf32>
    %110 = vector.extract_strided_slice %89 {offsets = [64, 0], sizes = [16, 128], strides = [1, 1]} : vector<144x128xf32> to vector<16x128xf32>
    %111 = vector.extract_strided_slice %90 {offsets = [4, 0], sizes = [1, 128], strides = [1, 1]} : vector<9x128xf32> to vector<1x128xf32>
    %112 = vector.broadcast %111 : vector<1x128xf32> to vector<16x128xf32>
    %113 = arith.mulf %110, %112 : vector<16x128xf32>
    %114 = arith.addf %109, %113 : vector<16x128xf32>
    %115 = vector.extract_strided_slice %89 {offsets = [80, 0], sizes = [16, 128], strides = [1, 1]} : vector<144x128xf32> to vector<16x128xf32>
    %116 = vector.extract_strided_slice %90 {offsets = [5, 0], sizes = [1, 128], strides = [1, 1]} : vector<9x128xf32> to vector<1x128xf32>
    %117 = vector.broadcast %116 : vector<1x128xf32> to vector<16x128xf32>
    %118 = arith.mulf %115, %117 : vector<16x128xf32>
    %119 = arith.addf %114, %118 : vector<16x128xf32>
    %120 = vector.extract_strided_slice %89 {offsets = [96, 0], sizes = [16, 128], strides = [1, 1]} : vector<144x128xf32> to vector<16x128xf32>
    %121 = vector.extract_strided_slice %90 {offsets = [6, 0], sizes = [1, 128], strides = [1, 1]} : vector<9x128xf32> to vector<1x128xf32>
    %122 = vector.broadcast %121 : vector<1x128xf32> to vector<16x128xf32>
    %123 = arith.mulf %120, %122 : vector<16x128xf32>
    %124 = arith.addf %119, %123 : vector<16x128xf32>
    %125 = vector.extract_strided_slice %89 {offsets = [112, 0], sizes = [16, 128], strides = [1, 1]} : vector<144x128xf32> to vector<16x128xf32>
    %126 = vector.extract_strided_slice %90 {offsets = [7, 0], sizes = [1, 128], strides = [1, 1]} : vector<9x128xf32> to vector<1x128xf32>
    %127 = vector.broadcast %126 : vector<1x128xf32> to vector<16x128xf32>
    %128 = arith.mulf %125, %127 : vector<16x128xf32>
    %129 = arith.addf %124, %128 : vector<16x128xf32>
    %130 = vector.extract_strided_slice %89 {offsets = [128, 0], sizes = [16, 128], strides = [1, 1]} : vector<144x128xf32> to vector<16x128xf32>
    %131 = vector.extract_strided_slice %90 {offsets = [8, 0], sizes = [1, 128], strides = [1, 1]} : vector<9x128xf32> to vector<1x128xf32>
    %132 = vector.broadcast %131 : vector<1x128xf32> to vector<16x128xf32>
    %133 = arith.mulf %130, %132 : vector<16x128xf32>
    %134 = arith.addf %129, %133 : vector<16x128xf32>
    %c0_39 = arith.constant 0 : index
    %c0_40 = arith.constant 0 : index
    %135 = vector.load %arg12[%c0_39, %c0_40] : memref<1x128xf32, #tpu.memory_space<vmem>>, vector<1x128xf32>
    %136 = vector.broadcast %135 : vector<1x128xf32> to vector<16x128xf32>
    %137 = arith.addf %134, %136 : vector<16x128xf32>
    %cst_41 = arith.constant 0.000000e+00 : f32
    %138 = vector.broadcast %cst_41 : f32 to vector<16x128xf32>
    %139 = arith.maximumf %137, %138 : vector<16x128xf32>
    %cst_42 = arith.constant 6.000000e+00 : f32
    %140 = vector.broadcast %cst_42 : f32 to vector<16x128xf32>
    %141 = arith.minimumf %139, %140 : vector<16x128xf32>
    %142 = arith.truncf %141 : vector<16x128xf32> to vector<16x128xbf16>
    %c0_43 = arith.constant 0 : index
    %c0_44 = arith.constant 0 : index
    %143 = vector.load %arg14[%c0_43, %c0_44] : memref<128x256xbf16, #tpu.memory_space<vmem>>, vector<128x256xbf16>
    %cst_45 = arith.constant dense<0.000000e+00> : vector<16x256xf32>
    %144 = tpu.matmul %142, %143, %cst_45 {dimension_numbers = #tpu.dot_dimension_numbers<[1], [0], [0], [1], [0, 0, 1, 1], [], []>} : vector<16x128xbf16>, vector<128x256xbf16>, vector<16x256xf32> -> vector<16x256xf32>
    %c0_46 = arith.constant 0 : index
    %c0_47 = arith.constant 0 : index
    %145 = vector.load %arg15[%c0_46, %c0_47] : memref<1x256xf32, #tpu.memory_space<vmem>>, vector<1x256xf32>
    %146 = vector.broadcast %145 : vector<1x256xf32> to vector<16x256xf32>
    %147 = arith.addf %144, %146 : vector<16x256xf32>
    %cst_48 = arith.constant 0.000000e+00 : f32
    %148 = vector.broadcast %cst_48 : f32 to vector<16x256xf32>
    %149 = arith.maximumf %147, %148 : vector<16x256xf32>
    %cst_49 = arith.constant 6.000000e+00 : f32
    %150 = vector.broadcast %cst_49 : f32 to vector<16x256xf32>
    %151 = arith.minimumf %149, %150 : vector<16x256xf32>
    %c0_50 = arith.constant 0 : index
    %c0_51 = arith.constant 0 : index
    %c0_52 = arith.constant 0 : index
    %152 = vector.load %arg31[%c0_50, %c0_51, %c0_52] : memref<1x16x256xf32, #tpu.memory_space<vmem>>, vector<1x16x256xf32>
    %153 = vector.shape_cast %152 : vector<1x16x256xf32> to vector<16x256xf32>
    %154 = vector.shape_cast %151 : vector<16x256xf32> to vector<1x16x256xf32>
    tpu.vector_store %arg31[%c0_50, %c0_51, %c0_52], %154 {strides = array<i32>} : memref<1x16x256xf32, #tpu.memory_space<vmem>>, vector<1x16x256xf32>,
    %155 = arith.truncf %151 : vector<16x256xf32> to vector<16x256xbf16>
    %c0_53 = arith.constant 0 : index
    %c0_54 = arith.constant 0 : index
    %156 = vector.load %arg16[%c0_53, %c0_54] : memref<256x128xbf16, #tpu.memory_space<vmem>>, vector<256x128xbf16>
    %cst_55 = arith.constant dense<0.000000e+00> : vector<16x128xf32>
    %157 = tpu.matmul %155, %156, %cst_55 {dimension_numbers = #tpu.dot_dimension_numbers<[1], [0], [0], [1], [0, 0, 1, 1], [], []>} : vector<16x256xbf16>, vector<256x128xbf16>, vector<16x128xf32> -> vector<16x128xf32>
    %c0_56 = arith.constant 0 : index
    %c0_57 = arith.constant 0 : index
    %158 = vector.load %arg17[%c0_56, %c0_57] : memref<1x128xf32, #tpu.memory_space<vmem>>, vector<1x128xf32>
    %159 = vector.broadcast %158 : vector<1x128xf32> to vector<16x128xf32>
    %160 = arith.addf %157, %159 : vector<16x128xf32>
    %cst_58 = arith.constant 0.000000e+00 : f32
    %161 = vector.broadcast %cst_58 : f32 to vector<16x128xf32>
    %162 = arith.maximumf %160, %161 : vector<16x128xf32>
    %cst_59 = arith.constant 6.000000e+00 : f32
    %163 = vector.broadcast %cst_59 : f32 to vector<16x128xf32>
    %164 = arith.minimumf %162, %163 : vector<16x128xf32>
    %c0_60 = arith.constant 0 : index
    %c0_61 = arith.constant 0 : index
    %165 = vector.load %arg20[%c0_60, %c0_61] : memref<36x16xf32, #tpu.memory_space<vmem>>, vector<36x16xf32>
    %cst_62 = arith.constant dense<0.000000e+00> : vector<36x128xf32>
    %166 = tpu.matmul %165, %164, %cst_62 {dimension_numbers = #tpu.dot_dimension_numbers<[1], [0], [0], [1], [0, 0, 1, 1], [], []>} : vector<36x16xf32>, vector<16x128xf32>, vector<36x128xf32> -> vector<36x128xf32>
    %c0_63 = arith.constant 0 : index
    %c0_64 = arith.constant 0 : index
    %167 = vector.load %arg18[%c0_63, %c0_64] : memref<9x128xf32, #tpu.memory_space<vmem>>, vector<9x128xf32>
    %168 = vector.extract_strided_slice %166 {offsets = [0, 0], sizes = [4, 128], strides = [1, 1]} : vector<36x128xf32> to vector<4x128xf32>
    %169 = vector.extract_strided_slice %167 {offsets = [0, 0], sizes = [1, 128], strides = [1, 1]} : vector<9x128xf32> to vector<1x128xf32>
    %170 = vector.broadcast %169 : vector<1x128xf32> to vector<4x128xf32>
    %171 = arith.mulf %168, %170 : vector<4x128xf32>
    %172 = vector.extract_strided_slice %166 {offsets = [4, 0], sizes = [4, 128], strides = [1, 1]} : vector<36x128xf32> to vector<4x128xf32>
    %173 = vector.extract_strided_slice %167 {offsets = [1, 0], sizes = [1, 128], strides = [1, 1]} : vector<9x128xf32> to vector<1x128xf32>
    %174 = vector.broadcast %173 : vector<1x128xf32> to vector<4x128xf32>
    %175 = arith.mulf %172, %174 : vector<4x128xf32>
    %176 = arith.addf %171, %175 : vector<4x128xf32>
    %177 = vector.extract_strided_slice %166 {offsets = [8, 0], sizes = [4, 128], strides = [1, 1]} : vector<36x128xf32> to vector<4x128xf32>
    %178 = vector.extract_strided_slice %167 {offsets = [2, 0], sizes = [1, 128], strides = [1, 1]} : vector<9x128xf32> to vector<1x128xf32>
    %179 = vector.broadcast %178 : vector<1x128xf32> to vector<4x128xf32>
    %180 = arith.mulf %177, %179 : vector<4x128xf32>
    %181 = arith.addf %176, %180 : vector<4x128xf32>
    %182 = vector.extract_strided_slice %166 {offsets = [12, 0], sizes = [4, 128], strides = [1, 1]} : vector<36x128xf32> to vector<4x128xf32>
    %183 = vector.extract_strided_slice %167 {offsets = [3, 0], sizes = [1, 128], strides = [1, 1]} : vector<9x128xf32> to vector<1x128xf32>
    %184 = vector.broadcast %183 : vector<1x128xf32> to vector<4x128xf32>
    %185 = arith.mulf %182, %184 : vector<4x128xf32>
    %186 = arith.addf %181, %185 : vector<4x128xf32>
    %187 = vector.extract_strided_slice %166 {offsets = [16, 0], sizes = [4, 128], strides = [1, 1]} : vector<36x128xf32> to vector<4x128xf32>
    %188 = vector.extract_strided_slice %167 {offsets = [4, 0], sizes = [1, 128], strides = [1, 1]} : vector<9x128xf32> to vector<1x128xf32>
    %189 = vector.broadcast %188 : vector<1x128xf32> to vector<4x128xf32>
    %190 = arith.mulf %187, %189 : vector<4x128xf32>
    %191 = arith.addf %186, %190 : vector<4x128xf32>
    %192 = vector.extract_strided_slice %166 {offsets = [20, 0], sizes = [4, 128], strides = [1, 1]} : vector<36x128xf32> to vector<4x128xf32>
    %193 = vector.extract_strided_slice %167 {offsets = [5, 0], sizes = [1, 128], strides = [1, 1]} : vector<9x128xf32> to vector<1x128xf32>
    %194 = vector.broadcast %193 : vector<1x128xf32> to vector<4x128xf32>
    %195 = arith.mulf %192, %194 : vector<4x128xf32>
    %196 = arith.addf %191, %195 : vector<4x128xf32>
    %197 = vector.extract_strided_slice %166 {offsets = [24, 0], sizes = [4, 128], strides = [1, 1]} : vector<36x128xf32> to vector<4x128xf32>
    %198 = vector.extract_strided_slice %167 {offsets = [6, 0], sizes = [1, 128], strides = [1, 1]} : vector<9x128xf32> to vector<1x128xf32>
    %199 = vector.broadcast %198 : vector<1x128xf32> to vector<4x128xf32>
    %200 = arith.mulf %197, %199 : vector<4x128xf32>
    %201 = arith.addf %196, %200 : vector<4x128xf32>
    %202 = vector.extract_strided_slice %166 {offsets = [28, 0], sizes = [4, 128], strides = [1, 1]} : vector<36x128xf32> to vector<4x128xf32>
    %203 = vector.extract_strided_slice %167 {offsets = [7, 0], sizes = [1, 128], strides = [1, 1]} : vector<9x128xf32> to vector<1x128xf32>
    %204 = vector.broadcast %203 : vector<1x128xf32> to vector<4x128xf32>
    %205 = arith.mulf %202, %204 : vector<4x128xf32>
    %206 = arith.addf %201, %205 : vector<4x128xf32>
    %207 = vector.extract_strided_slice %166 {offsets = [32, 0], sizes = [4, 128], strides = [1, 1]} : vector<36x128xf32> to vector<4x128xf32>
    %208 = vector.extract_strided_slice %167 {offsets = [8, 0], sizes = [1, 128], strides = [1, 1]} : vector<9x128xf32> to vector<1x128xf32>
    %209 = vector.broadcast %208 : vector<1x128xf32> to vector<4x128xf32>
    %210 = arith.mulf %207, %209 : vector<4x128xf32>
    %211 = arith.addf %206, %210 : vector<4x128xf32>
    %c0_65 = arith.constant 0 : index
    %c0_66 = arith.constant 0 : index
    %212 = vector.load %arg19[%c0_65, %c0_66] : memref<1x128xf32, #tpu.memory_space<vmem>>, vector<1x128xf32>
    %213 = vector.broadcast %212 : vector<1x128xf32> to vector<4x128xf32>
    %214 = arith.addf %211, %213 : vector<4x128xf32>
    %cst_67 = arith.constant 0.000000e+00 : f32
    %215 = vector.broadcast %cst_67 : f32 to vector<4x128xf32>
    %216 = arith.maximumf %214, %215 : vector<4x128xf32>
    %cst_68 = arith.constant 6.000000e+00 : f32
    %217 = vector.broadcast %cst_68 : f32 to vector<4x128xf32>
    %218 = arith.minimumf %216, %217 : vector<4x128xf32>
    %219 = arith.truncf %218 : vector<4x128xf32> to vector<4x128xbf16>
    %c0_69 = arith.constant 0 : index
    %c0_70 = arith.constant 0 : index
    %220 = vector.load %arg21[%c0_69, %c0_70] : memref<128x256xbf16, #tpu.memory_space<vmem>>, vector<128x256xbf16>
    %cst_71 = arith.constant dense<0.000000e+00> : vector<4x256xf32>
    %221 = tpu.matmul %219, %220, %cst_71 {dimension_numbers = #tpu.dot_dimension_numbers<[1], [0], [0], [1], [0, 0, 1, 1], [], []>} : vector<4x128xbf16>, vector<128x256xbf16>, vector<4x256xf32> -> vector<4x256xf32>
    %c0_72 = arith.constant 0 : index
    %c0_73 = arith.constant 0 : index
    %222 = vector.load %arg22[%c0_72, %c0_73] : memref<1x256xf32, #tpu.memory_space<vmem>>, vector<1x256xf32>
    %223 = vector.broadcast %222 : vector<1x256xf32> to vector<4x256xf32>
    %224 = arith.addf %221, %223 : vector<4x256xf32>
    %cst_74 = arith.constant 0.000000e+00 : f32
    %225 = vector.broadcast %cst_74 : f32 to vector<4x256xf32>
    %226 = arith.maximumf %224, %225 : vector<4x256xf32>
    %cst_75 = arith.constant 6.000000e+00 : f32
    %227 = vector.broadcast %cst_75 : f32 to vector<4x256xf32>
    %228 = arith.minimumf %226, %227 : vector<4x256xf32>
    %c0_76 = arith.constant 0 : index
    %c0_77 = arith.constant 0 : index
    %c0_78 = arith.constant 0 : index
    %229 = vector.load %arg32[%c0_76, %c0_77, %c0_78] : memref<1x4x256xf32, #tpu.memory_space<vmem>>, vector<1x4x256xf32>
    %230 = vector.shape_cast %229 : vector<1x4x256xf32> to vector<4x256xf32>
    %231 = vector.shape_cast %228 : vector<4x256xf32> to vector<1x4x256xf32>
    tpu.vector_store %arg32[%c0_76, %c0_77, %c0_78], %231 {strides = array<i32>} : memref<1x4x256xf32, #tpu.memory_space<vmem>>, vector<1x4x256xf32>,
    %232 = arith.truncf %228 : vector<4x256xf32> to vector<4x256xbf16>
    %c0_79 = arith.constant 0 : index
    %c0_80 = arith.constant 0 : index
    %233 = vector.load %arg23[%c0_79, %c0_80] : memref<256x64xbf16, #tpu.memory_space<vmem>>, vector<256x64xbf16>
    %cst_81 = arith.constant dense<0.000000e+00> : vector<4x64xf32>
    %234 = tpu.matmul %232, %233, %cst_81 {dimension_numbers = #tpu.dot_dimension_numbers<[1], [0], [0], [1], [0, 0, 1, 1], [], []>} : vector<4x256xbf16>, vector<256x64xbf16>, vector<4x64xf32> -> vector<4x64xf32>
    %c0_82 = arith.constant 0 : index
    %c0_83 = arith.constant 0 : index
    %235 = vector.load %arg24[%c0_82, %c0_83] : memref<1x64xf32, #tpu.memory_space<vmem>>, vector<1x64xf32>
    %236 = vector.broadcast %235 : vector<1x64xf32> to vector<4x64xf32>
    %237 = arith.addf %234, %236 : vector<4x64xf32>
    %cst_84 = arith.constant 0.000000e+00 : f32
    %238 = vector.broadcast %cst_84 : f32 to vector<4x64xf32>
    %239 = arith.maximumf %237, %238 : vector<4x64xf32>
    %cst_85 = arith.constant 6.000000e+00 : f32
    %240 = vector.broadcast %cst_85 : f32 to vector<4x64xf32>
    %241 = arith.minimumf %239, %240 : vector<4x64xf32>
    %c0_86 = arith.constant 0 : index
    %c0_87 = arith.constant 0 : index
    %242 = vector.load %arg27[%c0_86, %c0_87] : memref<9x4xf32, #tpu.memory_space<vmem>>, vector<9x4xf32>
    %cst_88 = arith.constant dense<0.000000e+00> : vector<9x64xf32>
    %243 = tpu.matmul %242, %241, %cst_88 {dimension_numbers = #tpu.dot_dimension_numbers<[1], [0], [0], [1], [0, 0, 1, 1], [], []>} : vector<9x4xf32>, vector<4x64xf32>, vector<9x64xf32> -> vector<9x64xf32>
    %c0_89 = arith.constant 0 : index
    %c0_90 = arith.constant 0 : index
    %244 = vector.load %arg25[%c0_89, %c0_90] : memref<9x64xf32, #tpu.memory_space<vmem>>, vector<9x64xf32>
    %245 = vector.extract_strided_slice %243 {offsets = [0, 0], sizes = [1, 64], strides = [1, 1]} : vector<9x64xf32> to vector<1x64xf32>
    %246 = vector.extract_strided_slice %244 {offsets = [0, 0], sizes = [1, 64], strides = [1, 1]} : vector<9x64xf32> to vector<1x64xf32>
    %247 = arith.mulf %245, %246 : vector<1x64xf32>
    %248 = vector.extract_strided_slice %243 {offsets = [1, 0], sizes = [1, 64], strides = [1, 1]} : vector<9x64xf32> to vector<1x64xf32>
    %249 = vector.extract_strided_slice %244 {offsets = [1, 0], sizes = [1, 64], strides = [1, 1]} : vector<9x64xf32> to vector<1x64xf32>
    %250 = arith.mulf %248, %249 : vector<1x64xf32>
    %251 = arith.addf %247, %250 : vector<1x64xf32>
    %252 = vector.extract_strided_slice %243 {offsets = [2, 0], sizes = [1, 64], strides = [1, 1]} : vector<9x64xf32> to vector<1x64xf32>
    %253 = vector.extract_strided_slice %244 {offsets = [2, 0], sizes = [1, 64], strides = [1, 1]} : vector<9x64xf32> to vector<1x64xf32>
    %254 = arith.mulf %252, %253 : vector<1x64xf32>
    %255 = arith.addf %251, %254 : vector<1x64xf32>
    %256 = vector.extract_strided_slice %243 {offsets = [3, 0], sizes = [1, 64], strides = [1, 1]} : vector<9x64xf32> to vector<1x64xf32>
    %257 = vector.extract_strided_slice %244 {offsets = [3, 0], sizes = [1, 64], strides = [1, 1]} : vector<9x64xf32> to vector<1x64xf32>
    %258 = arith.mulf %256, %257 : vector<1x64xf32>
    %259 = arith.addf %255, %258 : vector<1x64xf32>
    %260 = vector.extract_strided_slice %243 {offsets = [4, 0], sizes = [1, 64], strides = [1, 1]} : vector<9x64xf32> to vector<1x64xf32>
    %261 = vector.extract_strided_slice %244 {offsets = [4, 0], sizes = [1, 64], strides = [1, 1]} : vector<9x64xf32> to vector<1x64xf32>
    %262 = arith.mulf %260, %261 : vector<1x64xf32>
    %263 = arith.addf %259, %262 : vector<1x64xf32>
    %264 = vector.extract_strided_slice %243 {offsets = [5, 0], sizes = [1, 64], strides = [1, 1]} : vector<9x64xf32> to vector<1x64xf32>
    %265 = vector.extract_strided_slice %244 {offsets = [5, 0], sizes = [1, 64], strides = [1, 1]} : vector<9x64xf32> to vector<1x64xf32>
    %266 = arith.mulf %264, %265 : vector<1x64xf32>
    %267 = arith.addf %263, %266 : vector<1x64xf32>
    %268 = vector.extract_strided_slice %243 {offsets = [6, 0], sizes = [1, 64], strides = [1, 1]} : vector<9x64xf32> to vector<1x64xf32>
    %269 = vector.extract_strided_slice %244 {offsets = [6, 0], sizes = [1, 64], strides = [1, 1]} : vector<9x64xf32> to vector<1x64xf32>
    %270 = arith.mulf %268, %269 : vector<1x64xf32>
    %271 = arith.addf %267, %270 : vector<1x64xf32>
    %272 = vector.extract_strided_slice %243 {offsets = [7, 0], sizes = [1, 64], strides = [1, 1]} : vector<9x64xf32> to vector<1x64xf32>
    %273 = vector.extract_strided_slice %244 {offsets = [7, 0], sizes = [1, 64], strides = [1, 1]} : vector<9x64xf32> to vector<1x64xf32>
    %274 = arith.mulf %272, %273 : vector<1x64xf32>
    %275 = arith.addf %271, %274 : vector<1x64xf32>
    %276 = vector.extract_strided_slice %243 {offsets = [8, 0], sizes = [1, 64], strides = [1, 1]} : vector<9x64xf32> to vector<1x64xf32>
    %277 = vector.extract_strided_slice %244 {offsets = [8, 0], sizes = [1, 64], strides = [1, 1]} : vector<9x64xf32> to vector<1x64xf32>
    %278 = arith.mulf %276, %277 : vector<1x64xf32>
    %279 = arith.addf %275, %278 : vector<1x64xf32>
    %c0_91 = arith.constant 0 : index
    %c0_92 = arith.constant 0 : index
    %280 = vector.load %arg26[%c0_91, %c0_92] : memref<1x64xf32, #tpu.memory_space<vmem>>, vector<1x64xf32>
    %281 = arith.addf %279, %280 : vector<1x64xf32>
    %cst_93 = arith.constant 0.000000e+00 : f32
    %282 = vector.broadcast %cst_93 : f32 to vector<1x64xf32>
    %283 = arith.maximumf %281, %282 : vector<1x64xf32>
    %cst_94 = arith.constant 6.000000e+00 : f32
    %284 = vector.broadcast %cst_94 : f32 to vector<1x64xf32>
    %285 = arith.minimumf %283, %284 : vector<1x64xf32>
    %286 = arith.truncf %285 : vector<1x64xf32> to vector<1x64xbf16>
    %c0_95 = arith.constant 0 : index
    %c0_96 = arith.constant 0 : index
    %287 = vector.load %arg28[%c0_95, %c0_96] : memref<64x128xbf16, #tpu.memory_space<vmem>>, vector<64x128xbf16>
    %cst_97 = arith.constant dense<0.000000e+00> : vector<1x128xf32>
    %288 = tpu.matmul %286, %287, %cst_97 {dimension_numbers = #tpu.dot_dimension_numbers<[1], [0], [0], [1], [0, 0, 1, 1], [], []>} : vector<1x64xbf16>, vector<64x128xbf16>, vector<1x128xf32> -> vector<1x128xf32>
    %c0_98 = arith.constant 0 : index
    %c0_99 = arith.constant 0 : index
    %289 = vector.load %arg29[%c0_98, %c0_99] : memref<1x128xf32, #tpu.memory_space<vmem>>, vector<1x128xf32>
    %290 = arith.addf %288, %289 : vector<1x128xf32>
    %cst_100 = arith.constant 0.000000e+00 : f32
    %291 = vector.broadcast %cst_100 : f32 to vector<1x128xf32>
    %292 = arith.maximumf %290, %291 : vector<1x128xf32>
    %cst_101 = arith.constant 6.000000e+00 : f32
    %293 = vector.broadcast %cst_101 : f32 to vector<1x128xf32>
    %294 = arith.minimumf %292, %293 : vector<1x128xf32>
    %c0_102 = arith.constant 0 : index
    %c0_103 = arith.constant 0 : index
    %c0_104 = arith.constant 0 : index
    %295 = vector.load %arg33[%c0_102, %c0_103, %c0_104] : memref<1x1x128xf32, #tpu.memory_space<vmem>>, vector<1x1x128xf32>
    %296 = vector.shape_cast %295 : vector<1x1x128xf32> to vector<1x128xf32>
    %297 = vector.shape_cast %294 : vector<1x128xf32> to vector<1x1x128xf32>
    tpu.vector_store %arg33[%c0_102, %c0_103, %c0_104], %297 {strides = array<i32>} : memref<1x1x128xf32, #tpu.memory_space<vmem>>, vector<1x1x128xf32>,
    return
  }
  func.func @transform_0(%arg0: i32) -> (i32, i32, i32) {
    %c0_i32 = arith.constant 0 : i32
    %c0_i32_0 = arith.constant 0 : i32
    %c0_i32_1 = arith.constant 0 : i32
    return %arg0, %c0_i32, %c0_i32_0 : i32, i32, i32
  }
  func.func @transform_1(%arg0: i32) -> (i32, i32) {
    %c0_i32 = arith.constant 0 : i32
    %c0_i32_0 = arith.constant 0 : i32
    %c0_i32_1 = arith.constant 0 : i32
    return %c0_i32, %c0_i32_0 : i32, i32
  }
  func.func @transform_2(%arg0: i32) -> (i32, i32) {
    %c0_i32 = arith.constant 0 : i32
    %c0_i32_0 = arith.constant 0 : i32
    %c0_i32_1 = arith.constant 0 : i32
    return %c0_i32, %c0_i32_0 : i32, i32
  }
  func.func @transform_3(%arg0: i32) -> (i32, i32) {
    %c0_i32 = arith.constant 0 : i32
    %c0_i32_0 = arith.constant 0 : i32
    %c0_i32_1 = arith.constant 0 : i32
    return %c0_i32, %c0_i32_0 : i32, i32
  }
  func.func @transform_4(%arg0: i32) -> (i32, i32) {
    %c0_i32 = arith.constant 0 : i32
    %c0_i32_0 = arith.constant 0 : i32
    %c0_i32_1 = arith.constant 0 : i32
    return %c0_i32, %c0_i32_0 : i32, i32
  }
  func.func @transform_5(%arg0: i32) -> (i32, i32) {
    %c0_i32 = arith.constant 0 : i32
    %c0_i32_0 = arith.constant 0 : i32
    %c0_i32_1 = arith.constant 0 : i32
    return %c0_i32, %c0_i32_0 : i32, i32
  }
  func.func @transform_6(%arg0: i32) -> (i32, i32) {
    %c0_i32 = arith.constant 0 : i32
    %c0_i32_0 = arith.constant 0 : i32
    %c0_i32_1 = arith.constant 0 : i32
    return %c0_i32, %c0_i32_0 : i32, i32
  }
  func.func @transform_7(%arg0: i32) -> (i32, i32) {
    %c0_i32 = arith.constant 0 : i32
    %c0_i32_0 = arith.constant 0 : i32
    %c0_i32_1 = arith.constant 0 : i32
    return %c0_i32, %c0_i32_0 : i32, i32
  }
  func.func @transform_8(%arg0: i32) -> (i32, i32) {
    %c0_i32 = arith.constant 0 : i32
    %c0_i32_0 = arith.constant 0 : i32
    %c0_i32_1 = arith.constant 0 : i32
    return %c0_i32, %c0_i32_0 : i32, i32
  }
  func.func @transform_9(%arg0: i32) -> (i32, i32) {
    %c0_i32 = arith.constant 0 : i32
    %c0_i32_0 = arith.constant 0 : i32
    %c0_i32_1 = arith.constant 0 : i32
    return %c0_i32, %c0_i32_0 : i32, i32
  }
  func.func @transform_10(%arg0: i32) -> (i32, i32) {
    %c0_i32 = arith.constant 0 : i32
    %c0_i32_0 = arith.constant 0 : i32
    %c0_i32_1 = arith.constant 0 : i32
    return %c0_i32, %c0_i32_0 : i32, i32
  }
  func.func @transform_11(%arg0: i32) -> (i32, i32) {
    %c0_i32 = arith.constant 0 : i32
    %c0_i32_0 = arith.constant 0 : i32
    %c0_i32_1 = arith.constant 0 : i32
    return %c0_i32, %c0_i32_0 : i32, i32
  }
  func.func @transform_12(%arg0: i32) -> (i32, i32) {
    %c0_i32 = arith.constant 0 : i32
    %c0_i32_0 = arith.constant 0 : i32
    %c0_i32_1 = arith.constant 0 : i32
    return %c0_i32, %c0_i32_0 : i32, i32
  }
  func.func @transform_13(%arg0: i32) -> (i32, i32) {
    %c0_i32 = arith.constant 0 : i32
    %c0_i32_0 = arith.constant 0 : i32
    %c0_i32_1 = arith.constant 0 : i32
    return %c0_i32, %c0_i32_0 : i32, i32
  }
  func.func @transform_14(%arg0: i32) -> (i32, i32) {
    %c0_i32 = arith.constant 0 : i32
    %c0_i32_0 = arith.constant 0 : i32
    %c0_i32_1 = arith.constant 0 : i32
    return %c0_i32, %c0_i32_0 : i32, i32
  }
  func.func @transform_15(%arg0: i32) -> (i32, i32) {
    %c0_i32 = arith.constant 0 : i32
    %c0_i32_0 = arith.constant 0 : i32
    %c0_i32_1 = arith.constant 0 : i32
    return %c0_i32, %c0_i32_0 : i32, i32
  }
  func.func @transform_16(%arg0: i32) -> (i32, i32) {
    %c0_i32 = arith.constant 0 : i32
    %c0_i32_0 = arith.constant 0 : i32
    %c0_i32_1 = arith.constant 0 : i32
    return %c0_i32, %c0_i32_0 : i32, i32
  }
  func.func @transform_17(%arg0: i32) -> (i32, i32) {
    %c0_i32 = arith.constant 0 : i32
    %c0_i32_0 = arith.constant 0 : i32
    %c0_i32_1 = arith.constant 0 : i32
    return %c0_i32, %c0_i32_0 : i32, i32
  }
  func.func @transform_18(%arg0: i32) -> (i32, i32) {
    %c0_i32 = arith.constant 0 : i32
    %c0_i32_0 = arith.constant 0 : i32
    %c0_i32_1 = arith.constant 0 : i32
    return %c0_i32, %c0_i32_0 : i32, i32
  }
  func.func @transform_19(%arg0: i32) -> (i32, i32) {
    %c0_i32 = arith.constant 0 : i32
    %c0_i32_0 = arith.constant 0 : i32
    %c0_i32_1 = arith.constant 0 : i32
    return %c0_i32, %c0_i32_0 : i32, i32
  }
  func.func @transform_20(%arg0: i32) -> (i32, i32) {
    %c0_i32 = arith.constant 0 : i32
    %c0_i32_0 = arith.constant 0 : i32
    %c0_i32_1 = arith.constant 0 : i32
    return %c0_i32, %c0_i32_0 : i32, i32
  }
  func.func @transform_21(%arg0: i32) -> (i32, i32) {
    %c0_i32 = arith.constant 0 : i32
    %c0_i32_0 = arith.constant 0 : i32
    %c0_i32_1 = arith.constant 0 : i32
    return %c0_i32, %c0_i32_0 : i32, i32
  }
  func.func @transform_22(%arg0: i32) -> (i32, i32) {
    %c0_i32 = arith.constant 0 : i32
    %c0_i32_0 = arith.constant 0 : i32
    %c0_i32_1 = arith.constant 0 : i32
    return %c0_i32, %c0_i32_0 : i32, i32
  }
  func.func @transform_23(%arg0: i32) -> (i32, i32) {
    %c0_i32 = arith.constant 0 : i32
    %c0_i32_0 = arith.constant 0 : i32
    %c0_i32_1 = arith.constant 0 : i32
    return %c0_i32, %c0_i32_0 : i32, i32
  }
  func.func @transform_24(%arg0: i32) -> (i32, i32) {
    %c0_i32 = arith.constant 0 : i32
    %c0_i32_0 = arith.constant 0 : i32
    %c0_i32_1 = arith.constant 0 : i32
    return %c0_i32, %c0_i32_0 : i32, i32
  }
  func.func @transform_25(%arg0: i32) -> (i32, i32) {
    %c0_i32 = arith.constant 0 : i32
    %c0_i32_0 = arith.constant 0 : i32
    %c0_i32_1 = arith.constant 0 : i32
    return %c0_i32, %c0_i32_0 : i32, i32
  }
  func.func @transform_26(%arg0: i32) -> (i32, i32) {
    %c0_i32 = arith.constant 0 : i32
    %c0_i32_0 = arith.constant 0 : i32
    %c0_i32_1 = arith.constant 0 : i32
    return %c0_i32, %c0_i32_0 : i32, i32
  }
  func.func @transform_27(%arg0: i32) -> (i32, i32) {
    %c0_i32 = arith.constant 0 : i32
    %c0_i32_0 = arith.constant 0 : i32
    %c0_i32_1 = arith.constant 0 : i32
    return %c0_i32, %c0_i32_0 : i32, i32
  }
  func.func @transform_28(%arg0: i32) -> (i32, i32) {
    %c0_i32 = arith.constant 0 : i32
    %c0_i32_0 = arith.constant 0 : i32
    %c0_i32_1 = arith.constant 0 : i32
    return %c0_i32, %c0_i32_0 : i32, i32
  }
  func.func @transform_29(%arg0: i32) -> (i32, i32, i32) {
    %c0_i32 = arith.constant 0 : i32
    %c0_i32_0 = arith.constant 0 : i32
    %c0_i32_1 = arith.constant 0 : i32
    return %arg0, %c0_i32, %c0_i32_0 : i32, i32, i32
  }
  func.func @transform_30(%arg0: i32) -> (i32, i32, i32) {
    %c0_i32 = arith.constant 0 : i32
    %c0_i32_0 = arith.constant 0 : i32
    %c0_i32_1 = arith.constant 0 : i32
    return %arg0, %c0_i32, %c0_i32_0 : i32, i32, i32
  }
  func.func @transform_31(%arg0: i32) -> (i32, i32, i32) {
    %c0_i32 = arith.constant 0 : i32
    %c0_i32_0 = arith.constant 0 : i32
    %c0_i32_1 = arith.constant 0 : i32
    return %arg0, %c0_i32, %c0_i32_0 : i32, i32, i32
  }
  func.func @transform_32(%arg0: i32) -> (i32, i32, i32) {
    %c0_i32 = arith.constant 0 : i32
    %c0_i32_0 = arith.constant 0 : i32
    %c0_i32_1 = arith.constant 0 : i32
    return %arg0, %c0_i32, %c0_i32_0 : i32, i32, i32
  }
}

</mosaic_0001>

<bundles_post_ra>
// kernel: _lambda_.1
= control target key start
LH: loop header
LB: loop body
LE: loop exit
PB: predicated region body
PF: predicated region fallthrough
CT: control target
= control target key end

     0   :  { %s7965_s6 = smov 1   ;;  %s7966_s10 = smov 2   ;;  %s9436_s0 = inlined_call_operand.smem [shape: u32[33], index: -1, kind: input, shape index: {}] }
   0x1   :  { %s8013_s5 = sld [smem:[%s9436_s0]]   ;;  %s7967_s14 = smov 3  }
   0x2   :  { %s8018_s9 = sld [smem:[%s9436_s0 + %s7965_s6]]   ;;  %s7968_s18 = smov 4  }
   0x3   :  { %s8023_s13 = sld [smem:[%s9436_s0 + %s7966_s10]]   ;;  %s7969_s22 = smov 5  }
   0x4   :  { %s8028_s17 = sld [smem:[%s9436_s0 + %s7967_s14]]   ;;  %s7970_s26 = smov 6  }
   0x5   :  { %s8033_s21 = sld [smem:[%s9436_s0 + %s7968_s18]]   ;;  %s7971_s30 = smov 7  }
   0x6   :  { %s8038_s25 = sld [smem:[%s9436_s0 + %s7969_s22]]   ;;  %s7972_s4 = smov 8  }
   0x7   :  { %9455 = sst [smem:[#allocation8_spill]] %s8013_s5  ;;  %s7973_s10 = smov 9  }
   0x8   :  { %9456 = sst [smem:[#allocation9_spill]] %s8018_s9  ;;  %s7974_s15 = smov 10  }
   0x9   :  { %s8043_s29 = sld [smem:[%s9436_s0 + %s7970_s26]]   ;;  %s7975_s20 = smov 11  }
   0xa   :  { %s8048_s3 = sld [smem:[%s9436_s0 + %s7971_s30]]   ;;  %s7976_s26 = smov 12  }
   0xb   :  { %s8053_s8 = sld [smem:[%s9436_s0 + %s7972_s4]]   ;;  %s7977_s1 = smov 13  }
   0xc   :  { %s8058_s14 = sld [smem:[%s9436_s0 + %s7973_s10]]   ;;  %s7978_s7 = smov 14  }
   0xd   :  { %s8063_s19 = sld [smem:[%s9436_s0 + %s7974_s15]]   ;;  %s7979_s15 = smov 15  }
   0xe   :  { %s8068_s24 = sld [smem:[%s9436_s0 + %s7975_s20]]   ;;  %s7980_s22 = smov 16  }
   0xf   :  { %s8073_s30 = sld [smem:[%s9436_s0 + %s7976_s26]]   ;;  %s7981_s28 = smov 17  }
  0x10   :  { %9457 = sst [smem:[#allocation10_spill]] %s8048_s3 }
  0x11   :  { %9458 = sst [smem:[#allocation11_spill]] %s8053_s8 }
  0x12   :  { %s8078_s6 = sld [smem:[%s9436_s0 + %s7977_s1]]  }
  0x13   :  { %s8083_s12 = sld [smem:[%s9436_s0 + %s7978_s7]]   ;;  %s7982_s7 = smov 18  }
  0x14   :  { %9459 = sst [smem:[#allocation12_spill]] %s8068_s24 }
  0x15   :  { %s8088_s20 = sld [smem:[%s9436_s0 + %s7979_s15]]   ;;  %s7983_s15 = smov 19  }
  0x16   :  { %s8093_s27 = sld [smem:[%s9436_s0 + %s7980_s22]]   ;;  %s7984_s22 = smov 20  }
  0x17   :  { %s8098_s4 = sld [smem:[%s9436_s0 + %s7981_s28]]   ;;  %s7985_s28 = smov 21  }
  0x18   :  { %9460 = sst [smem:[#allocation13_spill]] %s8078_s6 }
  0x19   :  { %9461 = sst [smem:[#allocation14_spill]] %s8083_s12 }
  0x1a   :  { %s8103_s12 = sld [smem:[%s9436_s0 + %s7982_s7]]   ;;  %s7986_s7 = smov 22  }
  0x1b   :  { %s8108_s24 = sld [smem:[%s9436_s0 + %s7983_s15]]   ;;  %s7987_s15 = smov 23  }
  0x1c   :  { %9462 = sst [smem:[#allocation15_spill]] %s8093_s27 }
  0x1d   :  { %9463 = sst [smem:[#allocation16_spill]] %s8098_s4 }
  0x1e   :  { %s8113_s27 = sld [smem:[%s9436_s0 + %s7984_s22]]   ;;  %s7988_s22 = smov 24  }
  0x1f   :  { %s8118_s4 = sld [smem:[%s9436_s0 + %s7985_s28]]   ;;  %s7989_s28 = smov 25  }
  0x20   :  { %9464 = sst [smem:[#allocation17_spill]] %s8103_s12 }
  0x21   :  { %9465 = sst [smem:[#allocation18_spill]] %s8108_s24 }
  0x22   :  { %s8123_s12 = sld [smem:[%s9436_s0 + %s7986_s7]]   ;;  %s7990_s7 = smov 26  }
  0x23   :  { %s8128_s24 = sld [smem:[%s9436_s0 + %s7987_s15]]   ;;  %s7991_s15 = smov 27  }
  0x24   :  { %9466 = sst [smem:[#allocation19_spill]] %s8113_s27 }
  0x25   :  { %9467 = sst [smem:[#allocation20_spill]] %s8118_s4 }
  0x26   :  { %s8133_s27 = sld [smem:[%s9436_s0 + %s7988_s22]]   ;;  %s7992_s22 = smov 28  }
  0x27   :  { %s8138_s4 = sld [smem:[%s9436_s0 + %s7989_s28]]   ;;  %s7993_s28 = smov 29  }
  0x28   :  { %9468 = sst [smem:[#allocation21_spill]] %s8123_s12 }
  0x29   :  { %9469 = sst [smem:[#allocation22_spill]] %s8128_s24 }
  0x2a   :  { %s8143_s12 = sld [smem:[%s9436_s0 + %s7990_s7]]   ;;  %s7994_s7 = smov 30  }
  0x2b   :  { %s8148_s24 = sld [smem:[%s9436_s0 + %s7991_s15]]   ;;  %s7995_s15 = smov 31  }
  0x2c   :  { %9470 = sst [smem:[#allocation23_spill]] %s8133_s27 }
  0x2d   :  { %9471 = sst [smem:[#allocation24_spill]] %s8138_s4 }
  0x2e   :  { %s8153_s27 = sld [smem:[%s9436_s0 + %s7992_s22]]   ;;  %s7996_s22 = smov 32  }
  0x2f   :  { %s8158_s4 = sld [smem:[%s9436_s0 + %s7993_s28]]  }
  0x30   :  { %9472 = sst [smem:[#allocation25_spill]] %s8143_s12 }
  0x31   :  { %9473 = sst [smem:[#allocation26_spill]] %s8148_s24 }
  0x32   :  { %s8163_s12 = sld [smem:[%s9436_s0 + %s7994_s7]]  }
  0x33   :  { %s8168_s24 = sld [smem:[%s9436_s0 + %s7995_s15]]  }
  0x34   :  { %9474 = sst [smem:[#allocation27_spill]] %s8153_s27 }
  0x35   :  { %9475 = sst [smem:[#allocation28_spill]] %s8158_s4 }
  0x36   :  { %s8173_s27 = sld [smem:[%s9436_s0 + %s7996_s22]]  }
  0x38   :  { %9476 = sst [smem:[#allocation29_spill]] %s8163_s12 }
  0x39   :  { %71 = vsyncpa [#allocation3], 0 }
  0x3a   :  { %73 = vsyncpa [#allocation3 + $0x1], 0 }
  0x3b   :  { %74 = vsyncpa [#allocation5], 0 }
  0x3c   :  { %76 = vsyncpa [#allocation5 + $0x1], 0  ;;  %s8175_s28 = smov 0   ;;  %s8177_s1 = smov 0  }
  0x3d   :  { %s8179_s2 = smov 0   ;;  %s8181_s7 = smov 0  }
  0x3e LB: > { %s9477_s4 = sld [smem:[#allocation28_spill]]  ;;  %s9478_s9 = sld [smem:[#allocation9_spill]]  ;;  %s7963_s7 = sphi %s8181_s7, %s9504_s7   ;;  %s7959_s2 = sphi %s8179_s2, %s9503_s2   ;;  %s7955_s1 = sphi %s8177_s1, %s9502_s1   ;;  %s7951_s28 = sphi %s8175_s28, %s9501_s28  }
  0x3f   : > { %s9479_s8 = sld [smem:[#allocation11_spill]]  ;;  %s9480_s6 = sld [smem:[#allocation13_spill]] }
  0x40   : > { %s8196_s0 = sadd.s32 4294967295, %s7963_s7   ;;  %s6448_s10 = sadd.s32 4294967294, %s7963_s7  }
  0x41   : > { %s8200_s11 = sadd.s32 1, %s7963_s7   ;;  %s703_s15 = sadd.s32 1, %s7959_s2 }
  0x42   : > { %s700_s16 = ssub.s32 %s7963_s7, %s8200_s11  ;;  %p713_p0 = scmp.ne.s32.totalorder %s7959_s2, %s7955_s1 }
  0x43   : > { %p701_p1 = scmp.eq.s32.totalorder %s700_s16, 0  ;;  %p714_p2 = scmp.eq.s32.totalorder %s8196_s0, 1 }
  0x44   : > { %p719_p3 = scmp.ne.s32.totalorder %s7955_s1, %s7951_s28  ;;  %p720_p4 = scmp.eq.s32.totalorder %s6448_s10, 1 }
  0x45   : > { %s8211_s18 = scalar_select %p701_p1, %s7959_s2, %s703_s15  }
  0x46   : > { %p8213_p5 = por %p714_p2, %p713_p0  ;;  %p8217_p6 = por %p720_p4, %p719_p3 }
  0x47   : > { %p6451_p7 = scmp.ge.s32.totalorder %s7963_s7, 1  ;;  %p908_p8 = scmp.lt.s32.totalorder %s7963_s7, 3 }
  0x49   : > { %p909_p9 = pnand %p6451_p7, %p908_p8 }
  0x4a   : > { %v7437_v0 = vld [vmem:[%s9478_s9 + $0x4] ss:$8 sps:$4 sm:$0xff] (!%p909_p9)   ;;  %v7439_v1 = vld [vmem:[%s9478_s9] ss:$8 sps:$4 sm:$0xff] (!%p909_p9)   ;;  %v7440_v2 = vld [vmem:[%s9478_s9 + $0x14] ss:$8 sps:$4 sm:$0xff] (!%p909_p9)  }
  0x4b   : > { %912 = sbr.rel (%p909_p9) target bundleno = 3636 (0xe34), region = 136  ;;  %2009 = vmatprep.subr.bf16.mxu0 (!%p909_p9), %v7437_v0  ;;  %v7442_v3 = vld [vmem:[%s9478_s9 + $0x10] ss:$8 sps:$4 sm:$0xff] (!%p909_p9)   ;;  %v7443_v4 = vld [vmem:[%s9478_s9 + $0x24] ss:$8 sps:$4 sm:$0xff] (!%p909_p9)   ;;  %s9483_s5 = sld [smem:[#allocation8_spill]] (!%p909_p9) }
  0x4c   : > { %2010 = vmatpush1.bf16.msra.mxu0 (!%p909_p9), %v7439_v1  ;;  %v7445_v5 = vld [vmem:[%s9478_s9 + $0x20] ss:$8 sps:$4 sm:$0xff] (!%p909_p9)   ;;  %p1004_p10 = scmp.lt.s32.totalorder (!%p909_p9), %s8196_s0, 1  ;;  %v7446_v6 = vld [vmem:[%s9478_s9 + $0x34] ss:$8 sps:$4 sm:$0xff] (!%p909_p9)   ;;  %vm1960_vm0 = vcmask (!%p909_p9), 523264  }
  0x4d   : > { %2011 = vmatprep.subr.bf16.mxu0 (!%p909_p9), %v7440_v2  ;;  %v7448_v7 = vld [vmem:[%s9478_s9 + $0x30] ss:$8 sps:$4 sm:$0xff] (!%p909_p9)   ;;  %v7449_v8 = vld [vmem:[%s9478_s9 + $0x44] ss:$8 sps:$4 sm:$0xff] (!%p909_p9)   ;;  %v7451_v9 = vld [vmem:[%s9478_s9 + $0x40] ss:$8 sps:$4 sm:$0xff] (!%p909_p9)  }
  0x4e   : > { %v7452_v10 = vld [vmem:[%s9478_s9 + $0x54] ss:$8 sps:$4 sm:$0xff] (!%p909_p9)   ;;  %v7454_v11 = vld [vmem:[%s9478_s9 + $0x50] ss:$8 sps:$4 sm:$0xff] (!%p909_p9)   ;;  %v7455_v12 = vld [vmem:[%s9478_s9 + $0x64] ss:$8 sps:$4 sm:$0xff] (!%p909_p9)  }
  0x4f   : > { %v7457_v14 = vld [vmem:[%s9478_s9 + $0x60] ss:$8 sps:$4 sm:$0xff] (!%p909_p9)   ;;  %v7458_v15 = vld [vmem:[%s9478_s9 + $0x74] ss:$8 sps:$4 sm:$0xff] (!%p909_p9)   ;;  %v7460_v16 = vld [vmem:[%s9478_s9 + $0x70] ss:$8 sps:$4 sm:$0xff] (!%p909_p9)  }
  0x50   : > { %2012 = vmatpush1.bf16.msra.mxu0 (!%p909_p9), %v7442_v3  ;;  %v7461_v17 = vld [vmem:[%s9478_s9 + $0x84] ss:$8 sps:$4 sm:$0xff] (!%p909_p9)   ;;  %v7463_v18 = vld [vmem:[%s9478_s9 + $0x80] ss:$8 sps:$4 sm:$0xff] (!%p909_p9)   ;;  %v7464_v19 = vld [vmem:[%s9478_s9 + $0x94] ss:$8 sps:$4 sm:$0xff] (!%p909_p9)  }
  0x51   : > { %2013 = vmatprep.subr.bf16.mxu0 (!%p909_p9), %v7443_v4  ;;  %v7466_v20 = vld [vmem:[%s9478_s9 + $0x90] ss:$8 sps:$4 sm:$0xff] (!%p909_p9)   ;;  %v7467_v21 = vld [vmem:[%s9478_s9 + $0xa4] ss:$8 sps:$4 sm:$0xff] (!%p909_p9)   ;;  %v7469_v22 = vld [vmem:[%s9478_s9 + $0xa0] ss:$8 sps:$4 sm:$0xff] (!%p909_p9)  }
  0x52   : > { %s8233_s26 = scalar_select %p1004_p10, %s8196_s0, 1  ;;  %v7470_v23 = vld [vmem:[%s9478_s9 + $0xb4] ss:$8 sps:$4 sm:$0xff]   ;;  %v7472_v24 = vld [vmem:[%s9478_s9 + $0xb0] ss:$8 sps:$4 sm:$0xff]   ;;  %vm7999_vm1 = vmmov 0  }
  0x53   : > { %v7473_v25 = vld [vmem:[%s9478_s9 + $0xc4] ss:$8 sps:$4 sm:$0xff]   ;;  %v7475_v26 = vld [vmem:[%s9478_s9 + $0xc0] ss:$8 sps:$4 sm:$0xff]   ;;  %v7476_v27 = vld [vmem:[%s9478_s9 + $0xd4] ss:$8 sps:$4 sm:$0xff]  }
  0x54   : > { %2014 = vmatpush1.bf16.msra.mxu0 %v7445_v5  ;;  %s7354_s10 = smul.u32 640, %s8233_s26  ;;  %v7478_v28 = vld [vmem:[%s9478_s9 + $0xd0] ss:$8 sps:$4 sm:$0xff]   ;;  %v7479_v29 = vld [vmem:[%s9478_s9 + $0xe4] ss:$8 sps:$4 sm:$0xff]   ;;  %s9484_s3 = sld [smem:[#allocation10_spill]] }
  0x55   : > { %2015 = vmatprep.subr.bf16.mxu0 %v7446_v6  ;;  %v7481_v30 = vld [vmem:[%s9478_s9 + $0xe0] ss:$8 sps:$4 sm:$0xff]   ;;  %v7482_v31 = vld [vmem:[%s9478_s9 + $0xf4] ss:$8 sps:$4 sm:$0xff]   ;;  %v7484_v32 = vld [vmem:[%s9478_s9 + $0xf0] ss:$8 sps:$4 sm:$0xff]  }
  0x56   : > { %s8241_s15 = scalar_lea.vmem %s9483_s5, %s7354_s10  ;;  %v7490_v33 = vld [vmem:[%s9478_s9 + $0x104] ss:$8 sps:$4 sm:$0xff]   ;;  %v7488_v35 = vld [vmem:[%s9478_s9 + $0x100] ss:$8 sps:$4 sm:$0xff]   ;;  %v7496_v37 = vld [vmem:[%s9478_s9 + $0x114] ss:$8 sps:$4 sm:$0xff]  }
  0x57   : > { %v7487_v13 = vld [vmem:[%s8241_s15 + $0x4] ss:$20 sps:$4 sm:$0xff]   ;;  %v7485_v34 = vld [vmem:[%s8241_s15] ss:$20 sps:$4 sm:$0xff]   ;;  %v7493_v40 = vld [vmem:[%s8241_s15 + $0x28] ss:$20 sps:$4 sm:$0xff]  }
  0x58   : > { %2016 = vmatpush1.bf16.msra.mxu0 %v7448_v7  ;;  %2041 = vmatprep.mubr.bf16.mxu0 %v7487_v13  ;;  %v7491_v36 = vld [vmem:[%s8241_s15 + $0x2c] ss:$20 sps:$4 sm:$0xff]   ;;  %v7494_v38 = vld [vmem:[%s9478_s9 + $0x110] ss:$8 sps:$4 sm:$0xff]   ;;  %v7497_v41 = vld [vmem:[%s8241_s15 + $0x54] ss:$20 sps:$4 sm:$0xff]  }
  0x59   : > { %2017 = vmatprep.subr.bf16.mxu0 %v7449_v8  ;;  %v7502_v39 = vld [vmem:[%s9478_s9 + $0x124] ss:$8 sps:$4 sm:$0xff]   ;;  %v7500_v42 = vld [vmem:[%s9478_s9 + $0x120] ss:$8 sps:$4 sm:$0xff]   ;;  %v7508_v43 = vld [vmem:[%s9478_s9 + $0x134] ss:$8 sps:$4 sm:$0xff]  }
  0x5a   : > { %v7506_v44 = vld [vmem:[%s9478_s9 + $0x130] ss:$8 sps:$4 sm:$0xff]   ;;  %v7514_v45 = vld [vmem:[%s9478_s9 + $0x144] ss:$8 sps:$4 sm:$0xff]   ;;  %v7512_v48 = vld [vmem:[%s9478_s9 + $0x140] ss:$8 sps:$4 sm:$0xff]  }
  0x5b   : > { %v7499_v46 = vld [vmem:[%s8241_s15 + $0x50] ss:$20 sps:$4 sm:$0xff]   ;;  %v7520_v49 = vld [vmem:[%s9478_s9 + $0x154] ss:$8 sps:$4 sm:$0xff]   ;;  %v7505_v52 = vld [vmem:[%s8241_s15 + $0x78] ss:$20 sps:$4 sm:$0xff]  }
  0x5c   : > { %2018 = vmatpush1.bf16.msra.mxu0 %v7451_v9  ;;  %v7503_v47 = vld [vmem:[%s8241_s15 + $0x7c] ss:$20 sps:$4 sm:$0xff]   ;;  %v7526_v51 = vld [vmem:[%s9478_s9 + $0x164] ss:$8 sps:$4 sm:$0xff]   ;;  %v7524_v54 = vld [vmem:[%s9478_s9 + $0x160] ss:$8 sps:$4 sm:$0xff]  }
  0x5d   : > { %2019 = vmatprep.subr.bf16.mxu0 %v7452_v10  ;;  %v7518_v50 = vld [vmem:[%s9478_s9 + $0x150] ss:$8 sps:$4 sm:$0xff]   ;;  %v7532_v55 = vld [vmem:[%s9478_s9 + $0x174] ss:$8 sps:$4 sm:$0xff]   ;;  %v7538_v57 = vld [vmem:[%s9478_s9 + $0x184] ss:$8 sps:$4 sm:$0xff]  }
  0x5e   : > { %v7509_v53 = vld [vmem:[%s8241_s15 + $0xa4] ss:$20 sps:$4 sm:$0xff]   ;;  %v7511_v58 = vld [vmem:[%s8241_s15 + $0xa0] ss:$20 sps:$4 sm:$0xff]   ;;  %v7517_v0 = vld [vmem:[%s8241_s15 + $0xc8] ss:$20 sps:$4 sm:$0xff]  }
  0x5f   : > { %v7530_v56 = vld [vmem:[%s9478_s9 + $0x170] ss:$8 sps:$4 sm:$0xff]   ;;  %v7515_v59 = vld [vmem:[%s8241_s15 + $0xcc] ss:$20 sps:$4 sm:$0xff]   ;;  %v7544_v61 = vld [vmem:[%s9478_s9 + $0x194] ss:$8 sps:$4 sm:$0xff]  }
  0x60   : > { %2020 = vmatpush1.bf16.msra.mxu0 %v7454_v11  ;;  %v7536_v60 = vld [vmem:[%s9478_s9 + $0x180] ss:$8 sps:$4 sm:$0xff]   ;;  %v7542_v62 = vld [vmem:[%s9478_s9 + $0x190] ss:$8 sps:$4 sm:$0xff]   ;;  %v7550_v63 = vld [vmem:[%s9478_s9 + $0x1a4] ss:$8 sps:$4 sm:$0xff]  }
  0x61   : > { %2021 = vmatprep.subr.bf16.mxu0 %v7455_v12  ;;  %v7521_v1 = vld [vmem:[%s8241_s15 + $0xf4] ss:$20 sps:$4 sm:$0xff]   ;;  %v7554_v4 = vld [vmem:[%s9478_s9 + $0x1b0] ss:$8 sps:$4 sm:$0xff]   ;;  %v7562_v5 = vld [vmem:[%s9478_s9 + $0x1c4] ss:$8 sps:$4 sm:$0xff]  }
  0x62   : > { %v7548_v2 = vld [vmem:[%s9478_s9 + $0x1a0] ss:$8 sps:$4 sm:$0xff]   ;;  %v7556_v3 = vld [vmem:[%s9478_s9 + $0x1b4] ss:$8 sps:$4 sm:$0xff]   ;;  %v7523_v6 = vld [vmem:[%s8241_s15 + $0xf0] ss:$20 sps:$4 sm:$0xff]  }
  0x63   : > { %v7527_v7 = vld [vmem:[%s8241_s15 + $0x11c] ss:$20 sps:$4 sm:$0xff]   ;;  %v7560_v8 = vld [vmem:[%s9478_s9 + $0x1c0] ss:$8 sps:$4 sm:$0xff]   ;;  %v7574_v11 = vld [vmem:[%s9478_s9 + $0x1e4] ss:$8 sps:$4 sm:$0xff]  }
  0x64   : > { %2022 = vmatpush1.bf16.msra.mxu0 %v7457_v14  ;;  %v7568_v9 = vld [vmem:[%s9478_s9 + $0x1d4] ss:$8 sps:$4 sm:$0xff]   ;;  %v7566_v10 = vld [vmem:[%s9478_s9 + $0x1d0] ss:$8 sps:$4 sm:$0xff]   ;;  %v7572_v14 = vld [vmem:[%s9478_s9 + $0x1e0] ss:$8 sps:$4 sm:$0xff]  }
  0x65   : > { %2023 = vmatprep.subr.bf16.mxu0 %v7458_v15  ;;  %v7529_v12 = vld [vmem:[%s8241_s15 + $0x118] ss:$20 sps:$4 sm:$0xff]   ;;  %v7580_v15 = vld [vmem:[%s9478_s9 + $0x1f4] ss:$8 sps:$4 sm:$0xff]   ;;  %s9112_s16 = sand.u32 1, %s7955_s1   ;;  %s9487_s12 = sld [smem:[#allocation29_spill]] }
  0x66   : > { %v7533_v13 = vld [vmem:[%s8241_s15 + $0x144] ss:$20 sps:$4 sm:$0xff]   ;;  %s6452_s10 = sshll.u32 %s9112_s16, 8  ;;  %vm5509_vm2 = vcmask 130048   ;;  %vm6032_vm3 = vcmask 31744   ;;  %vm6039_vm4 = vcmask 1043456  }
  0x68   : > { %2024 = vmatpush1.bf16.msra.mxu0 %v7460_v16  ;;  %v7578_v16 = vld [vmem:[%s9478_s9 + $0x1f0] ss:$8 sps:$4 sm:$0xff]  }
  0x69   : > { %2025 = vmatprep.subr.bf16.mxu0 %v7461_v17  ;;  %v7586_v17 = vld [vmem:[%s9478_s9 + $0x204] ss:$8 sps:$4 sm:$0xff]  }
  0x6c   : > { %2026 = vmatpush1.bf16.msra.mxu0 %v7463_v18  ;;  %v7535_v18 = vld [vmem:[%s8241_s15 + $0x140] ss:$20 sps:$4 sm:$0xff]  }
  0x6d   : > { %2027 = vmatprep.subr.bf16.mxu0 %v7464_v19  ;;  %v7539_v19 = vld [vmem:[%s8241_s15 + $0x16c] ss:$20 sps:$4 sm:$0xff]  }
  0x70   : > { %2028 = vmatpush1.bf16.msra.mxu0 %v7466_v20  ;;  %v7541_v20 = vld [vmem:[%s8241_s15 + $0x168] ss:$20 sps:$4 sm:$0xff]  }
  0x71   : > { %2029 = vmatprep.subr.bf16.mxu0 %v7467_v21  ;;  %v7545_v21 = vld [vmem:[%s8241_s15 + $0x194] ss:$20 sps:$4 sm:$0xff]  }
  0x74   : > { %2030 = vmatpush1.bf16.msra.mxu0 %v7469_v22  ;;  %v7547_v22 = vld [vmem:[%s8241_s15 + $0x190] ss:$20 sps:$4 sm:$0xff]  }
  0x75   : > { %2031 = vmatprep.subr.bf16.mxu0 %v7470_v23  ;;  %v7551_v23 = vld [vmem:[%s8241_s15 + $0x1bc] ss:$20 sps:$4 sm:$0xff]  }
  0x78   : > { %2032 = vmatpush1.bf16.msra.mxu0 %v7472_v24  ;;  %v7553_v24 = vld [vmem:[%s8241_s15 + $0x1b8] ss:$20 sps:$4 sm:$0xff]  }
  0x79   : > { %2033 = vmatprep.subr.bf16.mxu0 %v7473_v25  ;;  %v7557_v25 = vld [vmem:[%s8241_s15 + $0x1e4] ss:$20 sps:$4 sm:$0xff]  }
  0x7c   : > { %2034 = vmatpush1.bf16.msra.mxu0 %v7475_v26  ;;  %v7559_v26 = vld [vmem:[%s8241_s15 + $0x1e0] ss:$20 sps:$4 sm:$0xff]  }
  0x7d   : > { %2035 = vmatprep.subr.bf16.mxu0 %v7476_v27  ;;  %v7563_v27 = vld [vmem:[%s8241_s15 + $0x20c] ss:$20 sps:$4 sm:$0xff]  }
  0x80   : > { %2036 = vmatpush1.bf16.msra.mxu0 %v7478_v28  ;;  %v7565_v28 = vld [vmem:[%s8241_s15 + $0x208] ss:$20 sps:$4 sm:$0xff]  }
  0x81   : > { %2037 = vmatprep.subr.bf16.mxu0 %v7479_v29  ;;  %v7569_v29 = vld [vmem:[%s8241_s15 + $0x234] ss:$20 sps:$4 sm:$0xff]  }
  0x84   : > { %2038 = vmatpush1.bf16.msra.mxu0 %v7481_v30  ;;  %v7571_v30 = vld [vmem:[%s8241_s15 + $0x230] ss:$20 sps:$4 sm:$0xff]  }
  0x85   : > { %2039 = vmatprep.subr.bf16.mxu0 %v7482_v31  ;;  %v7575_v31 = vld [vmem:[%s8241_s15 + $0x25c] ss:$20 sps:$4 sm:$0xff]  }
  0x88   : > { %2040 = vmatpush1.bf16.msra.mxu0 %v7484_v32  ;;  %v7577_v32 = vld [vmem:[%s8241_s15 + $0x258] ss:$20 sps:$4 sm:$0xff]  }
  0x89   : > { %2202 = vmatprep.subr.bf16.mxu0 %v7490_v33  ;;  %v7583_v33 = vld [vmem:[%s8241_s15 + $0xc] ss:$20 sps:$4 sm:$0xff]  }
  0x8b   : > { %2042 = vmatmul.mubr.bf16.vlgmr.msra.gmra.mrb[0].mxu0 %v7485_v34  ;;  %v7581_v34 = vld [vmem:[%s8241_s15 + $0x8] ss:$20 sps:$4 sm:$0xff]  }
  0x8c   : > { %2051 = vmatprep.mubr.bf16.mxu0 %v7491_v36  ;;  %2203 = vmatpush1.bf16.msra.mxu0 %v7488_v35  ;;  %v7584_v35 = vld [vmem:[%s9478_s9 + $0x200] ss:$8 sps:$4 sm:$0xff]  }
  0x8d   : > { %2204 = vmatprep.subr.bf16.mxu0 %v7496_v37  ;;  %v7587_v36 = vld [vmem:[%s8241_s15 + $0x34] ss:$20 sps:$4 sm:$0xff]  }
  0x8e   : > { %v7601_v37 = vld [vmem:[%s9478_s9 + $0x214] ss:$8 sps:$4 sm:$0xff]  }
  0x90   : > { %2205 = vmatpush1.bf16.msra.mxu0 %v7494_v38  ;;  %v7599_v38 = vld [vmem:[%s9478_s9 + $0x210] ss:$8 sps:$4 sm:$0xff]  }
  0x91   : > { %2206 = vmatprep.subr.bf16.mxu0 %v7502_v39  ;;  %v7616_v39 = vld [vmem:[%s9478_s9 + $0x224] ss:$8 sps:$4 sm:$0xff]  }
  0x93   : > { %2052 = vmatmul.mubr.bf16.gmra.mrb[4].mxu0 %v7493_v40  ;;  %v7589_v40 = vld [vmem:[%s8241_s15 + $0x30] ss:$20 sps:$4 sm:$0xff]  }
  0x94   : > { %2061 = vmatprep.mubr.bf16.mxu0 %v7497_v41  ;;  %2207 = vmatpush1.bf16.msra.mxu0 %v7500_v42  ;;  %v7590_v41 = vld [vmem:[%s8241_s15 + $0x5c] ss:$20 sps:$4 sm:$0xff]   ;;  %v7614_v42 = vld [vmem:[%s9478_s9 + $0x220] ss:$8 sps:$4 sm:$0xff]  }
  0x95   : > { %2208 = vmatprep.subr.bf16.mxu0 %v7508_v43  ;;  %v7631_v43 = vld [vmem:[%s9478_s9 + $0x234] ss:$8 sps:$4 sm:$0xff]  }
  0x98   : > { %2209 = vmatpush1.bf16.msra.mxu0 %v7506_v44  ;;  %v7629_v44 = vld [vmem:[%s9478_s9 + $0x230] ss:$8 sps:$4 sm:$0xff]   ;;  %s6833_s9 = sshll.u32 %s8233_s26, 3 }
  0x99   : > { %2210 = vmatprep.subr.bf16.mxu0 %v7514_v45  ;;  %v7592_v45 = vld [vmem:[%s8241_s15 + $0x58] ss:$20 sps:$4 sm:$0xff]  }
  0x9b   : > { %2062 = vmatmul.mubr.bf16.gmra.mrb[8].mxu0 %v7499_v46  ;;  %v7593_v46 = vld [vmem:[%s8241_s15 + $0x84] ss:$20 sps:$4 sm:$0xff]  }
  0x9c   : > { %2071 = vmatprep.mubr.bf16.mxu0 %v7503_v47  ;;  %2211 = vmatpush1.bf16.msra.mxu0 %v7512_v48  ;;  %v7595_v47 = vld [vmem:[%s8241_s15 + $0x80] ss:$20 sps:$4 sm:$0xff]  }
  0x9d   : > { %2212 = vmatprep.subr.bf16.mxu0 %v7520_v49  ;;  %v7596_v48 = vld [vmem:[%s8241_s15 + $0xac] ss:$20 sps:$4 sm:$0xff]   ;;  %v7598_v49 = vld [vmem:[%s8241_s15 + $0xa8] ss:$20 sps:$4 sm:$0xff]  }
  0xa0   : > { %2213 = vmatpush1.bf16.msra.mxu0 %v7518_v50  ;;  %v7602_v50 = vld [vmem:[%s8241_s15 + $0xd4] ss:$20 sps:$4 sm:$0xff]  }
  0xa1   : > { %2214 = vmatprep.subr.bf16.mxu0 %v7526_v51  ;;  %v7604_v51 = vld [vmem:[%s8241_s15 + $0xd0] ss:$20 sps:$4 sm:$0xff]  }
  0xa3   : > { %2072 = vmatmul.mubr.bf16.gmra.mrb[12].mxu0 %v7505_v52  ;;  %v7605_v52 = vld [vmem:[%s8241_s15 + $0xfc] ss:$20 sps:$4 sm:$0xff]  }
  0xa4   : > { %2081 = vmatprep.mubr.bf16.mxu0 %v7509_v53  ;;  %2215 = vmatpush1.bf16.msra.mxu0 %v7524_v54  ;;  %v7607_v53 = vld [vmem:[%s8241_s15 + $0xf8] ss:$20 sps:$4 sm:$0xff]  }
  0xa5   : > { %2216 = vmatprep.subr.bf16.mxu0 %v7532_v55  ;;  %v7608_v54 = vld [vmem:[%s8241_s15 + $0x124] ss:$20 sps:$4 sm:$0xff]   ;;  %v7610_v55 = vld [vmem:[%s8241_s15 + $0x120] ss:$20 sps:$4 sm:$0xff]  }
  0xa8   : > { %2217 = vmatpush1.bf16.msra.mxu0 %v7530_v56  ;;  %v7611_v56 = vld [vmem:[%s8241_s15 + $0x14c] ss:$20 sps:$4 sm:$0xff]  }
  0xa9   : > { %2218 = vmatprep.subr.bf16.mxu0 %v7538_v57  ;;  %v7613_v57 = vld [vmem:[%s8241_s15 + $0x148] ss:$20 sps:$4 sm:$0xff]  }
  0xab   : > { %2082 = vmatmul.mubr.bf16.gmra.mrb[16].mxu0 %v7511_v58  ;;  %v7617_v58 = vld [vmem:[%s8241_s15 + $0x174] ss:$20 sps:$4 sm:$0xff]  }
  0xac   : > { %2091 = vmatprep.mubr.bf16.mxu0 %v7515_v59  ;;  %2219 = vmatpush1.bf16.msra.mxu0 %v7536_v60  ;;  %v7619_v59 = vld [vmem:[%s8241_s15 + $0x170] ss:$20 sps:$4 sm:$0xff]  }
  0xad   : > { %2220 = vmatprep.subr.bf16.mxu0 %v7544_v61  ;;  %v7620_v60 = vld [vmem:[%s8241_s15 + $0x19c] ss:$20 sps:$4 sm:$0xff]   ;;  %v7622_v61 = vld [vmem:[%s8241_s15 + $0x198] ss:$20 sps:$4 sm:$0xff]  }
  0xb0   : > { %2221 = vmatpush1.bf16.msra.mxu0 %v7542_v62  ;;  %v7623_v62 = vld [vmem:[%s8241_s15 + $0x1c4] ss:$20 sps:$4 sm:$0xff]  }
  0xb1   : > { %2222 = vmatprep.subr.bf16.mxu0 %v7550_v63  ;;  %v7625_v63 = vld [vmem:[%s8241_s15 + $0x1c0] ss:$20 sps:$4 sm:$0xff]  }
  0xb3   : > { %2092 = vmatmul.mubr.bf16.gmra.mrb[20].mxu0 %v7517_v0  ;;  %v7626_v0 = vld [vmem:[%s8241_s15 + $0x1ec] ss:$20 sps:$4 sm:$0xff]  }
  0xb4   : > { %2101 = vmatprep.mubr.bf16.mxu0 %v7521_v1  ;;  %2223 = vmatpush1.bf16.msra.mxu0 %v7548_v2  ;;  %v7628_v1 = vld [vmem:[%s8241_s15 + $0x1e8] ss:$20 sps:$4 sm:$0xff]  }
  0xb5   : > { %2224 = vmatprep.subr.bf16.mxu0 %v7556_v3  ;;  %v7632_v2 = vld [vmem:[%s8241_s15 + $0x214] ss:$20 sps:$4 sm:$0xff]   ;;  %v7634_v3 = vld [vmem:[%s8241_s15 + $0x210] ss:$20 sps:$4 sm:$0xff]  }
  0xb8   : > { %2225 = vmatpush1.bf16.msra.mxu0 %v7554_v4  ;;  %v7635_v4 = vld [vmem:[%s8241_s15 + $0x23c] ss:$20 sps:$4 sm:$0xff]  }
  0xb9   : > { %2226 = vmatprep.subr.bf16.mxu0 %v7562_v5  ;;  %v7637_v5 = vld [vmem:[%s8241_s15 + $0x238] ss:$20 sps:$4 sm:$0xff]  }
  0xbb   : > { %2102 = vmatmul.mubr.bf16.gmra.mrb[24].mxu0 %v7523_v6  ;;  %v7638_v6 = vld [vmem:[%s8241_s15 + $0x264] ss:$20 sps:$4 sm:$0xff]  }
  0xbc   : > { %2111 = vmatprep.mubr.bf16.mxu0 %v7527_v7  ;;  %2227 = vmatpush1.bf16.msra.mxu0 %v7560_v8  ;;  %v7640_v7 = vld [vmem:[%s8241_s15 + $0x260] ss:$20 sps:$4 sm:$0xff]   ;;  %v7997_v8 = vmov 0  }
  0xbd   : > { %2228 = vmatprep.subr.bf16.mxu0 %v7568_v9  ;;  %v7641_v9 = vld [vmem:[%s8241_s15 + $0x10] ss:$20 sps:$4 sm:$0xff]  }
  0xc0   : > { %2229 = vmatpush1.bf16.msra.mxu0 %v7566_v10  ;;  %v7642_v10 = vld [vmem:[%s8241_s15 + $0x38] ss:$20 sps:$4 sm:$0xff]  }
  0xc1   : > { %2230 = vmatprep.subr.bf16.mxu0 %v7574_v11  ;;  %v7643_v11 = vld [vmem:[%s8241_s15 + $0x60] ss:$20 sps:$4 sm:$0xff]  }
  0xc3   : > { %2112 = vmatmul.mubr.bf16.gmra.mrb[28].mxu0 %v7529_v12  ;;  %v7644_v12 = vld [vmem:[%s8241_s15 + $0x88] ss:$20 sps:$4 sm:$0xff]  }
  0xc4   : > { %2121 = vmatprep.mubr.bf16.mxu0 %v7533_v13  ;;  %2231 = vmatpush1.bf16.msra.mxu0 %v7572_v14  ;;  %v7645_v13 = vld [vmem:[%s8241_s15 + $0xb0] ss:$20 sps:$4 sm:$0xff]   ;;  %v7646_v14 = vld [vmem:[%s8241_s15 + $0xd8] ss:$20 sps:$4 sm:$0xff]  }
  0xc5   : > { %2232 = vmatprep.subr.bf16.mxu0 %v7580_v15  ;;  %v7647_v15 = vld [vmem:[%s8241_s15 + $0x100] ss:$20 sps:$4 sm:$0xff]  }
  0xc8   : > { %2233 = vmatpush1.bf16.msra.mxu0 %v7578_v16  ;;  %v7648_v16 = vld [vmem:[%s8241_s15 + $0x128] ss:$20 sps:$4 sm:$0xff]  }
  0xc9   : > { %2395 = vmatprep.subr.bf16.mxu0 %v7586_v17  ;;  %v7649_v17 = vld [vmem:[%s8241_s15 + $0x150] ss:$20 sps:$4 sm:$0xff]  }
  0xcb   : > { %2122 = vmatmul.mubr.bf16.gmra.mrb[32].mxu0 %v7535_v18  ;;  %v7650_v18 = vld [vmem:[%s8241_s15 + $0x178] ss:$20 sps:$4 sm:$0xff]  }
  0xcc   : > { %2131 = vmatprep.mubr.bf16.mxu0 %v7539_v19  ;;  %v7651_v19 = vld [vmem:[%s8241_s15 + $0x1a0] ss:$20 sps:$4 sm:$0xff]  }
  0xd3   : > { %2132 = vmatmul.mubr.bf16.gmra.mrb[36].mxu0 %v7541_v20  ;;  %v7652_v20 = vld [vmem:[%s8241_s15 + $0x1c8] ss:$20 sps:$4 sm:$0xff]  }
  0xd4   : > { %2141 = vmatprep.mubr.bf16.mxu0 %v7545_v21  ;;  %v7653_v21 = vld [vmem:[%s8241_s15 + $0x1f0] ss:$20 sps:$4 sm:$0xff]  }
  0xdb   : > { %2142 = vmatmul.mubr.bf16.gmra.mrb[40].mxu0 %v7547_v22  ;;  %v7654_v22 = vld [vmem:[%s8241_s15 + $0x218] ss:$20 sps:$4 sm:$0xff]  }
  0xdc   : > { %2151 = vmatprep.mubr.bf16.mxu0 %v7551_v23  ;;  %v7655_v23 = vld [vmem:[%s8241_s15 + $0x240] ss:$20 sps:$4 sm:$0xff]  }
  0xe3   : > { %2152 = vmatmul.mubr.bf16.gmra.mrb[44].mxu0 %v7553_v24  ;;  %v7656_v24 = vld [vmem:[%s8241_s15 + $0x268] ss:$20 sps:$4 sm:$0xff]   ;;  %s9123_s15 = scalar_lea.vmem [#allocation2], %s6452_s10  ;;  %s9485_s10 = sld [smem:[#allocation12_spill]] }
  0xe4   : > { %2161 = vmatprep.mubr.bf16.mxu0 %v7557_v25  ;;  %v1190_v25 = vlaneseq }
  0xeb   : > { %2162 = vmatmul.mubr.bf16.gmra.mrb[48].mxu0 %v7559_v26  ;;  %v8415_v26 = vshrl.u32 %v1190_v25, 7 }
  0xec   : > { %2171 = vmatprep.mubr.bf16.mxu0 %v7563_v27 }
  0xed   : > { %v8418_v27 = vsub.s32 0, %v8415_v26 }
  0xf3   : > { %2172 = vmatmul.mubr.bf16.gmra.mrb[52].mxu0 %v7565_v28  ;;  %v1188_v28 = vld [vmem:[%s8023_s13] sm:$0x3] }
  0xf4   : > { %2181 = vmatprep.mubr.bf16.mxu0 %v7569_v29  ;;  %v8422_v29 = vsub.s32 1, %v8415_v26 }
  0xfb   : > { %2182 = vmatmul.mubr.bf16.gmra.mrb[56].mxu0 %v7571_v30  ;;  %v8425_v30 = vrot.slane %v1188_v28, %v8418_v27 }
  0xfc   : > { %2191 = vmatprep.mubr.bf16.mxu0 %v7575_v31  ;;  %v8428_v31 = vrot.slane %v1188_v28, %v8422_v29 }
 0x103   : > { %2192 = vmatmul.mubr.bf16.gmra.mrb[60].mxu0 %v7577_v32 }
 0x104   : > { %2234 = vmatprep.mubr.bf16.mxu0 %v7583_v33 }
 0x10b   : > { %2235 = vmatmul.mubr.bf16.vlgmr.msra.gmra.mrb[0].mxu0 %v7581_v34 }
 0x10c   : > { %2244 = vmatprep.mubr.bf16.mxu0 %v7587_v36  ;;  %2396 = vmatpush1.bf16.msra.mxu0 %v7584_v35 }
 0x10d   : > { %2397 = vmatprep.subr.bf16.mxu0 %v7601_v37 }
 0x110   : > { %2398 = vmatpush1.bf16.msra.mxu0 %v7599_v38 }
 0x111   : > { %2399 = vmatprep.subr.bf16.mxu0 %v7616_v39 }
 0x113   : > { %2245 = vmatmul.mubr.bf16.gmra.mrb[4].mxu0 %v7589_v40 }
 0x114   : > { %2254 = vmatprep.mubr.bf16.mxu0 %v7590_v41  ;;  %2400 = vmatpush1.bf16.msra.mxu0 %v7614_v42 }
 0x115   : > { %2401 = vmatprep.subr.bf16.mxu0 %v7631_v43  ;;  %v2717_v43 = vld [vmem:[%s8038_s25 + $0x8] sm:$0xff] }
 0x116   : > { %2924 = vmatprep.mubr.f32.mxu1 %v2717_v43 }
 0x118   : > { %2402 = vmatpush1.bf16.msra.mxu0 %v7629_v44 }
 0x11b   : > { %2255 = vmatmul.mubr.bf16.gmra.mrb[8].mxu0 %v7592_v45 }
 0x11c   : > { %2264 = vmatprep.mubr.bf16.mxu0 %v7593_v46 }
 0x123   : > { %2265 = vmatmul.mubr.bf16.gmra.mrb[12].mxu0 %v7595_v47 }
 0x124   : > { %2274 = vmatprep.mubr.bf16.mxu0 %v7596_v48 }
 0x12b   : > { %2275 = vmatmul.mubr.bf16.gmra.mrb[16].mxu0 %v7598_v49 }
 0x12c   : > { %2284 = vmatprep.mubr.bf16.mxu0 %v7602_v50 }
 0x133   : > { %2285 = vmatmul.mubr.bf16.gmra.mrb[20].mxu0 %v7604_v51 }
 0x134   : > { %2294 = vmatprep.mubr.bf16.mxu0 %v7605_v52 }
 0x13b   : > { %2295 = vmatmul.mubr.bf16.gmra.mrb[24].mxu0 %v7607_v53 }
 0x13c   : > { %2304 = vmatprep.mubr.bf16.mxu0 %v7608_v54 }
 0x143   : > { %2305 = vmatmul.mubr.bf16.gmra.mrb[28].mxu0 %v7610_v55 }
 0x144   : > { %2314 = vmatprep.mubr.bf16.mxu0 %v7611_v56 }
 0x14b   : > { %2315 = vmatmul.mubr.bf16.gmra.mrb[32].mxu0 %v7613_v57 }
 0x14c   : > { %2324 = vmatprep.mubr.bf16.mxu0 %v7617_v58 }
 0x153   : > { %2325 = vmatmul.mubr.bf16.gmra.mrb[36].mxu0 %v7619_v59 }
 0x154   : > { %2334 = vmatprep.mubr.bf16.mxu0 %v7620_v60 }
 0x15b   : > { %2335 = vmatmul.mubr.bf16.gmra.mrb[40].mxu0 %v7622_v61 }
 0x15c   : > { %2344 = vmatprep.mubr.bf16.mxu0 %v7623_v62 }
 0x163   : > { %2345 = vmatmul.mubr.bf16.gmra.mrb[44].mxu0 %v7625_v63 }
 0x164   : > { %2354 = vmatprep.mubr.bf16.mxu0 %v7626_v0 }
 0x16b   : > { %2355 = vmatmul.mubr.bf16.gmra.mrb[48].mxu0 %v7628_v1 }
 0x16c   : > { %2364 = vmatprep.mubr.bf16.mxu0 %v7632_v2 }
 0x173   : > { %2365 = vmatmul.mubr.bf16.gmra.mrb[52].mxu0 %v7634_v3 }
 0x174   : > { %2374 = vmatprep.mubr.bf16.mxu0 %v7635_v4 }
 0x17b   : > { %2375 = vmatmul.mubr.bf16.gmra.mrb[56].mxu0 %v7637_v5 }
 0x17c   : > { %2384 = vmatprep.mubr.bf16.mxu0 %v7638_v6 }
 0x183   : > { %2385 = vmatmul.mubr.bf16.gmra.mrb[60].mxu0 %v7640_v7 }
 0x184   : > { %2427 = vmatprep.mubr.bf16.mxu0 %v7997_v8 }
 0x18b   : > { %6610 = vmatmul.mubr.msk.bf16.vlgmr.msra.gmra.mrb[0].mxu0 %vm1960_vm0, %v7641_v9 }
 0x18c   : > { %2437 = vmatprep.mubr.bf16.mxu0 %v7997_v8 }
 0x193   : > { %6611 = vmatmul.mubr.msk.bf16.gmra.mrb[4].mxu0 %vm1960_vm0, %v7642_v10 }
 0x194   : > { %2447 = vmatprep.mubr.bf16.mxu0 %v7997_v8 }
 0x19b   : > { %6612 = vmatmul.mubr.msk.bf16.gmra.mrb[8].mxu0 %vm1960_vm0, %v7643_v11 }
 0x19c   : > { %2457 = vmatprep.mubr.bf16.mxu0 %v7997_v8 }
 0x1a3   : > { %6613 = vmatmul.mubr.msk.bf16.gmra.mrb[12].mxu0 %vm1960_vm0, %v7644_v12 }
 0x1a4   : > { %2467 = vmatprep.mubr.bf16.mxu0 %v7997_v8 }
 0x1ab   : > { %6614 = vmatmul.mubr.msk.bf16.gmra.mrb[16].mxu0 %vm1960_vm0, %v7645_v13 }
 0x1ac   : > { %2477 = vmatprep.mubr.bf16.mxu0 %v7997_v8 }
 0x1b3   : > { %6615 = vmatmul.mubr.msk.bf16.gmra.mrb[20].mxu0 %vm1960_vm0, %v7646_v14 }
 0x1b4   : > { %2487 = vmatprep.mubr.bf16.mxu0 %v7997_v8 }
 0x1bb   : > { %6616 = vmatmul.mubr.msk.bf16.gmra.mrb[24].mxu0 %vm1960_vm0, %v7647_v15 }
 0x1bc   : > { %2497 = vmatprep.mubr.bf16.mxu0 %v7997_v8 }
 0x1c3   : > { %6617 = vmatmul.mubr.msk.bf16.gmra.mrb[28].mxu0 %vm1960_vm0, %v7648_v16 }
 0x1c4   : > { %2507 = vmatprep.mubr.bf16.mxu0 %v7997_v8 }
 0x1cb   : > { %6618 = vmatmul.mubr.msk.bf16.gmra.mrb[32].mxu0 %vm1960_vm0, %v7649_v17 }
 0x1cc   : > { %2517 = vmatprep.mubr.bf16.mxu0 %v7997_v8 }
 0x1d3   : > { %6619 = vmatmul.mubr.msk.bf16.gmra.mrb[36].mxu0 %vm1960_vm0, %v7650_v18 }
 0x1d4   : > { %2527 = vmatprep.mubr.bf16.mxu0 %v7997_v8 }
 0x1db   : > { %6620 = vmatmul.mubr.msk.bf16.gmra.mrb[40].mxu0 %vm1960_vm0, %v7651_v19 }
 0x1dc   : > { %2537 = vmatprep.mubr.bf16.mxu0 %v7997_v8 }
 0x1e3   : > { %6621 = vmatmul.mubr.msk.bf16.gmra.mrb[44].mxu0 %vm1960_vm0, %v7652_v20 }
 0x1e4   : > { %2547 = vmatprep.mubr.bf16.mxu0 %v7997_v8 }
 0x1eb   : > { %6622 = vmatmul.mubr.msk.bf16.gmra.mrb[48].mxu0 %vm1960_vm0, %v7653_v21 }
 0x1ec   : > { %2557 = vmatprep.mubr.bf16.mxu0 %v7997_v8 }
 0x1f3   : > { %6623 = vmatmul.mubr.msk.bf16.gmra.mrb[52].mxu0 %vm1960_vm0, %v7654_v22 }
 0x1f4   : > { %2567 = vmatprep.mubr.bf16.mxu0 %v7997_v8 }
 0x1fb   : > { %6624 = vmatmul.mubr.msk.bf16.gmra.mrb[56].mxu0 %vm1960_vm0, %v7655_v23 }
 0x1fc   : > { %2577 = vmatprep.mubr.bf16.mxu0 %v7997_v8 }
 0x203   : > { %6625 = vmatmul.mubr.msk.bf16.gmra.mrb[60].mxu0 %vm1960_vm0, %v7656_v24 }
 0x25e   : > { %v2429_v32 = vpop.f32.mrb[0].mxu0 }
 0x25f   : > { %v7162_v33 = vadd.f32 %v2429_v32, %v8425_v30  ;;  %v2431_v34 = vpop.f32.mrb[1].mxu0 }
 0x260   : > { %v7163_v35 = vadd.f32 %v2431_v34, %v8428_v31  ;;  %v2433_v36 = vpop.f32.mrb[2].mxu0 }
 0x261   : > { %v2588_v37 = vmax.f32 %v7162_v33, 0.0  ;;  %v7164_v38 = vadd.f32 %v2433_v36, %v8425_v30  ;;  %v2435_v39 = vpop.f32.mrb[3].mxu0 }
 0x262   : > { %v2589_v40 = vmax.f32 %v7163_v35, 0.0  ;;  %v7165_v41 = vadd.f32 %v2435_v39, %v8428_v31 }
 0x263   : > { %v2590_v42 = vmax.f32 %v7164_v38, 0.0  ;;  %v2652_v45 = vmin.f32 %v2588_v37, 6.0 }
 0x264   : > { %v2591_v44 = vmax.f32 %v7165_v41, 0.0  ;;  %v2653_v47 = vmin.f32 %v2589_v40, 6.0 }
 0x265   : > { %v2654_v46 = vmin.f32 %v2590_v42, 6.0 }
 0x266   : > { %v2655_v48 = vmin.f32 %v2591_v44, 6.0  ;;  %v2439_v49 = vpop.f32.mrb[4].mxu0 }
 0x267   : > { %v7166_v50 = vadd.f32 %v2439_v49, %v8425_v30  ;;  %v2441_v51 = vpop.f32.mrb[5].mxu0  ;;  %v7081_v52 = vpack.c.bf16 %v2654_v46, %v2652_v45 }
 0x268   : > { %v7167_v53 = vadd.f32 %v2441_v51, %v8428_v31  ;;  %v2443_v54 = vpop.f32.mrb[6].mxu0  ;;  %v7079_v55 = vpack.c.bf16 %v2655_v48, %v2653_v47 }
 0x269   : > { %v2592_v56 = vmax.f32 %v7166_v50, 0.0  ;;  %v7168_v57 = vadd.f32 %v2443_v54, %v8425_v30  ;;  %v2445_v58 = vpop.f32.mrb[7].mxu0 }
 0x26a   : > { %v2593_v59 = vmax.f32 %v7167_v53, 0.0  ;;  %v7169_v60 = vadd.f32 %v2445_v58, %v8428_v31  ;;  %7080 = vmatprep.subr.bf16.mxu1 %v7079_v55 }
 0x26b   : > { %v2594_v61 = vmax.f32 %v7168_v57, 0.0  ;;  %7082 = vmatpush1.bf16.msra.mxu1 %v7081_v52  ;;  %v2656_v63 = vmin.f32 %v2592_v56, 6.0 }
 0x26c   : > { %v2595_v62 = vmax.f32 %v7169_v60, 0.0  ;;  %v2657_v1 = vmin.f32 %v2593_v59, 6.0 }
 0x26d   : > { %v2658_v0 = vmin.f32 %v2594_v61, 6.0 }
 0x26e   : > { %v2659_v2 = vmin.f32 %v2595_v62, 6.0  ;;  %v2449_v3 = vpop.f32.mrb[8].mxu0 }
 0x26f   : > { %v7085_v4 = vpack.c.bf16 %v2658_v0, %v2656_v63  ;;  %v7170_v5 = vadd.f32 %v2449_v3, %v8425_v30  ;;  %v2451_v6 = vpop.f32.mrb[9].mxu0 }
 0x270   : > { %v7083_v7 = vpack.c.bf16 %v2659_v2, %v2657_v1  ;;  %v7171_v9 = vadd.f32 %v2451_v6, %v8428_v31  ;;  %v2453_v10 = vpop.f32.mrb[10].mxu0 }
 0x271   : > { %v2596_v11 = vmax.f32 %v7170_v5, 0.0  ;;  %v7172_v12 = vadd.f32 %v2453_v10, %v8425_v30  ;;  %v2455_v13 = vpop.f32.mrb[11].mxu0 }
 0x272   : > { %v2597_v14 = vmax.f32 %v7171_v9, 0.0  ;;  %v7173_v15 = vadd.f32 %v2455_v13, %v8428_v31  ;;  %7084 = vmatprep.subr.bf16.mxu1 %v7083_v7 }
 0x273   : > { %v2598_v16 = vmax.f32 %v7172_v12, 0.0  ;;  %7086 = vmatpush1.bf16.msra.mxu1 %v7085_v4  ;;  %v2660_v18 = vmin.f32 %v2596_v11, 6.0 }
 0x274   : > { %v2599_v17 = vmax.f32 %v7173_v15, 0.0  ;;  %v2661_v20 = vmin.f32 %v2597_v14, 6.0 }
 0x275   : > { %v2662_v19 = vmin.f32 %v2598_v16, 6.0 }
 0x276   : > { %v2663_v21 = vmin.f32 %v2599_v17, 6.0  ;;  %v2459_v22 = vpop.f32.mrb[12].mxu0 }
 0x277   : > { %v7089_v23 = vpack.c.bf16 %v2662_v19, %v2660_v18  ;;  %v7174_v24 = vadd.f32 %v2459_v22, %v8425_v30  ;;  %v2461_v25 = vpop.f32.mrb[13].mxu0 }
 0x278   : > { %v7087_v28 = vpack.c.bf16 %v2663_v21, %v2661_v20  ;;  %v7175_v32 = vadd.f32 %v2461_v25, %v8428_v31  ;;  %v2463_v33 = vpop.f32.mrb[14].mxu0 }
 0x279   : > { %v2600_v34 = vmax.f32 %v7174_v24, 0.0  ;;  %v7176_v35 = vadd.f32 %v2463_v33, %v8425_v30  ;;  %v2465_v36 = vpop.f32.mrb[15].mxu0 }
 0x27a   : > { %v2601_v37 = vmax.f32 %v7175_v32, 0.0  ;;  %v7177_v38 = vadd.f32 %v2465_v36, %v8428_v31  ;;  %7088 = vmatprep.subr.bf16.mxu1 %v7087_v28 }
 0x27b   : > { %v2602_v39 = vmax.f32 %v7176_v35, 0.0  ;;  %7090 = vmatpush1.bf16.msra.mxu1 %v7089_v23  ;;  %v2664_v41 = vmin.f32 %v2600_v34, 6.0 }
 0x27c   : > { %v2603_v40 = vmax.f32 %v7177_v38, 0.0  ;;  %v2665_v43 = vmin.f32 %v2601_v37, 6.0 }
 0x27d   : > { %v2666_v42 = vmin.f32 %v2602_v39, 6.0 }
 0x27e   : > { %v2667_v44 = vmin.f32 %v2603_v40, 6.0  ;;  %v2469_v45 = vpop.f32.mrb[16].mxu0 }
 0x27f   : > { %v7093_v46 = vpack.c.bf16 %v2666_v42, %v2664_v41  ;;  %v7178_v47 = vadd.f32 %v2469_v45, %v8425_v30  ;;  %v2471_v48 = vpop.f32.mrb[17].mxu0 }
 0x280   : > { %v7091_v49 = vpack.c.bf16 %v2667_v44, %v2665_v43  ;;  %v7179_v50 = vadd.f32 %v2471_v48, %v8428_v31  ;;  %v2473_v51 = vpop.f32.mrb[18].mxu0 }
 0x281   : > { %v2604_v52 = vmax.f32 %v7178_v47, 0.0  ;;  %v7180_v53 = vadd.f32 %v2473_v51, %v8425_v30  ;;  %v2475_v54 = vpop.f32.mrb[19].mxu0 }
 0x282   : > { %v2605_v55 = vmax.f32 %v7179_v50, 0.0  ;;  %v7181_v56 = vadd.f32 %v2475_v54, %v8428_v31  ;;  %7092 = vmatprep.subr.bf16.mxu1 %v7091_v49 }
 0x283   : > { %v2606_v57 = vmax.f32 %v7180_v53, 0.0  ;;  %7094 = vmatpush1.bf16.msra.mxu1 %v7093_v46  ;;  %v2668_v59 = vmin.f32 %v2604_v52, 6.0 }
 0x284   : > { %v2607_v58 = vmax.f32 %v7181_v56, 0.0  ;;  %v2669_v61 = vmin.f32 %v2605_v55, 6.0 }
 0x285   : > { %v2670_v60 = vmin.f32 %v2606_v57, 6.0 }
 0x286   : > { %v2671_v62 = vmin.f32 %v2607_v58, 6.0  ;;  %v2479_v63 = vpop.f32.mrb[20].mxu0 }
 0x287   : > { %v7097_v0 = vpack.c.bf16 %v2670_v60, %v2668_v59  ;;  %v7182_v1 = vadd.f32 %v2479_v63, %v8425_v30  ;;  %v2481_v2 = vpop.f32.mrb[21].mxu0 }
 0x288   : > { %v7095_v3 = vpack.c.bf16 %v2671_v62, %v2669_v61  ;;  %v7183_v4 = vadd.f32 %v2481_v2, %v8428_v31  ;;  %v2483_v5 = vpop.f32.mrb[22].mxu0 }
 0x289   : > { %v2608_v6 = vmax.f32 %v7182_v1, 0.0  ;;  %v7184_v7 = vadd.f32 %v2483_v5, %v8425_v30  ;;  %v2485_v9 = vpop.f32.mrb[23].mxu0 }
 0x28a   : > { %v2609_v10 = vmax.f32 %v7183_v4, 0.0  ;;  %v7185_v11 = vadd.f32 %v2485_v9, %v8428_v31  ;;  %7096 = vmatprep.subr.bf16.mxu1 %v7095_v3 }
 0x28b   : > { %v2610_v12 = vmax.f32 %v7184_v7, 0.0  ;;  %7098 = vmatpush1.bf16.msra.mxu1 %v7097_v0  ;;  %v2672_v14 = vmin.f32 %v2608_v6, 6.0 }
 0x28c   : > { %v2611_v13 = vmax.f32 %v7185_v11, 0.0  ;;  %v2673_v16 = vmin.f32 %v2609_v10, 6.0 }
 0x28d   : > { %v2674_v15 = vmin.f32 %v2610_v12, 6.0 }
 0x28e   : > { %v2675_v17 = vmin.f32 %v2611_v13, 6.0  ;;  %v2489_v18 = vpop.f32.mrb[24].mxu0 }
 0x28f   : > { %v7101_v19 = vpack.c.bf16 %v2674_v15, %v2672_v14  ;;  %v7186_v20 = vadd.f32 %v2489_v18, %v8425_v30  ;;  %v2491_v21 = vpop.f32.mrb[25].mxu0 }
 0x290   : > { %v7099_v22 = vpack.c.bf16 %v2675_v17, %v2673_v16  ;;  %v7187_v23 = vadd.f32 %v2491_v21, %v8428_v31  ;;  %v2493_v24 = vpop.f32.mrb[26].mxu0 }
 0x291   : > { %v2612_v25 = vmax.f32 %v7186_v20, 0.0  ;;  %v7188_v28 = vadd.f32 %v2493_v24, %v8425_v30  ;;  %v2495_v32 = vpop.f32.mrb[27].mxu0 }
 0x292   : > { %v2613_v33 = vmax.f32 %v7187_v23, 0.0  ;;  %v7189_v34 = vadd.f32 %v2495_v32, %v8428_v31  ;;  %7100 = vmatprep.subr.bf16.mxu1 %v7099_v22 }
 0x293   : > { %v2614_v35 = vmax.f32 %v7188_v28, 0.0  ;;  %7102 = vmatpush1.bf16.msra.mxu1 %v7101_v19  ;;  %v2676_v37 = vmin.f32 %v2612_v25, 6.0 }
 0x294   : > { %v2615_v36 = vmax.f32 %v7189_v34, 0.0  ;;  %v2677_v39 = vmin.f32 %v2613_v33, 6.0 }
 0x295   : > { %v2678_v38 = vmin.f32 %v2614_v35, 6.0 }
 0x296   : > { %v2679_v40 = vmin.f32 %v2615_v36, 6.0  ;;  %v2499_v41 = vpop.f32.mrb[28].mxu0 }
 0x297   : > { %v7105_v42 = vpack.c.bf16 %v2678_v38, %v2676_v37  ;;  %v7190_v43 = vadd.f32 %v2499_v41, %v8425_v30  ;;  %v2501_v44 = vpop.f32.mrb[29].mxu0 }
 0x298   : > { %v7103_v45 = vpack.c.bf16 %v2679_v40, %v2677_v39  ;;  %v7191_v46 = vadd.f32 %v2501_v44, %v8428_v31  ;;  %v2503_v47 = vpop.f32.mrb[30].mxu0 }
 0x299   : > { %v2616_v48 = vmax.f32 %v7190_v43, 0.0  ;;  %v7192_v49 = vadd.f32 %v2503_v47, %v8425_v30  ;;  %v2505_v50 = vpop.f32.mrb[31].mxu0 }
 0x29a   : > { %v2617_v51 = vmax.f32 %v7191_v46, 0.0  ;;  %v7193_v52 = vadd.f32 %v2505_v50, %v8428_v31  ;;  %7104 = vmatprep.subr.bf16.mxu1 %v7103_v45 }
 0x29b   : > { %v2618_v53 = vmax.f32 %v7192_v49, 0.0  ;;  %7106 = vmatpush1.bf16.msra.mxu1 %v7105_v42  ;;  %v2680_v55 = vmin.f32 %v2616_v48, 6.0 }
 0x29c   : > { %v2619_v54 = vmax.f32 %v7193_v52, 0.0  ;;  %v2681_v57 = vmin.f32 %v2617_v51, 6.0 }
 0x29d   : > { %v2682_v56 = vmin.f32 %v2618_v53, 6.0 }
 0x29e   : > { %v2683_v58 = vmin.f32 %v2619_v54, 6.0  ;;  %v2509_v59 = vpop.f32.mrb[32].mxu0 }
 0x29f   : > { %v7109_v60 = vpack.c.bf16 %v2682_v56, %v2680_v55  ;;  %v7194_v61 = vadd.f32 %v2509_v59, %v8425_v30  ;;  %v2511_v62 = vpop.f32.mrb[33].mxu0 }
 0x2a0   : > { %v7107_v63 = vpack.c.bf16 %v2683_v58, %v2681_v57  ;;  %v7195_v0 = vadd.f32 %v2511_v62, %v8428_v31  ;;  %v2513_v1 = vpop.f32.mrb[34].mxu0 }
 0x2a1   : > { %v2620_v2 = vmax.f32 %v7194_v61, 0.0  ;;  %v7196_v3 = vadd.f32 %v2513_v1, %v8425_v30  ;;  %v2515_v4 = vpop.f32.mrb[35].mxu0 }
 0x2a2   : > { %v2621_v5 = vmax.f32 %v7195_v0, 0.0  ;;  %v7197_v6 = vadd.f32 %v2515_v4, %v8428_v31  ;;  %7108 = vmatprep.subr.bf16.mxu1 %v7107_v63 }
 0x2a3   : > { %v2622_v7 = vmax.f32 %v7196_v3, 0.0  ;;  %7110 = vmatpush1.bf16.msra.mxu1 %v7109_v60  ;;  %v2684_v10 = vmin.f32 %v2620_v2, 6.0 }
 0x2a4   : > { %v2623_v9 = vmax.f32 %v7197_v6, 0.0  ;;  %v2685_v12 = vmin.f32 %v2621_v5, 6.0 }
 0x2a5   : > { %v2686_v11 = vmin.f32 %v2622_v7, 6.0 }
 0x2a6   : > { %v2687_v13 = vmin.f32 %v2623_v9, 6.0  ;;  %v2519_v14 = vpop.f32.mrb[36].mxu0 }
 0x2a7   : > { %v7113_v15 = vpack.c.bf16 %v2686_v11, %v2684_v10  ;;  %v7198_v16 = vadd.f32 %v2519_v14, %v8425_v30  ;;  %v2521_v17 = vpop.f32.mrb[37].mxu0 }
 0x2a8   : > { %v7111_v18 = vpack.c.bf16 %v2687_v13, %v2685_v12  ;;  %v7199_v19 = vadd.f32 %v2521_v17, %v8428_v31  ;;  %v2523_v20 = vpop.f32.mrb[38].mxu0 }
 0x2a9   : > { %v2624_v21 = vmax.f32 %v7198_v16, 0.0  ;;  %v7200_v22 = vadd.f32 %v2523_v20, %v8425_v30  ;;  %v2525_v23 = vpop.f32.mrb[39].mxu0 }
 0x2aa   : > { %v2625_v24 = vmax.f32 %v7199_v19, 0.0  ;;  %v7201_v25 = vadd.f32 %v2525_v23, %v8428_v31  ;;  %7112 = vmatprep.subr.bf16.mxu1 %v7111_v18 }
 0x2ab   : > { %v2626_v28 = vmax.f32 %v7200_v22, 0.0  ;;  %7114 = vmatpush1.bf16.msra.mxu1 %v7113_v15  ;;  %v2688_v33 = vmin.f32 %v2624_v21, 6.0 }
 0x2ac   : > { %v2627_v32 = vmax.f32 %v7201_v25, 0.0  ;;  %v2689_v35 = vmin.f32 %v2625_v24, 6.0 }
 0x2ad   : > { %v2690_v34 = vmin.f32 %v2626_v28, 6.0 }
 0x2ae   : > { %v2691_v36 = vmin.f32 %v2627_v32, 6.0  ;;  %v2529_v37 = vpop.f32.mrb[40].mxu0 }
 0x2af   : > { %v7117_v38 = vpack.c.bf16 %v2690_v34, %v2688_v33  ;;  %v7202_v39 = vadd.f32 %v2529_v37, %v8425_v30  ;;  %v2531_v40 = vpop.f32.mrb[41].mxu0 }
 0x2b0   : > { %v7115_v41 = vpack.c.bf16 %v2691_v36, %v2689_v35  ;;  %v7203_v42 = vadd.f32 %v2531_v40, %v8428_v31  ;;  %v2533_v43 = vpop.f32.mrb[42].mxu0 }
 0x2b1   : > { %v2628_v44 = vmax.f32 %v7202_v39, 0.0  ;;  %v7204_v45 = vadd.f32 %v2533_v43, %v8425_v30  ;;  %v2535_v46 = vpop.f32.mrb[43].mxu0 }
 0x2b2   : > { %v2629_v47 = vmax.f32 %v7203_v42, 0.0  ;;  %v7205_v48 = vadd.f32 %v2535_v46, %v8428_v31  ;;  %7116 = vmatprep.subr.bf16.mxu1 %v7115_v41 }
 0x2b3   : > { %v2630_v49 = vmax.f32 %v7204_v45, 0.0  ;;  %7118 = vmatpush1.bf16.msra.mxu1 %v7117_v38  ;;  %v2692_v51 = vmin.f32 %v2628_v44, 6.0 }
 0x2b4   : > { %v2631_v50 = vmax.f32 %v7205_v48, 0.0  ;;  %v2693_v53 = vmin.f32 %v2629_v47, 6.0 }
 0x2b5   : > { %v2694_v52 = vmin.f32 %v2630_v49, 6.0 }
 0x2b6   : > { %v2695_v54 = vmin.f32 %v2631_v50, 6.0  ;;  %v2539_v55 = vpop.f32.mrb[44].mxu0 }
 0x2b7   : > { %v7121_v56 = vpack.c.bf16 %v2694_v52, %v2692_v51  ;;  %v7206_v57 = vadd.f32 %v2539_v55, %v8425_v30  ;;  %v2541_v58 = vpop.f32.mrb[45].mxu0 }
 0x2b8   : > { %v7119_v59 = vpack.c.bf16 %v2695_v54, %v2693_v53  ;;  %v7207_v60 = vadd.f32 %v2541_v58, %v8428_v31  ;;  %v2543_v61 = vpop.f32.mrb[46].mxu0 }
 0x2b9   : > { %v2632_v62 = vmax.f32 %v7206_v57, 0.0  ;;  %v7208_v63 = vadd.f32 %v2543_v61, %v8425_v30  ;;  %v2545_v0 = vpop.f32.mrb[47].mxu0 }
 0x2ba   : > { %v2633_v1 = vmax.f32 %v7207_v60, 0.0  ;;  %v7209_v2 = vadd.f32 %v2545_v0, %v8428_v31  ;;  %7120 = vmatprep.subr.bf16.mxu1 %v7119_v59 }
 0x2bb   : > { %v2634_v3 = vmax.f32 %v7208_v63, 0.0  ;;  %7122 = vmatpush1.bf16.msra.mxu1 %v7121_v56  ;;  %v2696_v5 = vmin.f32 %v2632_v62, 6.0 }
 0x2bc   : > { %v2635_v4 = vmax.f32 %v7209_v2, 0.0  ;;  %v2697_v7 = vmin.f32 %v2633_v1, 6.0 }
 0x2bd   : > { %v2698_v6 = vmin.f32 %v2634_v3, 6.0 }
 0x2be   : > { %v2699_v9 = vmin.f32 %v2635_v4, 6.0  ;;  %v2549_v10 = vpop.f32.mrb[48].mxu0 }
 0x2bf   : > { %v7125_v11 = vpack.c.bf16 %v2698_v6, %v2696_v5  ;;  %v7210_v12 = vadd.f32 %v2549_v10, %v8425_v30  ;;  %v2551_v13 = vpop.f32.mrb[49].mxu0 }
 0x2c0   : > { %v7123_v14 = vpack.c.bf16 %v2699_v9, %v2697_v7  ;;  %v7211_v15 = vadd.f32 %v2551_v13, %v8428_v31  ;;  %v2553_v16 = vpop.f32.mrb[50].mxu0 }
 0x2c1   : > { %v2636_v17 = vmax.f32 %v7210_v12, 0.0  ;;  %v7212_v18 = vadd.f32 %v2553_v16, %v8425_v30  ;;  %v2555_v19 = vpop.f32.mrb[51].mxu0 }
 0x2c2   : > { %v2637_v20 = vmax.f32 %v7211_v15, 0.0  ;;  %v7213_v21 = vadd.f32 %v2555_v19, %v8428_v31  ;;  %7124 = vmatprep.subr.bf16.mxu1 %v7123_v14 }
 0x2c3   : > { %v2638_v22 = vmax.f32 %v7212_v18, 0.0  ;;  %7126 = vmatpush1.bf16.msra.mxu1 %v7125_v11  ;;  %v2700_v24 = vmin.f32 %v2636_v17, 6.0 }
 0x2c4   : > { %v2639_v23 = vmax.f32 %v7213_v21, 0.0  ;;  %v2701_v28 = vmin.f32 %v2637_v20, 6.0 }
 0x2c5   : > { %v2702_v25 = vmin.f32 %v2638_v22, 6.0 }
 0x2c6   : > { %v2703_v32 = vmin.f32 %v2639_v23, 6.0  ;;  %v2559_v33 = vpop.f32.mrb[52].mxu0 }
 0x2c7   : > { %v7129_v34 = vpack.c.bf16 %v2702_v25, %v2700_v24  ;;  %v7214_v35 = vadd.f32 %v2559_v33, %v8425_v30  ;;  %v2561_v36 = vpop.f32.mrb[53].mxu0  ;;  %v2716_v25 = vld [vmem:[%s8038_s25] sm:$0xff] }
 0x2c8   : > { %v7127_v37 = vpack.c.bf16 %v2703_v32, %v2701_v28  ;;  %v7215_v38 = vadd.f32 %v2561_v36, %v8428_v31  ;;  %v2563_v39 = vpop.f32.mrb[54].mxu0  ;;  %v2718_v28 = vld [vmem:[%s8038_s25 + $0x10] sm:$0xff]  ;;  %v2721_v32 = vld [vmem:[%s8038_s25 + $0x28] sm:$0xff]  ;;  %v2720_v33 = vld [vmem:[%s8038_s25 + $0x20] sm:$0xff] }
 0x2c9   : > { %v2640_v40 = vmax.f32 %v7214_v35, 0.0  ;;  %v7216_v41 = vadd.f32 %v2563_v39, %v8425_v30  ;;  %v2565_v42 = vpop.f32.mrb[55].mxu0  ;;  %v2722_v35 = vld [vmem:[%s8038_s25 + $0x30] sm:$0xff]  ;;  %v2725_v36 = vld [vmem:[%s8038_s25 + $0x48] sm:$0xff] }
 0x2ca   : > { %v2641_v43 = vmax.f32 %v7215_v38, 0.0  ;;  %v7217_v44 = vadd.f32 %v2565_v42, %v8428_v31  ;;  %7128 = vmatprep.subr.bf16.mxu1 %v7127_v37  ;;  %v2724_v37 = vld [vmem:[%s8038_s25 + $0x40] sm:$0xff]  ;;  %v2727_v38 = vld [vmem:[%s8038_s25 + $0x58] sm:$0xff]  ;;  %v2726_v39 = vld [vmem:[%s8038_s25 + $0x50] sm:$0xff] }
 0x2cb   : > { %v2642_v45 = vmax.f32 %v7216_v41, 0.0  ;;  %7130 = vmatpush1.bf16.msra.mxu1 %v7129_v34  ;;  %v2704_v47 = vmin.f32 %v2640_v40, 6.0  ;;  %v2723_v34 = vld [vmem:[%s8038_s25 + $0x38] sm:$0xff]  ;;  %v2729_v40 = vld [vmem:[%s8038_s25 + $0x68] sm:$0xff]  ;;  %v2728_v41 = vld [vmem:[%s8038_s25 + $0x60] sm:$0xff] }
 0x2cc   : > { %v2643_v46 = vmax.f32 %v7217_v44, 0.0  ;;  %v2705_v49 = vmin.f32 %v2641_v43, 6.0  ;;  %v2731_v42 = vld [vmem:[%s8038_s25 + $0x78] sm:$0xff]  ;;  %v2730_v43 = vld [vmem:[%s8038_s25 + $0x70] sm:$0xff]  ;;  %v2733_v44 = vld [vmem:[%s8038_s25 + $0x88] sm:$0xff] }
 0x2cd   : > { %v2706_v48 = vmin.f32 %v2642_v45, 6.0  ;;  %v2732_v45 = vld [vmem:[%s8038_s25 + $0x80] sm:$0xff] }
 0x2ce   : > { %v2707_v50 = vmin.f32 %v2643_v46, 6.0  ;;  %v2569_v51 = vpop.f32.mrb[56].mxu0  ;;  %v2735_v46 = vld [vmem:[%s8038_s25 + $0x98] sm:$0xff] }
 0x2cf   : > { %v7133_v52 = vpack.c.bf16 %v2706_v48, %v2704_v47  ;;  %v7218_v53 = vadd.f32 %v2569_v51, %v8425_v30  ;;  %v2571_v54 = vpop.f32.mrb[57].mxu0  ;;  %v2734_v47 = vld [vmem:[%s8038_s25 + $0x90] sm:$0xff]  ;;  %v2737_v48 = vld [vmem:[%s8038_s25 + $0xa8] sm:$0xff] }
 0x2d0   : > { %v7131_v55 = vpack.c.bf16 %v2707_v50, %v2705_v49  ;;  %v7219_v56 = vadd.f32 %v2571_v54, %v8428_v31  ;;  %v2573_v57 = vpop.f32.mrb[58].mxu0  ;;  %v2736_v49 = vld [vmem:[%s8038_s25 + $0xa0] sm:$0xff]  ;;  %v2739_v50 = vld [vmem:[%s8038_s25 + $0xb8] sm:$0xff]  ;;  %v2738_v51 = vld [vmem:[%s8038_s25 + $0xb0] sm:$0xff] }
 0x2d1   : > { %v2644_v58 = vmax.f32 %v7218_v53, 0.0  ;;  %v7220_v59 = vadd.f32 %v2573_v57, %v8425_v30  ;;  %v2575_v60 = vpop.f32.mrb[59].mxu0  ;;  %v2740_v53 = vld [vmem:[%s8038_s25 + $0xc0] sm:$0xff]  ;;  %v2743_v54 = vld [vmem:[%s8038_s25 + $0xd8] sm:$0xff] }
 0x2d2   : > { %v2645_v61 = vmax.f32 %v7219_v56, 0.0  ;;  %v7221_v62 = vadd.f32 %v2575_v60, %v8428_v31  ;;  %7132 = vmatprep.subr.bf16.mxu1 %v7131_v55  ;;  %v2742_v55 = vld [vmem:[%s8038_s25 + $0xd0] sm:$0xff]  ;;  %v2745_v56 = vld [vmem:[%s8038_s25 + $0xe8] sm:$0xff]  ;;  %v2744_v57 = vld [vmem:[%s8038_s25 + $0xe0] sm:$0xff] }
 0x2d3   : > { %v2646_v63 = vmax.f32 %v7220_v59, 0.0  ;;  %7134 = vmatpush1.bf16.msra.mxu1 %v7133_v52  ;;  %v2708_v1 = vmin.f32 %v2644_v58, 6.0  ;;  %v2741_v52 = vld [vmem:[%s8038_s25 + $0xc8] sm:$0xff]  ;;  %v2747_v58 = vld [vmem:[%s8038_s25 + $0xf8] sm:$0xff]  ;;  %v2746_v59 = vld [vmem:[%s8038_s25 + $0xf0] sm:$0xff] }
 0x2d4   : > { %v2647_v0 = vmax.f32 %v7221_v62, 0.0  ;;  %v2709_v3 = vmin.f32 %v2645_v61, 6.0  ;;  %v2749_v60 = vld [vmem:[%s8038_s25 + $0x108] sm:$0xff]  ;;  %v2748_v61 = vld [vmem:[%s8038_s25 + $0x100] sm:$0xff]  ;;  %v2751_v62 = vld [vmem:[%s8038_s25 + $0x118] sm:$0xff] }
 0x2d5   : > { %v2710_v2 = vmin.f32 %v2646_v63, 6.0  ;;  %v2750_v63 = vld [vmem:[%s8038_s25 + $0x110] sm:$0xff] }
 0x2d6   : > { %v2711_v4 = vmin.f32 %v2647_v0, 6.0  ;;  %v2579_v5 = vpop.f32.mrb[60].mxu0  ;;  %v2753_v0 = vld [vmem:[%s8038_s25 + $0x128] sm:$0xff] }
 0x2d7   : > { %v7137_v6 = vpack.c.bf16 %v2710_v2, %v2708_v1  ;;  %v7222_v7 = vadd.f32 %v2579_v5, %v8425_v30  ;;  %v2581_v9 = vpop.f32.mrb[61].mxu0  ;;  %v2752_v1 = vld [vmem:[%s8038_s25 + $0x120] sm:$0xff]  ;;  %v2755_v2 = vld [vmem:[%s8038_s25 + $0x138] sm:$0xff] }
 0x2d8   : > { %v7135_v10 = vpack.c.bf16 %v2711_v4, %v2709_v3  ;;  %v7223_v11 = vadd.f32 %v2581_v9, %v8428_v31  ;;  %v2583_v12 = vpop.f32.mrb[62].mxu0  ;;  %v2754_v3 = vld [vmem:[%s8038_s25 + $0x130] sm:$0xff]  ;;  %v2757_v4 = vld [vmem:[%s8038_s25 + $0x148] sm:$0xff]  ;;  %v2759_v9 = vld [vmem:[%s8038_s25 + $0x158] sm:$0xff] }
 0x2d9   : > { %v2648_v13 = vmax.f32 %v7222_v7, 0.0  ;;  %v7224_v14 = vadd.f32 %v2583_v12, %v8425_v30  ;;  %v2585_v15 = vpop.f32.mrb[63].mxu0  ;;  %v7657_v5 = vld [vmem:[%s8043_s29] ss:$16 sps:$4 sm:$0xff]  }
 0x2da   : > { %v2649_v16 = vmax.f32 %v7223_v11, 0.0  ;;  %v7225_v17 = vadd.f32 %v2585_v15, %v8428_v31  ;;  %7136 = vmatprep.subr.bf16.mxu1 %v7135_v10  ;;  %v2719_v31 = vld [vmem:[%s8038_s25 + $0x18] sm:$0xff]  ;;  %v2756_v7 = vld [vmem:[%s8038_s25 + $0x140] sm:$0xff]  ;;  %v2758_v10 = vld [vmem:[%s8038_s25 + $0x150] sm:$0xff] }
 0x2db   : > { %v2650_v18 = vmax.f32 %v7224_v14, 0.0  ;;  %7138 = vmatpush1.bf16.msra.mxu1 %v7137_v6  ;;  %v2712_v20 = vmin.f32 %v2648_v13, 6.0  ;;  %v7659_v6 = vld [vmem:[%s8043_s29 + $0x4] ss:$16 sps:$4 sm:$0xff]   ;;  %v2761_v11 = vld [vmem:[%s8038_s25 + $0x168] sm:$0xff]  ;;  %v2763_v13 = vld [vmem:[%s8038_s25 + $0x178] sm:$0xff] }
 0x2dc   : > { %v2651_v19 = vmax.f32 %v7225_v17, 0.0  ;;  %v2713_v22 = vmin.f32 %v2649_v16, 6.0  ;;  %v2760_v12 = vld [vmem:[%s8038_s25 + $0x160] sm:$0xff]  ;;  %v2762_v14 = vld [vmem:[%s8038_s25 + $0x170] sm:$0xff]  ;;  %v2765_v15 = vld [vmem:[%s8038_s25 + $0x188] sm:$0xff] }
 0x2dd   : > { %v2714_v21 = vmin.f32 %v2650_v18, 6.0  ;;  %v2764_v16 = vld [vmem:[%s8038_s25 + $0x180] sm:$0xff] }
 0x2de   : > { %v2715_v23 = vmin.f32 %v2651_v19, 6.0  ;;  %v7660_v17 = vld [vmem:[%s8043_s29 + $0x20] ss:$16 sps:$4 sm:$0xff]   ;;  %v7662_v18 = vld [vmem:[%s8043_s29 + $0x24] ss:$16 sps:$4 sm:$0xff]   ;;  %v2767_v19 = vld [vmem:[%s8038_s25 + $0x198] sm:$0xff] }
 0x2df   : > { %v7141_v24 = vpack.c.bf16 %v2714_v21, %v2712_v20  ;;  %v2766_v20 = vld [vmem:[%s8038_s25 + $0x190] sm:$0xff]  ;;  %v2769_v21 = vld [vmem:[%s8038_s25 + $0x1a8] sm:$0xff] }
 0x2e0   : > { %v7139_v30 = vpack.c.bf16 %v2715_v23, %v2713_v22  ;;  %v2768_v22 = vld [vmem:[%s8038_s25 + $0x1a0] sm:$0xff]  ;;  %v2771_v23 = vld [vmem:[%s8038_s25 + $0x1b8] sm:$0xff] }
 0x2e2   : > { %7140 = vmatprep.subr.bf16.mxu1 %v7139_v30  ;;  %v2773_v30 = vld [vmem:[%s8038_s25 + $0x1c8] sm:$0xff] }
 0x2e3   : > { %7142 = vmatpush1.bf16.msra.mxu1 %v7141_v24  ;;  %v2770_v24 = vld [vmem:[%s8038_s25 + $0x1b0] sm:$0xff] }
 0x2e4   : > { %4179 = vmatprep.subr.bf16.mxu1 %v7659_v6  ;;  %v2807_v6 = vld [vmem:[%s8038_s25 + $0x2d8] sm:$0xff] }
 0x2e6   : > { %2925 = vmatmul.mubr.f32.vlgmr.msra.gmra.mrb[0].mxu1 %v2716_v25  ;;  %v2772_v25 = vld [vmem:[%s8038_s25 + $0x1c0] sm:$0xff] }
 0x2e7   : > { %2930 = vmatprep.mubr.f32.mxu1 %v2719_v31  ;;  %4180 = vmatpush1.bf16.msra.mxu1 %v7657_v5  ;;  %v2775_v31 = vld [vmem:[%s8038_s25 + $0x1d8] sm:$0xff]  ;;  %v2804_v5 = vld [vmem:[%s8038_s25 + $0x2c0] sm:$0xff] }
 0x2e8   : > { %4181 = vmatprep.subr.bf16.mxu1 %v7662_v18  ;;  %v2814_v18 = vld [vmem:[%s8038_s25 + $0x310] sm:$0xff] }
 0x2ea   : > { %2931 = vmatmul.mubr.f32.gmra.mrb[2].mxu1 %v2718_v28  ;;  %v2774_v28 = vld [vmem:[%s8038_s25 + $0x1d0] sm:$0xff] }
 0x2eb   : > { %2936 = vmatprep.mubr.f32.mxu1 %v2721_v32  ;;  %4182 = vmatpush1.bf16.msra.mxu1 %v7660_v17  ;;  %v7663_v32 = vld [vmem:[%s8043_s29 + $0x40] ss:$16 sps:$4 sm:$0xff]   ;;  %v2815_v17 = vld [vmem:[%s8038_s25 + $0x318] sm:$0xff] }
 0x2ee   : > { %2937 = vmatmul.mubr.f32.gmra.mrb[4].mxu1 %v2720_v33  ;;  %v7665_v33 = vld [vmem:[%s8043_s29 + $0x44] ss:$16 sps:$4 sm:$0xff]  }
 0x2ef   : > { %2942 = vmatprep.mubr.f32.mxu1 %v2723_v34  ;;  %v2777_v34 = vld [vmem:[%s8038_s25 + $0x1e8] sm:$0xff]  ;;  %4183 = vmatprep.subr.bf16.mxu1 %v7665_v33 }
 0x2f0   : > { %4184 = vmatpush1.bf16.msra.mxu1 %v7663_v32  ;;  %v2825_v32 = vld [vmem:[%s8038_s25 + $0x368] sm:$0xff] }
 0x2f2   : > { %2943 = vmatmul.mubr.f32.gmra.mrb[6].mxu1 %v2722_v35  ;;  %v2776_v35 = vld [vmem:[%s8038_s25 + $0x1e0] sm:$0xff] }
 0x2f3   : > { %2948 = vmatprep.mubr.f32.mxu1 %v2725_v36  ;;  %v2779_v36 = vld [vmem:[%s8038_s25 + $0x1f8] sm:$0xff] }
 0x2f6   : > { %2949 = vmatmul.mubr.f32.gmra.mrb[8].mxu1 %v2724_v37  ;;  %v2778_v37 = vld [vmem:[%s8038_s25 + $0x1f0] sm:$0xff] }
 0x2f7   : > { %2954 = vmatprep.mubr.f32.mxu1 %v2727_v38  ;;  %v2781_v38 = vld [vmem:[%s8038_s25 + $0x208] sm:$0xff] }
 0x2fa   : > { %2955 = vmatmul.mubr.f32.gmra.mrb[10].mxu1 %v2726_v39  ;;  %v2780_v39 = vld [vmem:[%s8038_s25 + $0x200] sm:$0xff] }
 0x2fb   : > { %2960 = vmatprep.mubr.f32.mxu1 %v2729_v40  ;;  %v2783_v40 = vld [vmem:[%s8038_s25 + $0x218] sm:$0xff] }
 0x2fe   : > { %2961 = vmatmul.mubr.f32.gmra.mrb[12].mxu1 %v2728_v41  ;;  %v2782_v41 = vld [vmem:[%s8038_s25 + $0x210] sm:$0xff] }
 0x2ff   : > { %2966 = vmatprep.mubr.f32.mxu1 %v2731_v42  ;;  %v2785_v42 = vld [vmem:[%s8038_s25 + $0x228] sm:$0xff] }
 0x302   : > { %2967 = vmatmul.mubr.f32.gmra.mrb[14].mxu1 %v2730_v43  ;;  %v7666_v43 = vld [vmem:[%s8043_s29 + $0x60] ss:$16 sps:$4 sm:$0xff]  }
 0x303   : > { %2972 = vmatprep.mubr.f32.mxu1 %v2733_v44  ;;  %v7668_v44 = vld [vmem:[%s8043_s29 + $0x64] ss:$16 sps:$4 sm:$0xff]  }
 0x304   : > { %4185 = vmatprep.subr.bf16.mxu1 %v7668_v44  ;;  %v2831_v44 = vld [vmem:[%s8038_s25 + $0x398] sm:$0xff] }
 0x305   : > { %4186 = vmatpush1.bf16.msra.mxu1 %v7666_v43  ;;  %v2828_v43 = vld [vmem:[%s8038_s25 + $0x380] sm:$0xff] }
 0x306   : > { %2973 = vmatmul.mubr.f32.gmra.mrb[16].mxu1 %v2732_v45  ;;  %v2784_v45 = vld [vmem:[%s8038_s25 + $0x220] sm:$0xff] }
 0x307   : > { %2978 = vmatprep.mubr.f32.mxu1 %v2735_v46  ;;  %v2787_v46 = vld [vmem:[%s8038_s25 + $0x238] sm:$0xff] }
 0x30a   : > { %2979 = vmatmul.mubr.f32.gmra.mrb[18].mxu1 %v2734_v47  ;;  %v2786_v47 = vld [vmem:[%s8038_s25 + $0x230] sm:$0xff] }
 0x30b   : > { %2984 = vmatprep.mubr.f32.mxu1 %v2737_v48  ;;  %v2789_v48 = vld [vmem:[%s8038_s25 + $0x248] sm:$0xff] }
 0x30e   : > { %2985 = vmatmul.mubr.f32.gmra.mrb[20].mxu1 %v2736_v49  ;;  %v2788_v49 = vld [vmem:[%s8038_s25 + $0x240] sm:$0xff] }
 0x30f   : > { %2990 = vmatprep.mubr.f32.mxu1 %v2739_v50  ;;  %v2791_v50 = vld [vmem:[%s8038_s25 + $0x258] sm:$0xff] }
 0x312   : > { %2991 = vmatmul.mubr.f32.gmra.mrb[22].mxu1 %v2738_v51  ;;  %v2790_v51 = vld [vmem:[%s8038_s25 + $0x250] sm:$0xff] }
 0x313   : > { %2996 = vmatprep.mubr.f32.mxu1 %v2741_v52  ;;  %v2793_v52 = vld [vmem:[%s8038_s25 + $0x268] sm:$0xff] }
 0x316   : > { %2997 = vmatmul.mubr.f32.gmra.mrb[24].mxu1 %v2740_v53  ;;  %v2792_v53 = vld [vmem:[%s8038_s25 + $0x260] sm:$0xff] }
 0x317   : > { %3002 = vmatprep.mubr.f32.mxu1 %v2743_v54  ;;  %v2795_v54 = vld [vmem:[%s8038_s25 + $0x278] sm:$0xff] }
 0x31a   : > { %3003 = vmatmul.mubr.f32.gmra.mrb[26].mxu1 %v2742_v55  ;;  %v7669_v55 = vld [vmem:[%s8043_s29 + $0x80] ss:$16 sps:$4 sm:$0xff]  }
 0x31b   : > { %3008 = vmatprep.mubr.f32.mxu1 %v2745_v56  ;;  %v7671_v56 = vld [vmem:[%s8043_s29 + $0x84] ss:$16 sps:$4 sm:$0xff]  }
 0x31c   : > { %4187 = vmatprep.subr.bf16.mxu1 %v7671_v56 }
 0x31d   : > { %4188 = vmatpush1.bf16.msra.mxu1 %v7669_v55 }
 0x31e   : > { %3009 = vmatmul.mubr.f32.gmra.mrb[28].mxu1 %v2744_v57  ;;  %v2794_v57 = vld [vmem:[%s8038_s25 + $0x270] sm:$0xff] }
 0x31f   : > { %3014 = vmatprep.mubr.f32.mxu1 %v2747_v58  ;;  %v2797_v58 = vld [vmem:[%s8038_s25 + $0x288] sm:$0xff] }
 0x322   : > { %3015 = vmatmul.mubr.f32.gmra.mrb[30].mxu1 %v2746_v59  ;;  %v2796_v59 = vld [vmem:[%s8038_s25 + $0x280] sm:$0xff] }
 0x323   : > { %3020 = vmatprep.mubr.f32.mxu1 %v2749_v60  ;;  %v2799_v60 = vld [vmem:[%s8038_s25 + $0x298] sm:$0xff] }
 0x326   : > { %3021 = vmatmul.mubr.f32.gmra.mrb[32].mxu1 %v2748_v61  ;;  %v2798_v61 = vld [vmem:[%s8038_s25 + $0x290] sm:$0xff] }
 0x327   : > { %3026 = vmatprep.mubr.f32.mxu1 %v2751_v62  ;;  %v2801_v62 = vld [vmem:[%s8038_s25 + $0x2a8] sm:$0xff] }
 0x32a   : > { %3027 = vmatmul.mubr.f32.gmra.mrb[34].mxu1 %v2750_v63  ;;  %v2800_v63 = vld [vmem:[%s8038_s25 + $0x2a0] sm:$0xff] }
 0x32b   : > { %3032 = vmatprep.mubr.f32.mxu1 %v2753_v0  ;;  %v2803_v0 = vld [vmem:[%s8038_s25 + $0x2b8] sm:$0xff] }
 0x32e   : > { %3033 = vmatmul.mubr.f32.gmra.mrb[36].mxu1 %v2752_v1  ;;  %v7672_v1 = vld [vmem:[%s8043_s29 + $0xa0] ss:$16 sps:$4 sm:$0xff]  }
 0x32f   : > { %3038 = vmatprep.mubr.f32.mxu1 %v2755_v2  ;;  %v7674_v2 = vld [vmem:[%s8043_s29 + $0xa4] ss:$16 sps:$4 sm:$0xff]  }
 0x330   : > { %4189 = vmatprep.subr.bf16.mxu1 %v7674_v2  ;;  %v7684_v2 = vld [vmem:[%s8043_s29 + $0x120] ss:$16 sps:$4 sm:$0xff]  }
 0x331   : > { %4190 = vmatpush1.bf16.msra.mxu1 %v7672_v1 }
 0x332   : > { %3039 = vmatmul.mubr.f32.gmra.mrb[38].mxu1 %v2754_v3  ;;  %v2802_v3 = vld [vmem:[%s8038_s25 + $0x2b0] sm:$0xff] }
 0x333   : > { %3044 = vmatprep.mubr.f32.mxu1 %v2757_v4  ;;  %v2805_v4 = vld [vmem:[%s8038_s25 + $0x2c8] sm:$0xff] }
 0x336   : > { %3045 = vmatmul.mubr.f32.gmra.mrb[40].mxu1 %v2756_v7  ;;  %v2806_v7 = vld [vmem:[%s8038_s25 + $0x2d0] sm:$0xff] }
 0x337   : > { %3050 = vmatprep.mubr.f32.mxu1 %v2759_v9  ;;  %v2809_v9 = vld [vmem:[%s8038_s25 + $0x2e8] sm:$0xff] }
 0x33a   : > { %3051 = vmatmul.mubr.f32.gmra.mrb[42].mxu1 %v2758_v10  ;;  %v2808_v10 = vld [vmem:[%s8038_s25 + $0x2e0] sm:$0xff] }
 0x33b   : > { %3056 = vmatprep.mubr.f32.mxu1 %v2761_v11  ;;  %v2811_v11 = vld [vmem:[%s8038_s25 + $0x2f8] sm:$0xff] }
 0x33e   : > { %3057 = vmatmul.mubr.f32.gmra.mrb[44].mxu1 %v2760_v12  ;;  %v2810_v12 = vld [vmem:[%s8038_s25 + $0x2f0] sm:$0xff] }
 0x33f   : > { %3062 = vmatprep.mubr.f32.mxu1 %v2763_v13  ;;  %v2813_v13 = vld [vmem:[%s8038_s25 + $0x308] sm:$0xff] }
 0x342   : > { %3063 = vmatmul.mubr.f32.gmra.mrb[46].mxu1 %v2762_v14  ;;  %v7675_v14 = vld [vmem:[%s8043_s29 + $0xc0] ss:$16 sps:$4 sm:$0xff]  }
 0x343   : > { %3068 = vmatprep.mubr.f32.mxu1 %v2765_v15  ;;  %v7677_v15 = vld [vmem:[%s8043_s29 + $0xc4] ss:$16 sps:$4 sm:$0xff]  }
 0x344   : > { %4191 = vmatprep.subr.bf16.mxu1 %v7677_v15 }
 0x345   : > { %4192 = vmatpush1.bf16.msra.mxu1 %v7675_v14 }
 0x346   : > { %3069 = vmatmul.mubr.f32.gmra.mrb[48].mxu1 %v2764_v16  ;;  %v2812_v16 = vld [vmem:[%s8038_s25 + $0x300] sm:$0xff] }
 0x347   : > { %3074 = vmatprep.mubr.f32.mxu1 %v2767_v19  ;;  %v2817_v19 = vld [vmem:[%s8038_s25 + $0x328] sm:$0xff] }
 0x34a   : > { %3075 = vmatmul.mubr.f32.gmra.mrb[50].mxu1 %v2766_v20  ;;  %v2816_v20 = vld [vmem:[%s8038_s25 + $0x320] sm:$0xff] }
 0x34b   : > { %3080 = vmatprep.mubr.f32.mxu1 %v2769_v21  ;;  %v2819_v21 = vld [vmem:[%s8038_s25 + $0x338] sm:$0xff] }
 0x34e   : > { %3081 = vmatmul.mubr.f32.gmra.mrb[52].mxu1 %v2768_v22  ;;  %v2818_v22 = vld [vmem:[%s8038_s25 + $0x330] sm:$0xff] }
 0x34f   : > { %3086 = vmatprep.mubr.f32.mxu1 %v2771_v23  ;;  %v2821_v23 = vld [vmem:[%s8038_s25 + $0x348] sm:$0xff] }
 0x352   : > { %3087 = vmatmul.mubr.f32.gmra.mrb[54].mxu1 %v2770_v24  ;;  %v7678_v24 = vld [vmem:[%s8043_s29 + $0xe0] ss:$16 sps:$4 sm:$0xff]  }
 0x353   : > { %3092 = vmatprep.mubr.f32.mxu1 %v2773_v30  ;;  %v7680_v30 = vld [vmem:[%s8043_s29 + $0xe4] ss:$16 sps:$4 sm:$0xff]  }
 0x354   : > { %4193 = vmatprep.subr.bf16.mxu1 %v7680_v30 }
 0x355   : > { %4194 = vmatpush1.bf16.msra.mxu1 %v7678_v24 }
 0x356   : > { %3093 = vmatmul.mubr.f32.gmra.mrb[56].mxu1 %v2772_v25  ;;  %v2820_v25 = vld [vmem:[%s8038_s25 + $0x340] sm:$0xff] }
 0x357   : > { %3098 = vmatprep.mubr.f32.mxu1 %v2775_v31  ;;  %v2823_v31 = vld [vmem:[%s8038_s25 + $0x358] sm:$0xff] }
 0x35a   : > { %3099 = vmatmul.mubr.f32.gmra.mrb[58].mxu1 %v2774_v28  ;;  %v2822_v28 = vld [vmem:[%s8038_s25 + $0x350] sm:$0xff] }
 0x35b   : > { %3104 = vmatprep.mubr.f32.mxu1 %v2777_v34 }
 0x35e   : > { %3105 = vmatmul.mubr.f32.gmra.mrb[60].mxu1 %v2776_v35  ;;  %v2824_v35 = vld [vmem:[%s8038_s25 + $0x360] sm:$0xff] }
 0x35f   : > { %3110 = vmatprep.mubr.f32.mxu1 %v2779_v36  ;;  %v2827_v36 = vld [vmem:[%s8038_s25 + $0x378] sm:$0xff] }
 0x362   : > { %3111 = vmatmul.mubr.f32.gmra.mrb[62].mxu1 %v2778_v37 }
 0x363   : > { %3116 = vmatprep.mubr.f32.mxu1 %v2781_v38 }
 0x366   : > { %3117 = vmatmul.mubr.f32.gmra.mrb[64].mxu1 %v2780_v39  ;;  %v2826_v39 = vld [vmem:[%s8038_s25 + $0x370] sm:$0xff] }
 0x367   : > { %3122 = vmatprep.mubr.f32.mxu1 %v2783_v40  ;;  %v2829_v40 = vld [vmem:[%s8038_s25 + $0x388] sm:$0xff] }
 0x36a   : > { %3123 = vmatmul.mubr.f32.gmra.mrb[66].mxu1 %v2782_v41 }
 0x36b   : > { %3128 = vmatprep.mubr.f32.mxu1 %v2785_v42 }
 0x36e   : > { %3129 = vmatmul.mubr.f32.gmra.mrb[68].mxu1 %v2784_v45 }
 0x36f   : > { %3134 = vmatprep.mubr.f32.mxu1 %v2787_v46  ;;  %v7681_v46 = vld [vmem:[%s8043_s29 + $0x100] ss:$16 sps:$4 sm:$0xff]  }
 0x372   : > { %3135 = vmatmul.mubr.f32.gmra.mrb[70].mxu1 %v2786_v47  ;;  %v7683_v47 = vld [vmem:[%s8043_s29 + $0x104] ss:$16 sps:$4 sm:$0xff]  }
 0x373   : > { %3140 = vmatprep.mubr.f32.mxu1 %v2789_v48  ;;  %4195 = vmatprep.subr.bf16.mxu1 %v7683_v47 }
 0x374   : > { %4196 = vmatpush1.bf16.msra.mxu1 %v7681_v46  ;;  %v2847_v46 = vld [vmem:[%s8038_s25 + $0x418] sm:$0xff] }
 0x376   : > { %3141 = vmatmul.mubr.f32.gmra.mrb[72].mxu1 %v2788_v49  ;;  %v2830_v49 = vld [vmem:[%s8038_s25 + $0x390] sm:$0xff] }
 0x377   : > { %3146 = vmatprep.mubr.f32.mxu1 %v2791_v50  ;;  %v2833_v50 = vld [vmem:[%s8038_s25 + $0x3a8] sm:$0xff] }
 0x37a   : > { %3147 = vmatmul.mubr.f32.gmra.mrb[74].mxu1 %v2790_v51 }
 0x37b   : > { %3152 = vmatprep.mubr.f32.mxu1 %v2793_v52 }
 0x37e   : > { %3153 = vmatmul.mubr.f32.gmra.mrb[76].mxu1 %v2792_v53  ;;  %v2832_v53 = vld [vmem:[%s8038_s25 + $0x3a0] sm:$0xff] }
 0x37f   : > { %3158 = vmatprep.mubr.f32.mxu1 %v2795_v54  ;;  %v2835_v54 = vld [vmem:[%s8038_s25 + $0x3b8] sm:$0xff] }
 0x382   : > { %3159 = vmatmul.mubr.f32.gmra.mrb[78].mxu1 %v2794_v57  ;;  %v2834_v57 = vld [vmem:[%s8038_s25 + $0x3b0] sm:$0xff] }
 0x383   : > { %3164 = vmatprep.mubr.f32.mxu1 %v2797_v58  ;;  %v2837_v58 = vld [vmem:[%s8038_s25 + $0x3c8] sm:$0xff] }
 0x386   : > { %3165 = vmatmul.mubr.f32.gmra.mrb[80].mxu1 %v2796_v59 }
 0x387   : > { %3170 = vmatprep.mubr.f32.mxu1 %v2799_v60 }
 0x38a   : > { %3171 = vmatmul.mubr.f32.gmra.mrb[82].mxu1 %v2798_v61  ;;  %v8662_v61 = vld [vmem:[%s8028_s17] sm:$0xff] }
 0x38b   : > { %3176 = vmatprep.mubr.f32.mxu1 %v2801_v62  ;;  %v2836_v62 = vld [vmem:[%s8038_s25 + $0x3c0] sm:$0xff] }
 0x38e   : > { %3177 = vmatmul.mubr.f32.gmra.mrb[84].mxu1 %v2800_v63  ;;  %v8666_v63 = vld [vmem:[%s8028_s17 + $0x8] sm:$0xff] }
 0x38f   : > { %3182 = vmatprep.mubr.f32.mxu1 %v2803_v0  ;;  %v2839_v0 = vld [vmem:[%s8038_s25 + $0x3d8] sm:$0xff] }
 0x392   : > { %3183 = vmatmul.mubr.f32.gmra.mrb[86].mxu1 %v2802_v3  ;;  %v7686_v3 = vld [vmem:[%s8043_s29 + $0x124] ss:$16 sps:$4 sm:$0xff]  }
 0x393   : > { %3188 = vmatprep.mubr.f32.mxu1 %v2805_v4  ;;  %v8675_v4 = vrot.slane %v8662_v61, %v8418_v27  ;;  %4197 = vmatprep.subr.bf16.mxu1 %v7686_v3  ;;  %v7689_v3 = vld [vmem:[%s8043_s29 + $0x144] ss:$16 sps:$4 sm:$0xff]  }
 0x394   : > { %4198 = vmatpush1.bf16.msra.mxu1 %v7684_v2 }
 0x395   : > { %4199 = vmatprep.subr.bf16.mxu1 %v7689_v3 }
 0x396   : > { %3189 = vmatmul.mubr.f32.gmra.mrb[88].mxu1 %v2804_v5 }
 0x397   : > { %3194 = vmatprep.mubr.f32.mxu1 %v2807_v6  ;;  %v8681_v6 = vrot.slane %v8662_v61, %v8422_v29 }
 0x39a   : > { %3195 = vmatmul.mubr.f32.gmra.mrb[90].mxu1 %v2806_v7  ;;  %v8685_v7 = vrot.slane %v8666_v63, %v8418_v27 }
 0x39b   : > { %3200 = vmatprep.mubr.f32.mxu1 %v2809_v9  ;;  %v8689_v9 = vrot.slane %v8666_v63, %v8422_v29 }
 0x39e   : > { %3201 = vmatmul.mubr.f32.gmra.mrb[92].mxu1 %v2808_v10  ;;  %v2838_v10 = vld [vmem:[%s8038_s25 + $0x3d0] sm:$0xff] }
 0x39f   : > { %3206 = vmatprep.mubr.f32.mxu1 %v2811_v11  ;;  %v2841_v11 = vld [vmem:[%s8038_s25 + $0x3e8] sm:$0xff] }
 0x3a2   : > { %3207 = vmatmul.mubr.f32.gmra.mrb[94].mxu1 %v2810_v12 }
 0x3a3   : > { %3212 = vmatprep.mubr.f32.mxu1 %v2813_v13 }
 0x3a6   : > { %3213 = vmatmul.mubr.f32.gmra.mrb[96].mxu1 %v2812_v16 }
 0x3a7   : > { %3218 = vmatprep.mubr.f32.mxu1 %v2815_v17 }
 0x3aa   : > { %3219 = vmatmul.mubr.f32.gmra.mrb[98].mxu1 %v2814_v18  ;;  %v2840_v18 = vld [vmem:[%s8038_s25 + $0x3e0] sm:$0xff] }
 0x3ab   : > { %3224 = vmatprep.mubr.f32.mxu1 %v2817_v19 }
 0x3ae   : > { %3225 = vmatmul.mubr.f32.gmra.mrb[100].mxu1 %v2816_v20  ;;  %v2843_v20 = vld [vmem:[%s8038_s25 + $0x3f8] sm:$0xff] }
 0x3af   : > { %3230 = vmatprep.mubr.f32.mxu1 %v2819_v21 }
 0x3b2   : > { %3231 = vmatmul.mubr.f32.gmra.mrb[102].mxu1 %v2818_v22 }
 0x3b3   : > { %3236 = vmatprep.mubr.f32.mxu1 %v2821_v23 }
 0x3b6   : > { %3237 = vmatmul.mubr.f32.gmra.mrb[104].mxu1 %v2820_v25 }
 0x3b7   : > { %3242 = vmatprep.mubr.f32.mxu1 %v2823_v31 }
 0x3b9   : > { %v8619_v33 = vpop.f32.mrb[0].mxu1 }
 0x3ba   : > { %v8621_v34 = vpop.f32.mrb[1].mxu1  ;;  %3243 = vmatmul.mubr.f32.gmra.mrb[106].mxu1 %v2822_v28  ;;  %v3369_v13 = vmul.f32 %v8675_v4, %v8619_v33  ;;  %v2842_v28 = vld [vmem:[%s8038_s25 + $0x3f0] sm:$0xff]  ;;  %v2845_v33 = vld [vmem:[%s8038_s25 + $0x408] sm:$0xff] }
 0x3bb   : > { %3248 = vmatprep.mubr.f32.mxu1 %v2825_v32  ;;  %v3370_v16 = vmul.f32 %v8685_v7, %v8621_v34 }
 0x3bd   : > { %v8625_v37 = vpop.f32.mrb[2].mxu1 }
 0x3be   : > { %v8627_v38 = vpop.f32.mrb[3].mxu1  ;;  %3249 = vmatmul.mubr.f32.gmra.mrb[108].mxu1 %v2824_v35  ;;  %v3371_v23 = vmul.f32 %v8675_v4, %v8625_v37 }
 0x3bf   : > { %3254 = vmatprep.mubr.f32.mxu1 %v2827_v36  ;;  %v3372_v25 = vmul.f32 %v8685_v7, %v8627_v38 }
 0x3c1   : > { %v8631_v41 = vpop.f32.mrb[4].mxu1 }
 0x3c2   : > { %v8633_v42 = vpop.f32.mrb[5].mxu1  ;;  %3255 = vmatmul.mubr.f32.gmra.mrb[110].mxu1 %v2826_v39  ;;  %v3373_v36 = vmul.f32 %v8675_v4, %v8631_v41 }
 0x3c3   : > { %3260 = vmatprep.mubr.f32.mxu1 %v2829_v40  ;;  %v3374_v38 = vmul.f32 %v8685_v7, %v8633_v42 }
 0x3c5   : > { %v8637_v45 = vpop.f32.mrb[6].mxu1 }
 0x3c6   : > { %v8641_v48 = vpop.f32.mrb[7].mxu1  ;;  %3261 = vmatmul.mubr.f32.gmra.mrb[112].mxu1 %v2828_v43  ;;  %v2844_v43 = vld [vmem:[%s8038_s25 + $0x400] sm:$0xff] }
 0x3c7   : > { %3266 = vmatprep.mubr.f32.mxu1 %v2831_v44  ;;  %v3376_v42 = vmul.f32 %v8685_v7, %v8641_v48 }
 0x3c9   : > { %v8645_v51 = vpop.f32.mrb[8].mxu1 }
 0x3ca   : > { %v8647_v52 = vpop.f32.mrb[9].mxu1  ;;  %3267 = vmatmul.mubr.f32.gmra.mrb[114].mxu1 %v2830_v49  ;;  %v3375_v49 = vmul.f32 %v8675_v4, %v8637_v45  ;;  %v7687_v45 = vld [vmem:[%s8043_s29 + $0x140] ss:$16 sps:$4 sm:$0xff]  }
 0x3cb   : > { %3272 = vmatprep.mubr.f32.mxu1 %v2833_v50  ;;  %4200 = vmatpush1.bf16.msra.mxu1 %v7687_v45  ;;  %v2856_v45 = vld [vmem:[%s8038_s25 + $0x460] sm:$0xff] }
 0x3cd   : > { %v8651_v55 = vpop.f32.mrb[10].mxu1 }
 0x3ce   : > { %v8653_v56 = vpop.f32.mrb[11].mxu1  ;;  %3273 = vmatmul.mubr.f32.gmra.mrb[116].mxu1 %v2832_v53 }
 0x3cf   : > { %3278 = vmatprep.mubr.f32.mxu1 %v2835_v54 }
 0x3d1   : > { %v8657_v59 = vpop.f32.mrb[12].mxu1 }
 0x3d2   : > { %v8659_v60 = vpop.f32.mrb[13].mxu1  ;;  %3279 = vmatmul.mubr.f32.gmra.mrb[118].mxu1 %v2834_v57  ;;  %v2846_v57 = vld [vmem:[%s8038_s25 + $0x410] sm:$0xff] }
 0x3d3   : > { %3284 = vmatprep.mubr.f32.mxu1 %v2837_v58 }
 0x3d5   : > { %v8669_v1 = vpop.f32.mrb[14].mxu1 }
 0x3d6   : > { %v8677_v5 = vpop.f32.mrb[15].mxu1  ;;  %3285 = vmatmul.mubr.f32.gmra.mrb[120].mxu1 %v2836_v62  ;;  %v2849_v62 = vld [vmem:[%s8038_s25 + $0x428] sm:$0xff] }
 0x3d7   : > { %3290 = vmatprep.mubr.f32.mxu1 %v2839_v0 }
 0x3d9   : > { %v2974_v12 = vpop.f32.mrb[16].mxu1 }
 0x3da   : > { %v3393_v14 = vmul.f32 %v8681_v6, %v2974_v12  ;;  %v2976_v15 = vpop.f32.mrb[17].mxu1  ;;  %3291 = vmatmul.mubr.f32.gmra.mrb[122].mxu1 %v2838_v10  ;;  %v3377_v10 = vmul.f32 %v8675_v4, %v8645_v51  ;;  %v3378_v12 = vmul.f32 %v8685_v7, %v8647_v52 }
 0x3db   : > { %v3394_v17 = vmul.f32 %v8689_v9, %v2976_v15  ;;  %3296 = vmatprep.mubr.f32.mxu1 %v2841_v11 }
 0x3dc   : > { %v8700_v19 = vadd.f32 %v3393_v14, %v3369_v13  ;;  %v2848_v14 = vld [vmem:[%s8038_s25 + $0x420] sm:$0xff] }
 0x3dd   : > { %v8703_v21 = vadd.f32 %v3394_v17, %v3370_v16  ;;  %v2980_v22 = vpop.f32.mrb[18].mxu1  ;;  %v2851_v16 = vld [vmem:[%s8038_s25 + $0x438] sm:$0xff] }
 0x3de   : > { %v3395_v24 = vmul.f32 %v8681_v6, %v2980_v22  ;;  %v2982_v30 = vpop.f32.mrb[19].mxu1  ;;  %3297 = vmatmul.mubr.f32.gmra.mrb[124].mxu1 %v2840_v18  ;;  %v3379_v18 = vmul.f32 %v8675_v4, %v8651_v55  ;;  %v3380_v22 = vmul.f32 %v8685_v7, %v8653_v56  ;;  %v3381_v55 = vmul.f32 %v8675_v4, %v8657_v59 }
 0x3df   : > { %v3396_v31 = vmul.f32 %v8689_v9, %v2982_v30  ;;  %3302 = vmatprep.mubr.f32.mxu1 %v2843_v20  ;;  %v8771_v56 = vsub.s32 2, %v8415_v26 }
 0x3e0   : > { %v8712_v32 = vadd.f32 %v3395_v24, %v3371_v23  ;;  %v2850_v24 = vld [vmem:[%s8038_s25 + $0x430] sm:$0xff] }
 0x3e1   : > { %v8715_v34 = vadd.f32 %v3396_v31, %v3372_v25  ;;  %v2986_v35 = vpop.f32.mrb[20].mxu1  ;;  %v2853_v25 = vld [vmem:[%s8038_s25 + $0x448] sm:$0xff] }
 0x3e2   : > { %v3397_v37 = vmul.f32 %v8681_v6, %v2986_v35  ;;  %v2988_v39 = vpop.f32.mrb[21].mxu1  ;;  %3303 = vmatmul.mubr.f32.gmra.mrb[126].mxu1 %v2842_v28 }
 0x3e3   : > { %v3398_v40 = vmul.f32 %v8689_v9, %v2988_v39  ;;  %3308 = vmatprep.mubr.f32.mxu1 %v2845_v33  ;;  %v2852_v39 = vld [vmem:[%s8038_s25 + $0x440] sm:$0xff] }
 0x3e4   : > { %v8724_v44 = vadd.f32 %v3397_v37, %v3373_v36  ;;  %v3382_v36 = vmul.f32 %v8685_v7, %v8659_v60 }
 0x3e5   : > { %v8727_v47 = vadd.f32 %v3398_v40, %v3374_v38  ;;  %v2992_v41 = vpop.f32.mrb[22].mxu1  ;;  %v2855_v40 = vld [vmem:[%s8038_s25 + $0x458] sm:$0xff] }
 0x3e6   : > { %v3399_v50 = vmul.f32 %v8681_v6, %v2992_v41  ;;  %v2994_v53 = vpop.f32.mrb[23].mxu1  ;;  %3309 = vmatmul.mubr.f32.gmra.mrb[128].mxu1 %v2844_v43 }
 0x3e7   : > { %v3400_v54 = vmul.f32 %v8689_v9, %v2994_v53  ;;  %3314 = vmatprep.mubr.f32.mxu1 %v2847_v46  ;;  %v3383_v46 = vmul.f32 %v8675_v4, %v8669_v1  ;;  %v2854_v1 = vld [vmem:[%s8038_s25 + $0x450] sm:$0xff] }
 0x3e8   : > { %v8736_v58 = vadd.f32 %v3399_v50, %v3375_v49  ;;  %v8787_v49 = vrot.slane %v8662_v61, %v8771_v56  ;;  %v3384_v50 = vmul.f32 %v8685_v7, %v8677_v5 }
 0x3e9   : > { %v8739_v0 = vadd.f32 %v3400_v54, %v3376_v42  ;;  %v2998_v2 = vpop.f32.mrb[24].mxu1  ;;  %v8794_v42 = vrot.slane %v8666_v63, %v8771_v56 }
 0x3ea   : > { %v3401_v11 = vmul.f32 %v8681_v6, %v2998_v2  ;;  %v3000_v48 = vpop.f32.mrb[25].mxu1  ;;  %3315 = vmatmul.mubr.f32.gmra.mrb[130].mxu1 %v2846_v57  ;;  %v7692_v2 = vld [vmem:[%s8043_s29 + $0x164] ss:$16 sps:$4 sm:$0xff]  }
 0x3eb   : > { %v3402_v13 = vmul.f32 %v8689_v9, %v3000_v48  ;;  %3320 = vmatprep.mubr.f32.mxu1 %v2849_v62  ;;  %v7690_v62 = vld [vmem:[%s8043_s29 + $0x160] ss:$16 sps:$4 sm:$0xff]   ;;  %4201 = vmatprep.subr.bf16.mxu1 %v7692_v2 }
 0x3ec   : > { %v8750_v15 = vadd.f32 %v3401_v11, %v3377_v10  ;;  %v2859_v10 = vld [vmem:[%s8038_s25 + $0x478] sm:$0xff]  ;;  %4202 = vmatpush1.bf16.msra.mxu1 %v7690_v62 }
 0x3ed   : > { %v8753_v17 = vadd.f32 %v3402_v13, %v3378_v12  ;;  %v3004_v51 = vpop.f32.mrb[26].mxu1 }
 0x3ee   : > { %v3403_v20 = vmul.f32 %v8681_v6, %v3004_v51  ;;  %v3006_v52 = vpop.f32.mrb[27].mxu1  ;;  %3321 = vmatmul.mubr.f32.gmra.mrb[132].mxu1 %v2848_v14 }
 0x3ef   : > { %v3404_v23 = vmul.f32 %v8689_v9, %v3006_v52  ;;  %3326 = vmatprep.mubr.f32.mxu1 %v2851_v16  ;;  %v2858_v16 = vld [vmem:[%s8038_s25 + $0x470] sm:$0xff] }
 0x3f0   : > { %v8762_v30 = vadd.f32 %v3403_v20, %v3379_v18 }
 0x3f1   : > { %v8765_v31 = vadd.f32 %v3404_v23, %v3380_v22  ;;  %v3010_v28 = vpop.f32.mrb[28].mxu1 }
 0x3f2   : > { %v3405_v33 = vmul.f32 %v8681_v6, %v3010_v28  ;;  %v3012_v35 = vpop.f32.mrb[29].mxu1  ;;  %3327 = vmatmul.mubr.f32.gmra.mrb[134].mxu1 %v2850_v24 }
 0x3f3   : > { %v3406_v37 = vmul.f32 %v8689_v9, %v3012_v35  ;;  %3332 = vmatprep.mubr.f32.mxu1 %v2853_v25 }
 0x3f4   : > { %v8777_v38 = vadd.f32 %v3405_v33, %v3381_v55 }
 0x3f5   : > { %v8780_v59 = vadd.f32 %v3406_v37, %v3382_v36  ;;  %v3016_v43 = vpop.f32.mrb[30].mxu1 }
 0x3f6   : > { %v3407_v41 = vmul.f32 %v8681_v6, %v3016_v43  ;;  %v3018_v60 = vpop.f32.mrb[31].mxu1  ;;  %3333 = vmatmul.mubr.f32.gmra.mrb[136].mxu1 %v2852_v39  ;;  %v2857_v6 = vld [vmem:[%s8038_s25 + $0x468] sm:$0xff]  ;;  %v7695_v43 = vld [vmem:[%s8043_s29 + $0x184] ss:$16 sps:$4 sm:$0xff]  }
 0x3f7   : > { %v3408_v53 = vmul.f32 %v8689_v9, %v3018_v60  ;;  %3338 = vmatprep.mubr.f32.mxu1 %v2855_v40  ;;  %v7693_v40 = vld [vmem:[%s8043_s29 + $0x180] ss:$16 sps:$4 sm:$0xff]   ;;  %4203 = vmatprep.subr.bf16.mxu1 %v7695_v43 }
 0x3f8   : > { %v8797_v4 = vadd.f32 %v3407_v41, %v3383_v46  ;;  %4204 = vmatpush1.bf16.msra.mxu1 %v7693_v40 }
 0x3f9   : > { %v8800_v54 = vadd.f32 %v3408_v53, %v3384_v50  ;;  %v3022_v57 = vpop.f32.mrb[32].mxu1 }
 0x3fa   : > { %v3433_v5 = vmul.f32 %v8787_v49, %v3022_v57  ;;  %v3024_v7 = vpop.f32.mrb[33].mxu1  ;;  %3339 = vmatmul.mubr.f32.gmra.mrb[138].mxu1 %v2854_v1 }
 0x3fb   : > { %v3434_v9 = vmul.f32 %v8794_v42, %v3024_v7  ;;  %3344 = vmatprep.mubr.f32.mxu1 %v2857_v6 }
 0x3fc   : > { %v3449_v3 = vadd.f32 %v3433_v5, %v8700_v19 }
 0x3fd   : > { %v3450_v11 = vadd.f32 %v3434_v9, %v8703_v21  ;;  %v3028_v48 = vpop.f32.mrb[34].mxu1 }
 0x3fe   : > { %v3435_v12 = vmul.f32 %v8787_v49, %v3028_v48  ;;  %v3030_v13 = vpop.f32.mrb[35].mxu1  ;;  %3345 = vmatmul.mubr.f32.gmra.mrb[140].mxu1 %v2856_v45 }
 0x3ff   : > { %v3436_v14 = vmul.f32 %v8794_v42, %v3030_v13  ;;  %3350 = vmatprep.mubr.f32.mxu1 %v2859_v10 }
 0x400   : > { %v3451_v51 = vadd.f32 %v3435_v12, %v8712_v32 }
 0x401   : > { %v3452_v18 = vadd.f32 %v3436_v14, %v8715_v34  ;;  %v3034_v20 = vpop.f32.mrb[36].mxu1  ;;  %v7696_v14 = vld [vmem:[%s8043_s29 + $0x1a0] ss:$16 sps:$4 sm:$0xff]  }
 0x402   : > { %v3437_v19 = vmul.f32 %v8787_v49, %v3034_v20  ;;  %v3036_v52 = vpop.f32.mrb[37].mxu1  ;;  %3351 = vmatmul.mubr.f32.gmra.mrb[142].mxu1 %v2858_v16  ;;  %v7698_v16 = vld [vmem:[%s8043_s29 + $0x1a4] ss:$16 sps:$4 sm:$0xff]  }
 0x403   : > { %v3438_v21 = vmul.f32 %v8794_v42, %v3036_v52  ;;  %4205 = vmatprep.subr.bf16.mxu1 %v7698_v16 }
 0x404   : > { %v3453_v22 = vadd.f32 %v3437_v19, %v8724_v44  ;;  %4206 = vmatpush1.bf16.msra.mxu1 %v7696_v14 }
 0x405   : > { %v3454_v23 = vadd.f32 %v3438_v21, %v8727_v47  ;;  %v3040_v24 = vpop.f32.mrb[38].mxu1 }
 0x406   : > { %v3439_v25 = vmul.f32 %v8787_v49, %v3040_v24  ;;  %v3042_v28 = vpop.f32.mrb[39].mxu1 }
 0x407   : > { %v3440_v32 = vmul.f32 %v8794_v42, %v3042_v28 }
 0x408   : > { %v3455_v34 = vadd.f32 %v3439_v25, %v8736_v58 }
 0x409   : > { %v3456_v55 = vadd.f32 %v3440_v32, %v8739_v0  ;;  %v3046_v33 = vpop.f32.mrb[40].mxu1 }
 0x40a   : > { %v3441_v35 = vmul.f32 %v8787_v49, %v3046_v33  ;;  %v3048_v36 = vpop.f32.mrb[41].mxu1 }
 0x40b   : > { %v3442_v37 = vmul.f32 %v8794_v42, %v3048_v36 }
 0x40c   : > { %v3457_v44 = vadd.f32 %v3441_v35, %v8750_v15 }
 0x40d   : > { %v3458_v47 = vadd.f32 %v3442_v37, %v8753_v17  ;;  %v3052_v39 = vpop.f32.mrb[42].mxu1  ;;  %v8835_v17 = vsub.s32 3, %v8415_v26 }
 0x40e   : > { %v3443_v46 = vmul.f32 %v8787_v49, %v3052_v39  ;;  %v3054_v41 = vpop.f32.mrb[43].mxu1 }
 0x40f   : > { %v3444_v58 = vmul.f32 %v8794_v42, %v3054_v41  ;;  %v3472_v7 = vrot.slane %v8666_v63, %v8835_v17 }
 0x410   : > { %v3459_v0 = vadd.f32 %v3443_v46, %v8762_v30 }
 0x411   : > { %v3460_v60 = vadd.f32 %v3444_v58, %v8765_v31  ;;  %v3058_v50 = vpop.f32.mrb[44].mxu1  ;;  %v3468_v31 = vrot.slane %v8662_v61, %v8835_v17 }
 0x412   : > { %v3445_v53 = vmul.f32 %v8787_v49, %v3058_v50  ;;  %v3060_v15 = vpop.f32.mrb[45].mxu1 }
 0x413   : > { %v3446_v1 = vmul.f32 %v8794_v42, %v3060_v15 }
 0x414   : > { %v3461_v6 = vadd.f32 %v3445_v53, %v8777_v38 }
 0x415   : > { %v3462_v57 = vadd.f32 %v3446_v1, %v8780_v59  ;;  %v3064_v62 = vpop.f32.mrb[46].mxu1  ;;  %v7699_v1 = vld [vmem:[%s8043_s29 + $0x1c0] ss:$16 sps:$4 sm:$0xff]  }
 0x416   : > { %v3447_v30 = vmul.f32 %v8787_v49, %v3064_v62  ;;  %v3066_v2 = vpop.f32.mrb[47].mxu1  ;;  %v7701_v62 = vld [vmem:[%s8043_s29 + $0x1c4] ss:$16 sps:$4 sm:$0xff]  }
 0x417   : > { %v3448_v5 = vmul.f32 %v8794_v42, %v3066_v2  ;;  %4207 = vmatprep.subr.bf16.mxu1 %v7701_v62 }
 0x418   : > { %v3463_v9 = vadd.f32 %v3447_v30, %v8797_v4  ;;  %4208 = vmatpush1.bf16.msra.mxu1 %v7699_v1 }
 0x419   : > { %v3464_v38 = vadd.f32 %v3448_v5, %v8800_v54  ;;  %v3070_v45 = vpop.f32.mrb[48].mxu1 }
 0x41a   : > { %v3473_v59 = vmul.f32 %v3468_v31, %v3070_v45  ;;  %v3072_v10 = vpop.f32.mrb[49].mxu1 }
 0x41b   : > { %v3474_v48 = vmul.f32 %v3472_v7, %v3072_v10 }
 0x41c   : > { %v3489_v12 = vadd.f32 %v3473_v59, %v3449_v3 }
 0x41d   : > { %v3490_v13 = vadd.f32 %v3474_v48, %v3450_v11  ;;  %v3076_v49 = vpop.f32.mrb[50].mxu1 }
 0x41e   : > { %v3475_v20 = vmul.f32 %v3468_v31, %v3076_v49  ;;  %v3078_v19 = vpop.f32.mrb[51].mxu1 }
 0x41f   : > { %v3476_v52 = vmul.f32 %v3472_v7, %v3078_v19 }
 0x420   : > { %v3491_v42 = vadd.f32 %v3475_v20, %v3451_v51 }
 0x421   : > { %v3492_v21 = vadd.f32 %v3476_v52, %v3452_v18  ;;  %v3082_v24 = vpop.f32.mrb[52].mxu1 }
 0x422   : > { %v3477_v4 = vmul.f32 %v3468_v31, %v3082_v24  ;;  %v3084_v25 = vpop.f32.mrb[53].mxu1 }
 0x423   : > { %v3478_v54 = vmul.f32 %v3472_v7, %v3084_v25 }
 0x424   : > { %v3493_v28 = vadd.f32 %v3477_v4, %v3453_v22 }
 0x425   : > { %v3494_v32 = vadd.f32 %v3478_v54, %v3454_v23  ;;  %v3088_v33 = vpop.f32.mrb[54].mxu1 }
 0x426   : > { %v3479_v35 = vmul.f32 %v3468_v31, %v3088_v33  ;;  %v3090_v3 = vpop.f32.mrb[55].mxu1 }
 0x427   : > { %v3480_v11 = vmul.f32 %v3472_v7, %v3090_v3 }
 0x428   : > { %v3495_v36 = vadd.f32 %v3479_v35, %v3455_v34  ;;  %v8853_v34 = vsub.s32 4, %v8415_v26 }
 0x429   : > { %v3496_v37 = vadd.f32 %v3480_v11, %v3456_v55  ;;  %v3094_v39 = vpop.f32.mrb[56].mxu1 }
 0x42a   : > { %v3481_v40 = vmul.f32 %v3468_v31, %v3094_v39  ;;  %v3096_v43 = vpop.f32.mrb[57].mxu1  ;;  %v3512_v10 = vrot.slane %v8666_v63, %v8853_v34  ;;  %v7704_v39 = vld [vmem:[%s8043_s29 + $0x1e4] ss:$16 sps:$4 sm:$0xff]  }
 0x42b   : > { %v3482_v51 = vmul.f32 %v3472_v7, %v3096_v43  ;;  %4209 = vmatprep.subr.bf16.mxu1 %v7704_v39 }
 0x42c   : > { %v3497_v46 = vadd.f32 %v3481_v40, %v3457_v44 }
 0x42d   : > { %v3498_v18 = vadd.f32 %v3482_v51, %v3458_v47  ;;  %v3100_v41 = vpop.f32.mrb[58].mxu1 }
 0x42e   : > { %v3483_v58 = vmul.f32 %v3468_v31, %v3100_v41  ;;  %v3102_v50 = vpop.f32.mrb[59].mxu1 }
 0x42f   : > { %v3484_v53 = vmul.f32 %v3472_v7, %v3102_v50 }
 0x430   : > { %v3499_v22 = vadd.f32 %v3483_v58, %v3459_v0  ;;  %v3508_v0 = vrot.slane %v8662_v61, %v8853_v34 }
 0x431   : > { %v3500_v23 = vadd.f32 %v3484_v53, %v3460_v60  ;;  %v3106_v15 = vpop.f32.mrb[60].mxu1 }
 0x432   : > { %v3485_v30 = vmul.f32 %v3468_v31, %v3106_v15  ;;  %v3108_v2 = vpop.f32.mrb[61].mxu1 }
 0x433   : > { %v3486_v55 = vmul.f32 %v3472_v7, %v3108_v2 }
 0x434   : > { %v3501_v5 = vadd.f32 %v3485_v30, %v3461_v6 }
 0x435   : > { %v3502_v44 = vadd.f32 %v3486_v55, %v3462_v57  ;;  %v3112_v47 = vpop.f32.mrb[62].mxu1 }
 0x436   : > { %v3487_v45 = vmul.f32 %v3468_v31, %v3112_v47  ;;  %v3114_v59 = vpop.f32.mrb[63].mxu1 }
 0x437   : > { %v3488_v60 = vmul.f32 %v3472_v7, %v3114_v59 }
 0x438   : > { %v3503_v48 = vadd.f32 %v3487_v45, %v3463_v9 }
 0x439   : > { %v3504_v49 = vadd.f32 %v3488_v60, %v3464_v38  ;;  %v3118_v14 = vpop.f32.mrb[64].mxu1 }
 0x43a   : > { %v3513_v16 = vmul.f32 %v3508_v0, %v3118_v14  ;;  %v3120_v20 = vpop.f32.mrb[65].mxu1 }
 0x43b   : > { %v3514_v19 = vmul.f32 %v3512_v10, %v3120_v20 }
 0x43c   : > { %v3529_v6 = vadd.f32 %v3513_v16, %v3489_v12  ;;  %v7702_v12 = vld [vmem:[%s8043_s29 + $0x1e0] ss:$16 sps:$4 sm:$0xff]  }
 0x43d   : > { %v3530_v52 = vadd.f32 %v3514_v19, %v3490_v13  ;;  %v3124_v57 = vpop.f32.mrb[66].mxu1  ;;  %4210 = vmatpush1.bf16.msra.mxu1 %v7702_v12 }
 0x43e   : > { %v3515_v31 = vmul.f32 %v3508_v0, %v3124_v57  ;;  %v3126_v24 = vpop.f32.mrb[67].mxu1 }
 0x43f   : > { %v3516_v4 = vmul.f32 %v3512_v10, %v3126_v24 }
 0x440   : > { %v3531_v25 = vadd.f32 %v3515_v31, %v3491_v42  ;;  %v7707_v42 = vld [vmem:[%s8043_s29 + $0xc] ss:$16 sps:$4 sm:$0xff]  }
 0x441   : > { %v3532_v54 = vadd.f32 %v3516_v4, %v3492_v21  ;;  %v3130_v7 = vpop.f32.mrb[68].mxu1  ;;  %4252 = vmatprep.subr.bf16.mxu1 %v7707_v42 }
 0x442   : > { %v3517_v33 = vmul.f32 %v3508_v0, %v3130_v7  ;;  %v3132_v35 = vpop.f32.mrb[69].mxu1 }
 0x443   : > { %v3518_v9 = vmul.f32 %v3512_v10, %v3132_v35 }
 0x444   : > { %v3533_v38 = vadd.f32 %v3517_v33, %v3493_v28 }
 0x445   : > { %v3534_v3 = vadd.f32 %v3518_v9, %v3494_v32  ;;  %v3136_v11 = vpop.f32.mrb[70].mxu1 }
 0x446   : > { %v3519_v40 = vmul.f32 %v3508_v0, %v3136_v11  ;;  %v3138_v43 = vpop.f32.mrb[71].mxu1 }
 0x447   : > { %v3520_v13 = vmul.f32 %v3512_v10, %v3138_v43 }
 0x448   : > { %v3535_v51 = vadd.f32 %v3519_v40, %v3495_v36  ;;  %v8863_v36 = vsub.s32 5, %v8415_v26 }
 0x449   : > { %v3536_v41 = vadd.f32 %v3520_v13, %v3496_v37  ;;  %v3142_v58 = vpop.f32.mrb[72].mxu1 }
 0x44a   : > { %v3521_v21 = vmul.f32 %v3508_v0, %v3142_v58  ;;  %v3144_v50 = vpop.f32.mrb[73].mxu1 }
 0x44b   : > { %v3522_v53 = vmul.f32 %v3512_v10, %v3144_v50 }
 0x44c   : > { %v3537_v15 = vadd.f32 %v3521_v21, %v3497_v46  ;;  %v3548_v46 = vrot.slane %v8662_v61, %v8863_v36 }
 0x44d   : > { %v3538_v1 = vadd.f32 %v3522_v53, %v3498_v18  ;;  %v3148_v28 = vpop.f32.mrb[74].mxu1 }
 0x44e   : > { %v3523_v32 = vmul.f32 %v3508_v0, %v3148_v28  ;;  %v3150_v62 = vpop.f32.mrb[75].mxu1 }
 0x44f   : > { %v3524_v30 = vmul.f32 %v3512_v10, %v3150_v62 }
 0x450   : > { %v3539_v2 = vadd.f32 %v3523_v32, %v3499_v22  ;;  %v3552_v22 = vrot.slane %v8666_v63, %v8863_v36 }
 0x451   : > { %v3540_v55 = vadd.f32 %v3524_v30, %v3500_v23  ;;  %v3154_v47 = vpop.f32.mrb[76].mxu1 }
 0x452   : > { %v3525_v45 = vmul.f32 %v3508_v0, %v3154_v47  ;;  %v3156_v59 = vpop.f32.mrb[77].mxu1 }
 0x453   : > { %v3526_v37 = vmul.f32 %v3512_v10, %v3156_v59 }
 0x454   : > { %v3541_v60 = vadd.f32 %v3525_v45, %v3501_v5 }
 0x455   : > { %v3542_v14 = vadd.f32 %v3526_v37, %v3502_v44  ;;  %v3160_v16 = vpop.f32.mrb[78].mxu1 }
 0x456   : > { %v3527_v20 = vmul.f32 %v3508_v0, %v3160_v16  ;;  %v3162_v19 = vpop.f32.mrb[79].mxu1 }
 0x457   : > { %v3528_v18 = vmul.f32 %v3512_v10, %v3162_v19 }
 0x458   : > { %v3543_v23 = vadd.f32 %v3527_v20, %v3503_v48  ;;  %v8870_v20 = vsub.s32 6, %v8415_v26 }
 0x459   : > { %v3544_v57 = vadd.f32 %v3528_v18, %v3504_v49  ;;  %v3166_v31 = vpop.f32.mrb[80].mxu1 }
 0x45a   : > { %v3553_v24 = vmul.f32 %v3548_v46, %v3166_v31  ;;  %v3168_v4 = vpop.f32.mrb[81].mxu1 }
 0x45b   : > { %v3554_v7 = vmul.f32 %v3552_v22, %v3168_v4 }
 0x45c   : > { %v3569_v33 = vadd.f32 %v3553_v24, %v3529_v6 }
 0x45d   : > { %v3570_v35 = vadd.f32 %v3554_v7, %v3530_v52  ;;  %v3172_v5 = vpop.f32.mrb[82].mxu1 }
 0x45e   : > { %v3555_v44 = vmul.f32 %v3548_v46, %v3172_v5  ;;  %v3174_v9 = vpop.f32.mrb[83].mxu1 }
 0x45f   : > { %v3556_v0 = vmul.f32 %v3552_v22, %v3174_v9 }
 0x460   : > { %v3571_v11 = vadd.f32 %v3555_v44, %v3531_v25 }
 0x461   : > { %v3572_v39 = vadd.f32 %v3556_v0, %v3532_v54  ;;  %v3178_v40 = vpop.f32.mrb[84].mxu1 }
 0x462   : > { %v3557_v43 = vmul.f32 %v3548_v46, %v3178_v40  ;;  %v3180_v10 = vpop.f32.mrb[85].mxu1 }
 0x463   : > { %v3558_v12 = vmul.f32 %v3552_v22, %v3180_v10 }
 0x464   : > { %v3573_v13 = vadd.f32 %v3557_v43, %v3533_v38 }
 0x465   : > { %v3574_v58 = vadd.f32 %v3558_v12, %v3534_v3  ;;  %v3184_v48 = vpop.f32.mrb[86].mxu1 }
 0x466   : > { %v3559_v49 = vmul.f32 %v3548_v46, %v3184_v48  ;;  %v3186_v42 = vpop.f32.mrb[87].mxu1 }
 0x467   : > { %v3560_v21 = vmul.f32 %v3552_v22, %v3186_v42 }
 0x468   : > { %v3575_v50 = vadd.f32 %v3559_v49, %v3535_v51 }
 0x469   : > { %v3576_v53 = vadd.f32 %v3560_v21, %v3536_v41  ;;  %v3190_v6 = vpop.f32.mrb[88].mxu1 }
 0x46a   : > { %v3561_v52 = vmul.f32 %v3548_v46, %v3190_v6  ;;  %v3192_v28 = vpop.f32.mrb[89].mxu1 }
 0x46b   : > { %v3562_v32 = vmul.f32 %v3552_v22, %v3192_v28 }
 0x46c   : > { %v3577_v62 = vadd.f32 %v3561_v52, %v3537_v15  ;;  %v3588_v15 = vrot.slane %v8662_v61, %v8870_v20 }
 0x46d   : > { %v3578_v30 = vadd.f32 %v3562_v32, %v3538_v1  ;;  %v3196_v25 = vpop.f32.mrb[90].mxu1 }
 0x46e   : > { %v3563_v54 = vmul.f32 %v3548_v46, %v3196_v25  ;;  %v3198_v47 = vpop.f32.mrb[91].mxu1 }
 0x46f   : > { %v3564_v45 = vmul.f32 %v3552_v22, %v3198_v47 }
 0x470   : > { %v3579_v59 = vadd.f32 %v3563_v54, %v3539_v2  ;;  %v3592_v2 = vrot.slane %v8666_v63, %v8870_v20 }
 0x471   : > { %v3580_v37 = vadd.f32 %v3564_v45, %v3540_v55  ;;  %v3202_v38 = vpop.f32.mrb[92].mxu1 }
 0x472   : > { %v3565_v3 = vmul.f32 %v3548_v46, %v3202_v38  ;;  %v3204_v16 = vpop.f32.mrb[93].mxu1 }
 0x473   : > { %v3566_v51 = vmul.f32 %v3552_v22, %v3204_v16 }
 0x474   : > { %v3581_v41 = vadd.f32 %v3565_v3, %v3541_v60 }
 0x475   : > { %v3582_v19 = vadd.f32 %v3566_v51, %v3542_v14  ;;  %v3208_v18 = vpop.f32.mrb[94].mxu1 }
 0x476   : > { %v3567_v31 = vmul.f32 %v3548_v46, %v3208_v18  ;;  %v3210_v24 = vpop.f32.mrb[95].mxu1 }
 0x477   : > { %v3568_v1 = vmul.f32 %v3552_v22, %v3210_v24 }
 0x478   : > { %v3583_v55 = vadd.f32 %v3567_v31, %v3543_v23 }
 0x479   : > { %v3584_v4 = vadd.f32 %v3568_v1, %v3544_v57  ;;  %v3214_v7 = vpop.f32.mrb[96].mxu1 }
 0x47a   : > { %v3593_v5 = vmul.f32 %v3588_v15, %v3214_v7  ;;  %v3216_v44 = vpop.f32.mrb[97].mxu1 }
 0x47b   : > { %v3594_v9 = vmul.f32 %v3592_v2, %v3216_v44 }
 0x47c   : > { %v3609_v0 = vadd.f32 %v3593_v5, %v3569_v33 }
 0x47d   : > { %v3610_v40 = vadd.f32 %v3594_v9, %v3570_v35  ;;  %v3220_v60 = vpop.f32.mrb[98].mxu1 }
 0x47e   : > { %v3595_v14 = vmul.f32 %v3588_v15, %v3220_v60  ;;  %v3222_v43 = vpop.f32.mrb[99].mxu1 }
 0x47f   : > { %v3596_v46 = vmul.f32 %v3592_v2, %v3222_v43 }
 0x480   : > { %v3611_v10 = vadd.f32 %v3595_v14, %v3571_v11 }
 0x481   : > { %v3612_v12 = vadd.f32 %v3596_v46, %v3572_v39  ;;  %v3226_v48 = vpop.f32.mrb[100].mxu1 }
 0x482   : > { %v3597_v49 = vmul.f32 %v3588_v15, %v3226_v48  ;;  %v3228_v22 = vpop.f32.mrb[101].mxu1 }
 0x483   : > { %v3598_v42 = vmul.f32 %v3592_v2, %v3228_v22  ;;  %v7753_v22 = vld [vmem:[%s9479_s8 + $0x40] sm:$0xff]  }
 0x484   : > { %v3613_v21 = vadd.f32 %v3597_v49, %v3573_v13  ;;  %6835 = vmatprep.subr.bf16.mxu0 %v7753_v22 }
 0x485   : > { %v3614_v6 = vadd.f32 %v3598_v42, %v3574_v58  ;;  %v3232_v23 = vpop.f32.mrb[102].mxu1  ;;  %v7754_v42 = vld [vmem:[%s9479_s8] sm:$0xff]  }
 0x486   : > { %v3599_v57 = vmul.f32 %v3588_v15, %v3232_v23  ;;  %v3234_v52 = vpop.f32.mrb[103].mxu1  ;;  %v7755_v23 = vld [vmem:[%s9479_s8 + $0x48] sm:$0xff]   ;;  %6836 = vmatpush3.bf16.msra.mxu0 %v7754_v42 }
 0x487   : > { %v3600_v28 = vmul.f32 %v3592_v2, %v3234_v52  ;;  %6837 = vmatprep.subr.bf16.mxu0 %v7755_v23 }
 0x488   : > { %v3615_v32 = vadd.f32 %v3599_v57, %v3575_v50  ;;  %v8883_v50 = vsub.s32 7, %v8415_v26 }
 0x489   : > { %v3616_v25 = vadd.f32 %v3600_v28, %v3576_v53  ;;  %v3238_v33 = vpop.f32.mrb[104].mxu1 }
 0x48a   : > { %v3601_v35 = vmul.f32 %v3588_v15, %v3238_v33  ;;  %v3240_v54 = vpop.f32.mrb[105].mxu1  ;;  %v8895_v5 = vrot.slane %v8666_v63, %v8883_v50  ;;  %v7756_v33 = vld [vmem:[%s9479_s8 + $0x8] sm:$0xff]  }
 0x48b   : > { %v3602_v47 = vmul.f32 %v3592_v2, %v3240_v54  ;;  %6838 = vmatpush3.bf16.msra.mxu0 %v7756_v33 }
 0x48c   : > { %v3617_v45 = vadd.f32 %v3601_v35, %v3577_v62 }
 0x48d   : > { %v8876_v38 = vadd.f32 %v3602_v47, %v3578_v30  ;;  %v3244_v11 = vpop.f32.mrb[106].mxu1 }
 0x48e   : > { %v3603_v39 = vmul.f32 %v3588_v15, %v3244_v11  ;;  %v3246_v3 = vpop.f32.mrb[107].mxu1 }
 0x48f   : > { %v3604_v16 = vmul.f32 %v3592_v2, %v3246_v3  ;;  %v7758_v3 = vld [vmem:[%s9479_s8 + $0x10] sm:$0xff]  }
 0x490   : > { %v8878_v51 = vadd.f32 %v3603_v39, %v3579_v59  ;;  %v8891_v59 = vrot.slane %v8662_v61, %v8883_v50 }
 0x491   : > { %v8880_v13 = vadd.f32 %v3604_v16, %v3580_v37  ;;  %v3250_v58 = vpop.f32.mrb[108].mxu1 }
 0x492   : > { %v3605_v18 = vmul.f32 %v3588_v15, %v3250_v58  ;;  %v3252_v31 = vpop.f32.mrb[109].mxu1  ;;  %v7759_v58 = vld [vmem:[%s9479_s8 + $0x58] sm:$0xff]  }
 0x493   : > { %v3606_v53 = vmul.f32 %v3592_v2, %v3252_v31 }
 0x494   : > { %v8885_v24 = vadd.f32 %v3605_v18, %v3581_v41 }
 0x495   : > { %v8887_v62 = vadd.f32 %v3606_v53, %v3582_v19  ;;  %v3256_v30 = vpop.f32.mrb[110].mxu1 }
 0x496   : > { %v3607_v1 = vmul.f32 %v3588_v15, %v3256_v30  ;;  %v3258_v7 = vpop.f32.mrb[111].mxu1  ;;  %v7760_v30 = vld [vmem:[%s9479_s8 + $0x18] sm:$0xff]  }
 0x497   : > { %v3608_v37 = vmul.f32 %v3592_v2, %v3258_v7 }
 0x498   : > { %v8897_v44 = vadd.f32 %v3607_v1, %v3583_v55 }
 0x499   : > { %v8899_v26 = vadd.f32 %v3608_v37, %v3584_v4  ;;  %v3262_v41 = vpop.f32.mrb[112].mxu1 }
 0x49a   : > { %v3633_v19 = vmul.f32 %v8891_v59, %v3262_v41  ;;  %v3264_v9 = vpop.f32.mrb[113].mxu1 }
 0x49b   : > { %v3634_v15 = vmul.f32 %v8895_v5, %v3264_v9  ;;  %v7762_v9 = vld [vmem:[%s9479_s8 + $0x20] sm:$0xff]  }
 0x49c   : > { %v8903_v61 = vadd.f32 %v3633_v19, %v3609_v0 }
 0x49d   : > { %v8905_v2 = vadd.f32 %v3634_v15, %v3610_v40  ;;  %v3268_v60 = vpop.f32.mrb[114].mxu1 }
 0x49e   : > { %v3635_v63 = vmul.f32 %v8891_v59, %v3268_v60  ;;  %v3270_v55 = vpop.f32.mrb[115].mxu1 }
 0x49f   : > { %v3636_v4 = vmul.f32 %v8895_v5, %v3270_v55 }
 0x4a0   : > { %v8909_v14 = vadd.f32 %v3635_v63, %v3611_v10 }
 0x4a1   : > { %v8911_v43 = vadd.f32 %v3636_v4, %v3612_v12  ;;  %v3274_v46 = vpop.f32.mrb[116].mxu1  ;;  %v8961_v4 = vld [vmem:[%s8028_s17 + $0x10] ss:$0 sm:$0xff] }
 0x4a2   : > { %v3637_v48 = vmul.f32 %v8891_v59, %v3274_v46  ;;  %v3276_v49 = vpop.f32.mrb[117].mxu1  ;;  %v3705_v46 = vld [vmem:[%s8033_s21] sm:$0x3] }
 0x4a3   : > { %v3638_v0 = vmul.f32 %v8895_v5, %v3276_v49  ;;  %v8968_v49 = vld [vmem:[%s8028_s17 + $0x18] ss:$0 sm:$0xff]  ;;  %v8979_v42 = vrot.slane %v3705_v46, %v8422_v29 }
 0x4a4   : > { %v8915_v40 = vadd.f32 %v3637_v48, %v3613_v21  ;;  %v7757_v21 = vld [vmem:[%s9479_s8 + $0x50] sm:$0xff]  }
 0x4a5   : > { %v8920_v57 = vadd.f32 %v3638_v0, %v3614_v6  ;;  %v3280_v52 = vpop.f32.mrb[118].mxu1  ;;  %6839 = vmatprep.subr.bf16.mxu0 %v7757_v21 }
 0x4a6   : > { %v3639_v10 = vmul.f32 %v8891_v59, %v3280_v52  ;;  %v3282_v12 = vpop.f32.mrb[119].mxu1  ;;  %6840 = vmatpush3.bf16.msra.mxu0 %v7758_v3 }
 0x4a7   : > { %v3640_v28 = vmul.f32 %v8895_v5, %v3282_v12  ;;  %6841 = vmatprep.subr.bf16.mxu0 %v7759_v58 }
 0x4a8   : > { %v8925_v35 = vadd.f32 %v3639_v10, %v3615_v32 }
 0x4a9   : > { %v8928_v54 = vadd.f32 %v3640_v28, %v3616_v25  ;;  %v3286_v6 = vpop.f32.mrb[120].mxu1 }
 0x4aa   : > { %v3641_v47 = vmul.f32 %v8891_v59, %v3286_v6  ;;  %v3288_v11 = vpop.f32.mrb[121].mxu1  ;;  %6842 = vmatpush3.bf16.msra.mxu0 %v7760_v30 }
 0x4ab   : > { %v3642_v39 = vmul.f32 %v8895_v5, %v3288_v11 }
 0x4ac   : > { %v8933_v16 = vadd.f32 %v3641_v47, %v3617_v45  ;;  %v7761_v45 = vld [vmem:[%s9479_s8 + $0x60] sm:$0xff]  }
 0x4ad   : > { %v8937_v32 = vadd.f32 %v3642_v39, %v8876_v38  ;;  %v3292_v25 = vpop.f32.mrb[122].mxu1  ;;  %6843 = vmatprep.subr.bf16.mxu0 %v7761_v45 }
 0x4ae   : > { %v3643_v18 = vmul.f32 %v8891_v59, %v3292_v25  ;;  %v3294_v31 = vpop.f32.mrb[123].mxu1  ;;  %6844 = vmatpush3.bf16.msra.mxu0 %v7762_v9 }
 0x4af   : > { %v3644_v53 = vmul.f32 %v8895_v5, %v3294_v31 }
 0x4b0   : > { %v8943_v1 = vadd.f32 %v3643_v18, %v8878_v51 }
 0x4b1   : > { %v8947_v7 = vadd.f32 %v3644_v53, %v8880_v13  ;;  %v3298_v38 = vpop.f32.mrb[124].mxu1 }
 0x4b2   : > { %v3645_v37 = vmul.f32 %v8891_v59, %v3298_v38  ;;  %v3300_v41 = vpop.f32.mrb[125].mxu1 }
 0x4b3   : > { %v3646_v19 = vmul.f32 %v8895_v5, %v3300_v41 }
 0x4b4   : > { %v8953_v15 = vadd.f32 %v3645_v37, %v8885_v24 }
 0x4b5   : > { %v8956_v51 = vadd.f32 %v3646_v19, %v8887_v62  ;;  %v3304_v60 = vpop.f32.mrb[126].mxu1 }
 0x4b6   : > { %v3647_v13 = vmul.f32 %v8891_v59, %v3304_v60  ;;  %v3306_v63 = vpop.f32.mrb[127].mxu1  ;;  %v8975_v59 = vrot.slane %v3705_v46, %v8418_v27 }
 0x4b7   : > { %v3648_v55 = vmul.f32 %v8895_v5, %v3306_v63 }
 0x4b8   : > { %v8965_v48 = vadd.f32 %v3647_v13, %v8897_v44 }
 0x4b9   : > { %v8971_v24 = vadd.f32 %v3648_v55, %v8899_v26  ;;  %v3310_v62 = vpop.f32.mrb[128].mxu1 }
 0x4ba   : > { %v3673_v0 = vmul.f32 %v8961_v4, %v3310_v62  ;;  %v3312_v22 = vpop.f32.mrb[129].mxu1  ;;  %v7705_v62 = vld [vmem:[%s8043_s29 + $0x8] ss:$16 sps:$4 sm:$0xff]  }
 0x4bb   : > { %v3674_v5 = vmul.f32 %v8968_v49, %v3312_v22 }
 0x4bc   : > { %v3689_v44 = vadd.f32 %v3673_v0, %v8903_v61 }
 0x4bd   : > { %v3690_v23 = vadd.f32 %v3674_v5, %v8905_v2  ;;  %v3316_v52 = vpop.f32.mrb[130].mxu1 }
 0x4be   : > { %v3717_v26 = vadd.f32 %v8975_v59, %v3689_v44  ;;  %v3675_v10 = vmul.f32 %v8961_v4, %v3316_v52  ;;  %v3318_v12 = vpop.f32.mrb[131].mxu1 }
 0x4bf   : > { %v3718_v28 = vadd.f32 %v8979_v42, %v3690_v23  ;;  %v3676_v33 = vmul.f32 %v8968_v49, %v3318_v12  ;;  %v7710_v23 = vld [vmem:[%s8043_s29 + $0x2c] ss:$16 sps:$4 sm:$0xff]  }
 0x4c0   : > { %v3691_v21 = vadd.f32 %v3675_v10, %v8909_v14  ;;  %v3733_v11 = vmax.f32 %v3717_v26, 0.0 }
 0x4c1   : > { %v3692_v6 = vadd.f32 %v3676_v33, %v8911_v43  ;;  %v3322_v47 = vpop.f32.mrb[132].mxu1  ;;  %v3734_v3 = vmax.f32 %v3718_v28, 0.0 }
 0x4c2   : > { %v3719_v61 = vadd.f32 %v8975_v59, %v3691_v21  ;;  %v3677_v2 = vmul.f32 %v8961_v4, %v3322_v47  ;;  %v3324_v39 = vpop.f32.mrb[133].mxu1  ;;  %v3749_v30 = vmin.f32 %v3733_v11, 6.0  ;;  %v7708_v21 = vld [vmem:[%s8043_s29 + $0x28] ss:$16 sps:$4 sm:$0xff]  }
 0x4c3   : > { %v3720_v58 = vadd.f32 %v8979_v42, %v3692_v6  ;;  %v3678_v25 = vmul.f32 %v8968_v49, %v3324_v39  ;;  %v3750_v19 = vmin.f32 %v3734_v3, 6.0  ;;  %v7713_v39 = vld [vmem:[%s8043_s29 + $0x4c] ss:$16 sps:$4 sm:$0xff]  }
 0x4c4   : > { %v3735_v18 = vmax.f32 %v3719_v61, 0.0  ;;  %v3693_v31 = vadd.f32 %v3677_v2, %v8915_v40 }
 0x4c5   : > { %v3736_v53 = vmax.f32 %v3720_v58, 0.0  ;;  %v3694_v14 = vadd.f32 %v3678_v25, %v8920_v57  ;;  %v3328_v43 = vpop.f32.mrb[134].mxu1 }
 0x4c6   : > { %v3751_v45 = vmin.f32 %v3735_v18, 6.0  ;;  %v3721_v38 = vadd.f32 %v8975_v59, %v3693_v31  ;;  %v3679_v37 = vmul.f32 %v8961_v4, %v3328_v43  ;;  %v3330_v41 = vpop.f32.mrb[135].mxu1  ;;  %v7711_v43 = vld [vmem:[%s8043_s29 + $0x48] ss:$16 sps:$4 sm:$0xff]  }
 0x4c7   : > { %v3752_v9 = vmin.f32 %v3736_v53, 6.0  ;;  %v3722_v60 = vadd.f32 %v8979_v42, %v3694_v14  ;;  %v3680_v13 = vmul.f32 %v8968_v49, %v3330_v41  ;;  %v7716_v41 = vld [vmem:[%s8043_s29 + $0x6c] ss:$16 sps:$4 sm:$0xff]  }
 0x4c8   : > { %v8999_v40 = vpack.c.bf16 %v3751_v45, %v3749_v30  ;;  %v3695_v57 = vadd.f32 %v3679_v37, %v8925_v35  ;;  %v3737_v0 = vmax.f32 %v3721_v38, 0.0 }
 0x4c9   : > { %v3696_v63 = vadd.f32 %v3680_v13, %v8928_v54  ;;  %v3334_v55 = vpop.f32.mrb[136].mxu1  ;;  %v9003_v46 = vpack.c.bf16 %v3752_v9, %v3750_v19  ;;  %v3738_v52 = vmax.f32 %v3722_v60, 0.0 }
 0x4ca   : > { %v3723_v22 = vadd.f32 %v8975_v59, %v3695_v57  ;;  %v3681_v5 = vmul.f32 %v8961_v4, %v3334_v55  ;;  %v3336_v44 = vpop.f32.mrb[137].mxu1  ;;  %v3753_v6 = vmin.f32 %v3737_v0, 6.0  ;;  %v7714_v55 = vld [vmem:[%s8043_s29 + $0x68] ss:$16 sps:$4 sm:$0xff]  }
 0x4cb   : > { %v3724_v26 = vadd.f32 %v8979_v42, %v3696_v63  ;;  %v3682_v10 = vmul.f32 %v8968_v49, %v3336_v44  ;;  %4211 = vmatprep.mubr.bf16.mxu1 %v9003_v46  ;;  %v3754_v3 = vmin.f32 %v3738_v52, 6.0 }
 0x4cc   : > { %v3739_v35 = vmax.f32 %v3723_v22, 0.0  ;;  %v3697_v54 = vadd.f32 %v3681_v5, %v8933_v16  ;;  %4212 = vmatmul.mubr.bf16.vlgmr.msra.gmra.mrb[144].mxu1 %v8999_v40 }
 0x4cd   : > { %v3740_v12 = vmax.f32 %v3724_v26, 0.0  ;;  %v3698_v28 = vadd.f32 %v3682_v10, %v8937_v32  ;;  %4253 = vmatpush1.bf16.msra.mxu1 %v7705_v62  ;;  %v3340_v33 = vpop.f32.mrb[138].mxu1 }
 0x4ce   : > { %v3755_v47 = vmin.f32 %v3739_v35, 6.0  ;;  %v3725_v11 = vadd.f32 %v8975_v59, %v3697_v54  ;;  %v3683_v61 = vmul.f32 %v8961_v4, %v3340_v33  ;;  %v3342_v2 = vpop.f32.mrb[139].mxu1  ;;  %4254 = vmatprep.subr.bf16.mxu1 %v7710_v23  ;;  %v7719_v23 = vld [vmem:[%s8043_s29 + $0x8c] ss:$16 sps:$4 sm:$0xff]  }
 0x4cf   : > { %v3756_v16 = vmin.f32 %v3740_v12, 6.0  ;;  %v3726_v58 = vadd.f32 %v8979_v42, %v3698_v28  ;;  %v3684_v32 = vmul.f32 %v8968_v49, %v3342_v2 }
 0x4d0   : > { %v3699_v25 = vadd.f32 %v3683_v61, %v8943_v1  ;;  %v9022_v18 = vpack.c.bf16 %v3755_v47, %v3753_v6  ;;  %v3741_v30 = vmax.f32 %v3725_v11, 0.0  ;;  %v7720_v47 = vld [vmem:[%s8043_s29 + $0xa8] ss:$16 sps:$4 sm:$0xff]  }
 0x4d1   : > { %v3700_v31 = vadd.f32 %v3684_v32, %v8947_v7  ;;  %4255 = vmatpush1.bf16.msra.mxu1 %v7708_v21  ;;  %v3346_v53 = vpop.f32.mrb[140].mxu1  ;;  %v9025_v14 = vpack.c.bf16 %v3756_v16, %v3754_v3  ;;  %v3742_v19 = vmax.f32 %v3726_v58, 0.0  ;;  %v7722_v21 = vld [vmem:[%s8043_s29 + $0xac] ss:$16 sps:$4 sm:$0xff]   ;;  %v7723_v16 = vld [vmem:[%s8043_s29 + $0xc8] ss:$16 sps:$4 sm:$0xff]  }
 0x4d2   : > { %v3727_v45 = vadd.f32 %v8975_v59, %v3699_v25  ;;  %v3685_v38 = vmul.f32 %v8961_v4, %v3346_v53  ;;  %v3348_v37 = vpop.f32.mrb[141].mxu1  ;;  %4256 = vmatprep.subr.bf16.mxu1 %v7713_v39  ;;  %v3757_v62 = vmin.f32 %v3741_v30, 6.0  ;;  %v7728_v58 = vld [vmem:[%s8043_s29 + $0xec] ss:$16 sps:$4 sm:$0xff]   ;;  %v7726_v32 = vld [vmem:[%s8043_s29 + $0xe8] ss:$16 sps:$4 sm:$0xff]  }
 0x4d3   : > { %v3728_v1 = vadd.f32 %v8979_v42, %v3700_v31  ;;  %v3686_v9 = vmul.f32 %v8968_v49, %v3348_v37  ;;  %4221 = vmatprep.mubr.bf16.mxu1 %v9025_v14  ;;  %v7731_v25 = vld [vmem:[%s8043_s29 + $0x10c] ss:$16 sps:$4 sm:$0xff]   ;;  %v7729_v31 = vld [vmem:[%s8043_s29 + $0x108] ss:$16 sps:$4 sm:$0xff]  }
 0x4d4   : > { %v3743_v7 = vmax.f32 %v3727_v45, 0.0  ;;  %v3701_v60 = vadd.f32 %v3685_v38, %v8953_v15  ;;  %4222 = vmatmul.mubr.bf16.gmra.mrb[148].mxu1 %v9022_v18  ;;  %v3758_v15 = vmin.f32 %v3742_v19, 6.0  ;;  %v7734_v53 = vld [vmem:[%s8043_s29 + $0x12c] ss:$16 sps:$4 sm:$0xff]   ;;  %v7735_v45 = vld [vmem:[%s8043_s29 + $0x148] ss:$16 sps:$4 sm:$0xff]  }
 0x4d5   : > { %v3744_v13 = vmax.f32 %v3728_v1, 0.0  ;;  %v3702_v57 = vadd.f32 %v3686_v9, %v8956_v51  ;;  %4257 = vmatpush1.bf16.msra.mxu1 %v7711_v43  ;;  %v3352_v63 = vpop.f32.mrb[142].mxu1  ;;  %v7732_v43 = vld [vmem:[%s8043_s29 + $0x128] ss:$16 sps:$4 sm:$0xff]   ;;  %v7737_v30 = vld [vmem:[%s8043_s29 + $0x14c] ss:$16 sps:$4 sm:$0xff]  }
 0x4d6   : > { %v3759_v0 = vmin.f32 %v3743_v7, 6.0  ;;  %v3729_v22 = vadd.f32 %v8975_v59, %v3701_v60  ;;  %v3687_v5 = vmul.f32 %v8961_v4, %v3352_v63  ;;  %v3354_v44 = vpop.f32.mrb[143].mxu1  ;;  %4258 = vmatprep.subr.bf16.mxu1 %v7716_v41  ;;  %v7717_v4 = vld [vmem:[%s8043_s29 + $0x88] ss:$16 sps:$4 sm:$0xff]   ;;  %v7743_v37 = vld [vmem:[%s8043_s29 + $0x18c] ss:$16 sps:$4 sm:$0xff]  }
 0x4d7   : > { %v3760_v52 = vmin.f32 %v3744_v13, 6.0  ;;  %v3730_v26 = vadd.f32 %v8979_v42, %v3702_v57  ;;  %v3688_v51 = vmul.f32 %v8968_v49, %v3354_v44  ;;  %v7738_v38 = vld [vmem:[%s8043_s29 + $0x168] ss:$16 sps:$4 sm:$0xff]   ;;  %v7746_v19 = vld [vmem:[%s8043_s29 + $0x1ac] ss:$16 sps:$4 sm:$0xff]   ;;  %v7773_v44 = vld [vmem:[%s9479_s8 + $0xd0] sm:$0xff]  }
 0x4d8   : > { %v3703_v10 = vadd.f32 %v3687_v5, %v8965_v48  ;;  %v9044_v35 = vpack.c.bf16 %v3759_v0, %v3757_v62  ;;  %v3745_v28 = vmax.f32 %v3729_v22, 0.0  ;;  %v7741_v41 = vld [vmem:[%s8043_s29 + $0x188] ss:$16 sps:$4 sm:$0xff]   ;;  %v7749_v9 = vld [vmem:[%s8043_s29 + $0x1cc] ss:$16 sps:$4 sm:$0xff]   ;;  %v7769_v62 = vld [vmem:[%s9479_s8 + $0xc0] sm:$0xff]  }
 0x4d9   : > { %v3704_v54 = vadd.f32 %v3688_v51, %v8971_v24  ;;  %4259 = vmatpush1.bf16.msra.mxu1 %v7714_v55  ;;  %v9047_v12 = vpack.c.bf16 %v3760_v52, %v3758_v15  ;;  %v3746_v6 = vmax.f32 %v3730_v26, 0.0  ;;  %v7744_v1 = vld [vmem:[%s8043_s29 + $0x1a8] ss:$16 sps:$4 sm:$0xff]   ;;  %v7752_v60 = vld [vmem:[%s8043_s29 + $0x1ec] ss:$16 sps:$4 sm:$0xff]   ;;  %v7765_v55 = vld [vmem:[%s9479_s8 + $0x70] sm:$0xff]  }
 0x4da   : > { %v3731_v33 = vadd.f32 %v8975_v59, %v3703_v10  ;;  %4260 = vmatprep.subr.bf16.mxu1 %v7719_v23  ;;  %v3761_v11 = vmin.f32 %v3745_v28, 6.0  ;;  %v7725_v59 = vld [vmem:[%s8043_s29 + $0xcc] ss:$16 sps:$4 sm:$0xff]   ;;  %v7747_v7 = vld [vmem:[%s8043_s29 + $0x1c8] ss:$16 sps:$4 sm:$0xff]   ;;  %v7770_v0 = vld [vmem:[%s9479_s8 + $0x80] sm:$0xff]  }
 0x4db   : > { %v3732_v49 = vadd.f32 %v8979_v42, %v3704_v54  ;;  %4231 = vmatprep.mubr.bf16.mxu1 %v9047_v12  ;;  %v3762_v2 = vmin.f32 %v3746_v6, 6.0  ;;  %v7750_v13 = vld [vmem:[%s8043_s29 + $0x1e8] ss:$16 sps:$4 sm:$0xff]   ;;  %v7774_v23 = vld [vmem:[%s9479_s8 + $0x90] sm:$0xff]   ;;  %v7777_v26 = vld [vmem:[%s9479_s8 + $0xe0] sm:$0xff]  }
 0x4dc   : > { %v3747_v48 = vmax.f32 %v3731_v33, 0.0  ;;  %4232 = vmatmul.mubr.bf16.gmra.mrb[152].mxu1 %v9044_v35  ;;  %v7763_v57 = vld [vmem:[%s9479_s8 + $0x68] sm:$0xff]   ;;  %v7775_v15 = vld [vmem:[%s9479_s8 + $0xd8] sm:$0xff]   ;;  %v7778_v51 = vld [vmem:[%s9479_s8 + $0xa0] sm:$0xff]  }
 0x4dd   : > { %v3748_v24 = vmax.f32 %v3732_v49, 0.0  ;;  %4261 = vmatpush1.bf16.msra.mxu1 %v7717_v4  ;;  %v7764_v63 = vld [vmem:[%s9479_s8 + $0x28] sm:$0xff]   ;;  %6845 = vmatprep.subr.bf16.mxu0 %v7763_v57  ;;  %v7776_v52 = vld [vmem:[%s9479_s8 + $0x98] sm:$0xff]   ;;  %v7781_v54 = vld [vmem:[%s9479_s8 + $0xf0] sm:$0xff]  }
 0x4de   : > { %v3763_v61 = vmin.f32 %v3747_v48, 6.0  ;;  %4262 = vmatprep.subr.bf16.mxu1 %v7722_v21  ;;  %6846 = vmatpush3.bf16.msra.mxu0 %v7764_v63  ;;  %v7771_v22 = vld [vmem:[%s9479_s8 + $0xc8] sm:$0xff]   ;;  %v7783_v4 = vld [vmem:[%s9479_s8 + $0xf8] sm:$0xff]   ;;  %v9105_v33 = vld [vmem:[%s9484_s3] sm:$0xf]  ;;  %s6832_s3 = sshll.u32 %s8233_s26, 5 }
 0x4df   : > { %v3764_v39 = vmin.f32 %v3748_v24, 6.0  ;;  %6847 = vmatprep.subr.bf16.mxu0 %v7765_v55  ;;  %v7772_v5 = vld [vmem:[%s9479_s8 + $0x88] sm:$0xff]   ;;  %v7784_v28 = vld [vmem:[%s9479_s8 + $0xb8] sm:$0xff]   ;;  %v9109_v21 = vrot.slane %v9105_v33, %v8418_v27  ;;  %v9116_v6 = vrot.slane %v9105_v33, %v8422_v29  ;;  %s1013_s5 = scalar_lea.vmem %s9487_s12, %s6832_s3  ;;  %s9489_s3 = sld [smem:[#allocation19_spill]] }
 0x4e0   : > { %v3771_v42 = vpack.c.bf16 %v3763_v61, %v3761_v11  ;;  %v7779_v10 = vld [vmem:[%s9479_s8 + $0xe8] sm:$0xff]   ;;  %s6834_s26 = sshll.u32 %s8196_s0, 12 }
 0x4e1   : > { %4263 = vmatpush1.bf16.msra.mxu1 %v7720_v47  ;;  %v3772_v3 = vpack.c.bf16 %v3764_v39, %v3762_v2 }
 0x4e2   : > { %4264 = vmatprep.subr.bf16.mxu1 %v7725_v59 }
 0x4e3   : > { %4241 = vmatprep.mubr.bf16.mxu1 %v3772_v3 }
 0x4e4   : > { %4242 = vmatmul.mubr.bf16.gmra.mrb[156].mxu1 %v3771_v42 }
 0x4e5   : > { %4265 = vmatpush1.bf16.msra.mxu1 %v7723_v16  ;;  %4284 = vmatprep.mubr.bf16.mxu1 %v9003_v46  ;;  %v7740_v46 = vld [vmem:[%s8043_s29 + $0x16c] ss:$16 sps:$4 sm:$0xff]  }
 0x4e6   : > { %4266 = vmatprep.subr.bf16.mxu1 %v7728_v58 }
 0x4e9   : > { %4267 = vmatpush1.bf16.msra.mxu1 %v7726_v32 }
 0x4ea   : > { %4268 = vmatprep.subr.bf16.mxu1 %v7731_v25 }
 0x4ed   : > { %4269 = vmatpush1.bf16.msra.mxu1 %v7729_v31 }
 0x4ee   : > { %4270 = vmatprep.subr.bf16.mxu1 %v7734_v53 }
 0x4f1   : > { %4271 = vmatpush1.bf16.msra.mxu1 %v7732_v43 }
 0x4f2   : > { %4272 = vmatprep.subr.bf16.mxu1 %v7737_v30 }
 0x4f5   : > { %4273 = vmatpush1.bf16.msra.mxu1 %v7735_v45 }
 0x4f6   : > { %4274 = vmatprep.subr.bf16.mxu1 %v7740_v46 }
 0x4f9   : > { %4275 = vmatpush1.bf16.msra.mxu1 %v7738_v38 }
 0x4fa   : > { %4276 = vmatprep.subr.bf16.mxu1 %v7743_v37 }
 0x4fd   : > { %4277 = vmatpush1.bf16.msra.mxu1 %v7741_v41 }
 0x4fe   : > { %4278 = vmatprep.subr.bf16.mxu1 %v7746_v19 }
 0x501   : > { %4279 = vmatpush1.bf16.msra.mxu1 %v7744_v1 }
 0x502   : > { %4280 = vmatprep.subr.bf16.mxu1 %v7749_v9 }
 0x505   : > { %4281 = vmatpush1.bf16.msra.mxu1 %v7747_v7 }
 0x506   : > { %4282 = vmatprep.subr.bf16.mxu1 %v7752_v60 }
 0x509   : > { %4283 = vmatpush1.bf16.msra.mxu1 %v7750_v13 }
 0x50a   : > { %6875 = vmatprep.subr.bf16.mxu1 %v7769_v62 }
 0x50c   : > { %4285 = vmatmul.mubr.bf16.vlgmr.msra.gmra.mrb[160].mxu1 %v8999_v40  ;;  %v7766_v40 = vld [vmem:[%s9479_s8 + $0x30] sm:$0xff]  }
 0x50d   : > { %4294 = vmatprep.mubr.bf16.mxu1 %v9025_v14  ;;  %6848 = vmatpush3.bf16.msra.mxu0 %v7766_v40  ;;  %v7768_v14 = vld [vmem:[%s9479_s8 + $0x38] sm:$0xff]  }
 0x50e   : > { %6876 = vmatpush3.bf16.msra.mxu1 %v7770_v0 }
 0x50f   : > { %6877 = vmatprep.subr.bf16.mxu1 %v7771_v22 }
 0x512   : > { %6878 = vmatpush3.bf16.msra.mxu1 %v7772_v5 }
 0x513   : > { %6879 = vmatprep.subr.bf16.mxu1 %v7773_v44 }
 0x514   : > { %4295 = vmatmul.mubr.bf16.gmra.mrb[164].mxu1 %v9022_v18  ;;  %v7767_v18 = vld [vmem:[%s9479_s8 + $0x78] sm:$0xff]  }
 0x515   : > { %4304 = vmatprep.mubr.bf16.mxu1 %v9047_v12  ;;  %6849 = vmatprep.subr.bf16.mxu0 %v7767_v18  ;;  %v7782_v12 = vld [vmem:[%s9479_s8 + $0xb0] sm:$0xff]  }
 0x516   : > { %6850 = vmatpush3.bf16.msra.mxu0 %v7768_v14  ;;  %6880 = vmatpush3.bf16.msra.mxu1 %v7774_v23 }
 0x517   : > { %6881 = vmatprep.subr.bf16.mxu1 %v7775_v15 }
 0x51a   : > { %6882 = vmatpush3.bf16.msra.mxu1 %v7776_v52 }
 0x51b   : > { %6883 = vmatprep.subr.bf16.mxu1 %v7777_v26 }
 0x51c   : > { %4305 = vmatmul.mubr.bf16.gmra.mrb[168].mxu1 %v9044_v35  ;;  %v7780_v35 = vld [vmem:[%s9479_s8 + $0xa8] sm:$0xff]   ;;  %s9496_s8 = sld [smem:[#allocation22_spill]] }
 0x51d   : > { %4314 = vmatprep.mubr.bf16.mxu1 %v3772_v3 }
 0x51e   : > { %6884 = vmatpush3.bf16.msra.mxu1 %v7778_v51 }
 0x51f   : > { %6885 = vmatprep.subr.bf16.mxu1 %v7779_v10 }
 0x522   : > { %6886 = vmatpush3.bf16.msra.mxu1 %v7780_v35 }
 0x523   : > { %6887 = vmatprep.subr.bf16.mxu1 %v7781_v54 }
 0x524   : > { %4315 = vmatmul.mubr.bf16.gmra.mrb[172].mxu1 %v3771_v42 }
 0x526   : > { %6888 = vmatpush3.bf16.msra.mxu1 %v7782_v12 }
 0x527   : > { %6889 = vmatprep.subr.bf16.mxu1 %v7783_v4 }
 0x52a   : > { %6890 = vmatpush3.bf16.msra.mxu1 %v7784_v28 }
 0x59f   : > { %v4213_v49 = vpop.f32.mrb[144].mxu1 }
 0x5a0   : > { %v4214_v48 = vadd.f32 %v4213_v49, %v9109_v21  ;;  %v4215_v24 = vpop.f32.mrb[145].mxu1 }
 0x5a1   : > { %v4216_v47 = vadd.f32 %v4215_v24, %v9116_v6  ;;  %v4217_v11 = vpop.f32.mrb[146].mxu1 }
 0x5a2   : > { %v4325_v61 = vmax.f32 %v4214_v48, 0.0  ;;  %v4218_v59 = vadd.f32 %v4217_v11, %v9109_v21  ;;  %v4219_v2 = vpop.f32.mrb[147].mxu1 }
 0x5a3   : > { %v4326_v39 = vmax.f32 %v4216_v47, 0.0  ;;  %v4220_v42 = vadd.f32 %v4219_v2, %v9116_v6 }
 0x5a4   : > { %v4357_v3 = vmin.f32 %v4325_v61, 6.0  ;;  %v4329_v16 = vmax.f32 %v4218_v59, 0.0 }
 0x5a5   : > { %v4358_v58 = vmin.f32 %v4326_v39, 6.0  ;;  %v4330_v32 = vmax.f32 %v4220_v42, 0.0 }
 0x5a6   : > { %4389 = vst [vmem:[%s9123_s15] sm:$0xff] %v4357_v3  ;;  %v4361_v25 = vmin.f32 %v4329_v16, 6.0 }
 0x5a7   : > { %4390 = vst [vmem:[%s9123_s15 + $0x8] sm:$0xff] %v4358_v58  ;;  %v4362_v31 = vmin.f32 %v4330_v32, 6.0  ;;  %v4223_v53 = vpop.f32.mrb[148].mxu1 }
 0x5a8   : > { %4393 = vst [vmem:[%s9123_s15 + $0x20] sm:$0xff] %v4361_v25  ;;  %v4421_v43 = vpack.c.bf16 %v4361_v25, %v4357_v3  ;;  %v4224_v30 = vadd.f32 %v4223_v53, %v9109_v21  ;;  %v4225_v45 = vpop.f32.mrb[149].mxu1 }
 0x5a9   : > { %4394 = vst [vmem:[%s9123_s15 + $0x28] sm:$0xff] %v4362_v31  ;;  %v4422_v46 = vpack.c.bf16 %v4362_v31, %v4358_v58  ;;  %v4226_v38 = vadd.f32 %v4225_v45, %v9116_v6  ;;  %v4227_v37 = vpop.f32.mrb[150].mxu1 }
 0x5aa   : > { %v4333_v41 = vmax.f32 %v4224_v30, 0.0  ;;  %v4228_v19 = vadd.f32 %v4227_v37, %v9109_v21  ;;  %v4229_v1 = vpop.f32.mrb[151].mxu1 }
 0x5ab   : > { %v4334_v9 = vmax.f32 %v4226_v38, 0.0  ;;  %v4230_v7 = vadd.f32 %v4229_v1, %v9116_v6  ;;  %4732 = vmatprep.mubr.bf16.mxu0 %v4422_v46 }
 0x5ac   : > { %v4365_v60 = vmin.f32 %v4333_v41, 6.0  ;;  %v4337_v13 = vmax.f32 %v4228_v19, 0.0  ;;  %4733 = vmatmul.mubr.bf16.vlgmr.msra.gmra.mrb[64].mxu0 %v4421_v43 }
 0x5ad   : > { %v4366_v57 = vmin.f32 %v4334_v9, 6.0  ;;  %v4338_v63 = vmax.f32 %v4230_v7, 0.0 }
 0x5ae   : > { %4397 = vst [vmem:[%s9123_s15 + $0x40] sm:$0xff] %v4365_v60  ;;  %v4369_v55 = vmin.f32 %v4337_v13, 6.0 }
 0x5af   : > { %4398 = vst [vmem:[%s9123_s15 + $0x48] sm:$0xff] %v4366_v57  ;;  %v4370_v40 = vmin.f32 %v4338_v63, 6.0  ;;  %v4233_v18 = vpop.f32.mrb[152].mxu1 }
 0x5b0   : > { %4401 = vst [vmem:[%s9123_s15 + $0x60] sm:$0xff] %v4369_v55  ;;  %v4425_v14 = vpack.c.bf16 %v4369_v55, %v4365_v60  ;;  %v4234_v62 = vadd.f32 %v4233_v18, %v9109_v21  ;;  %v4235_v0 = vpop.f32.mrb[153].mxu1 }
 0x5b1   : > { %4402 = vst [vmem:[%s9123_s15 + $0x68] sm:$0xff] %v4370_v40  ;;  %v4426_v22 = vpack.c.bf16 %v4370_v40, %v4366_v57  ;;  %v4236_v5 = vadd.f32 %v4235_v0, %v9116_v6  ;;  %v4237_v44 = vpop.f32.mrb[154].mxu1 }
 0x5b2   : > { %v4341_v23 = vmax.f32 %v4234_v62, 0.0  ;;  %v4238_v15 = vadd.f32 %v4237_v44, %v9109_v21  ;;  %v4239_v52 = vpop.f32.mrb[155].mxu1 }
 0x5b3   : > { %v4342_v26 = vmax.f32 %v4236_v5, 0.0  ;;  %v4240_v51 = vadd.f32 %v4239_v52, %v9116_v6  ;;  %4740 = vmatprep.mubr.bf16.mxu0 %v4426_v22 }
 0x5b4   : > { %v4373_v10 = vmin.f32 %v4341_v23, 6.0  ;;  %v4345_v35 = vmax.f32 %v4238_v15, 0.0  ;;  %4741 = vmatmul.mubr.bf16.gmra.mrb[68].mxu0 %v4425_v14 }
 0x5b5   : > { %v4374_v54 = vmin.f32 %v4342_v26, 6.0  ;;  %v4346_v12 = vmax.f32 %v4240_v51, 0.0 }
 0x5b6   : > { %4405 = vst [vmem:[%s9123_s15 + $0x80] sm:$0xff] %v4373_v10  ;;  %v4377_v4 = vmin.f32 %v4345_v35, 6.0 }
 0x5b7   : > { %4406 = vst [vmem:[%s9123_s15 + $0x88] sm:$0xff] %v4374_v54  ;;  %v4378_v28 = vmin.f32 %v4346_v12, 6.0  ;;  %v4243_v49 = vpop.f32.mrb[156].mxu1 }
 0x5b8   : > { %4409 = vst [vmem:[%s9123_s15 + $0xa0] sm:$0xff] %v4377_v4  ;;  %v4429_v48 = vpack.c.bf16 %v4377_v4, %v4373_v10  ;;  %v4244_v24 = vadd.f32 %v4243_v49, %v9109_v21  ;;  %v4245_v47 = vpop.f32.mrb[157].mxu1 }
 0x5b9   : > { %4410 = vst [vmem:[%s9123_s15 + $0xa8] sm:$0xff] %v4378_v28  ;;  %v4430_v11 = vpack.c.bf16 %v4378_v28, %v4374_v54  ;;  %v4246_v61 = vadd.f32 %v4245_v47, %v9116_v6  ;;  %v4247_v59 = vpop.f32.mrb[158].mxu1 }
 0x5ba   : > { %v4349_v2 = vmax.f32 %v4244_v24, 0.0  ;;  %v4248_v39 = vadd.f32 %v4247_v59, %v9109_v21  ;;  %v4249_v42 = vpop.f32.mrb[159].mxu1  ;;  %v9155_v21 = vrot.slane %v9105_v33, %v8771_v56 }
 0x5bb   : > { %v4350_v3 = vmax.f32 %v4246_v61, 0.0  ;;  %v4250_v16 = vadd.f32 %v4249_v42, %v9116_v6  ;;  %4748 = vmatprep.mubr.bf16.mxu0 %v4430_v11  ;;  %v9159_v6 = vrot.slane %v9105_v33, %v8835_v17 }
 0x5bc   : > { %v4381_v58 = vmin.f32 %v4349_v2, 6.0  ;;  %v4353_v32 = vmax.f32 %v4248_v39, 0.0  ;;  %4749 = vmatmul.mubr.bf16.gmra.mrb[72].mxu0 %v4429_v48 }
 0x5bd   : > { %v4382_v25 = vmin.f32 %v4350_v3, 6.0  ;;  %v4354_v31 = vmax.f32 %v4250_v16, 0.0 }
 0x5be   : > { %4413 = vst [vmem:[%s9123_s15 + $0xc0] sm:$0xff] %v4381_v58  ;;  %v4385_v53 = vmin.f32 %v4353_v32, 6.0 }
 0x5bf   : > { %4414 = vst [vmem:[%s9123_s15 + $0xc8] sm:$0xff] %v4382_v25  ;;  %v4386_v43 = vmin.f32 %v4354_v31, 6.0 }
 0x5c0   : > { %4417 = vst [vmem:[%s9123_s15 + $0xe0] sm:$0xff] %v4385_v53  ;;  %v4433_v30 = vpack.c.bf16 %v4385_v53, %v4381_v58 }
 0x5c1   : > { %4418 = vst [vmem:[%s9123_s15 + $0xe8] sm:$0xff] %v4386_v43  ;;  %v4434_v45 = vpack.c.bf16 %v4386_v43, %v4382_v25 }
 0x5c3   : > { %4756 = vmatprep.mubr.bf16.mxu0 %v4434_v45 }
 0x5c4   : > { %4757 = vmatmul.mubr.bf16.gmra.mrb[76].mxu0 %v4433_v30 }
 0x5df   : > { %v4286_v46 = vpop.f32.mrb[160].mxu1 }
 0x5e0   : > { %v4287_v38 = vadd.f32 %v4286_v46, %v9155_v21  ;;  %v4288_v37 = vpop.f32.mrb[161].mxu1 }
 0x5e1   : > { %v4289_v41 = vadd.f32 %v4288_v37, %v9159_v6  ;;  %v4290_v19 = vpop.f32.mrb[162].mxu1 }
 0x5e2   : > { %v4327_v1 = vmax.f32 %v4287_v38, 0.0  ;;  %v4291_v9 = vadd.f32 %v4290_v19, %v9155_v21  ;;  %v4292_v7 = vpop.f32.mrb[163].mxu1 }
 0x5e3   : > { %v4328_v60 = vmax.f32 %v4289_v41, 0.0  ;;  %v4293_v13 = vadd.f32 %v4292_v7, %v9159_v6 }
 0x5e4   : > { %v4359_v57 = vmin.f32 %v4327_v1, 6.0  ;;  %v4331_v33 = vmax.f32 %v4291_v9, 0.0 }
 0x5e5   : > { %v4360_v63 = vmin.f32 %v4328_v60, 6.0  ;;  %v4332_v55 = vmax.f32 %v4293_v13, 0.0 }
 0x5e6   : > { %4391 = vst [vmem:[%s9123_s15 + $0x10] sm:$0xff] %v4359_v57  ;;  %v4363_v40 = vmin.f32 %v4331_v33, 6.0 }
 0x5e7   : > { %4392 = vst [vmem:[%s9123_s15 + $0x18] sm:$0xff] %v4360_v63  ;;  %v4364_v18 = vmin.f32 %v4332_v55, 6.0  ;;  %v4296_v14 = vpop.f32.mrb[164].mxu1 }
 0x5e8   : > { %4395 = vst [vmem:[%s9123_s15 + $0x30] sm:$0xff] %v4363_v40  ;;  %v4423_v62 = vpack.c.bf16 %v4363_v40, %v4359_v57  ;;  %v4297_v0 = vadd.f32 %v4296_v14, %v9155_v21  ;;  %v4298_v22 = vpop.f32.mrb[165].mxu1 }
 0x5e9   : > { %4396 = vst [vmem:[%s9123_s15 + $0x38] sm:$0xff] %v4364_v18  ;;  %v4424_v5 = vpack.c.bf16 %v4364_v18, %v4360_v63  ;;  %v4299_v44 = vadd.f32 %v4298_v22, %v9159_v6  ;;  %v4300_v23 = vpop.f32.mrb[166].mxu1 }
 0x5ea   : > { %v4335_v15 = vmax.f32 %v4297_v0, 0.0  ;;  %v4301_v52 = vadd.f32 %v4300_v23, %v9155_v21  ;;  %v4302_v26 = vpop.f32.mrb[167].mxu1 }
 0x5eb   : > { %v4336_v51 = vmax.f32 %v4299_v44, 0.0  ;;  %v4303_v10 = vadd.f32 %v4302_v26, %v9159_v6  ;;  %4797 = vmatprep.mubr.bf16.mxu1 %v4424_v5 }
 0x5ec   : > { %v4367_v35 = vmin.f32 %v4335_v15, 6.0  ;;  %v4339_v54 = vmax.f32 %v4301_v52, 0.0  ;;  %4798 = vmatmul.mubr.bf16.vlgmr.msra.gmra.mrb[176].mxu1 %v4423_v62 }
 0x5ed   : > { %v4368_v12 = vmin.f32 %v4336_v51, 6.0  ;;  %v4340_v4 = vmax.f32 %v4303_v10, 0.0 }
 0x5ee   : > { %4399 = vst [vmem:[%s9123_s15 + $0x50] sm:$0xff] %v4367_v35  ;;  %v4371_v28 = vmin.f32 %v4339_v54, 6.0 }
 0x5ef   : > { %4400 = vst [vmem:[%s9123_s15 + $0x58] sm:$0xff] %v4368_v12  ;;  %v4372_v49 = vmin.f32 %v4340_v4, 6.0  ;;  %v4306_v48 = vpop.f32.mrb[168].mxu1 }
 0x5f0   : > { %4403 = vst [vmem:[%s9123_s15 + $0x70] sm:$0xff] %v4371_v28  ;;  %v4427_v24 = vpack.c.bf16 %v4371_v28, %v4367_v35  ;;  %v4307_v47 = vadd.f32 %v4306_v48, %v9155_v21  ;;  %v4308_v11 = vpop.f32.mrb[169].mxu1 }
 0x5f1   : > { %4404 = vst [vmem:[%s9123_s15 + $0x78] sm:$0xff] %v4372_v49  ;;  %v4428_v61 = vpack.c.bf16 %v4372_v49, %v4368_v12  ;;  %v4309_v59 = vadd.f32 %v4308_v11, %v9159_v6  ;;  %v4310_v2 = vpop.f32.mrb[170].mxu1 }
 0x5f2   : > { %v4343_v39 = vmax.f32 %v4307_v47, 0.0  ;;  %v4311_v42 = vadd.f32 %v4310_v2, %v9155_v21  ;;  %v4312_v3 = vpop.f32.mrb[171].mxu1 }
 0x5f3   : > { %v4344_v16 = vmax.f32 %v4309_v59, 0.0  ;;  %v4313_v58 = vadd.f32 %v4312_v3, %v9159_v6  ;;  %4805 = vmatprep.mubr.bf16.mxu1 %v4428_v61 }
 0x5f4   : > { %v4375_v32 = vmin.f32 %v4343_v39, 6.0  ;;  %v4347_v25 = vmax.f32 %v4311_v42, 0.0  ;;  %4806 = vmatmul.mubr.bf16.gmra.mrb[180].mxu1 %v4427_v24  ;;  %v6692_v42 = vld [vmem:[%s8058_s14] ss:$0 sm:$0xff] }
 0x5f5   : > { %v4376_v31 = vmin.f32 %v4344_v16, 6.0  ;;  %v4348_v53 = vmax.f32 %v4313_v58, 0.0 }
 0x5f6   : > { %4407 = vst [vmem:[%s9123_s15 + $0x90] sm:$0xff] %v4375_v32  ;;  %v4379_v43 = vmin.f32 %v4347_v25, 6.0 }
 0x5f7   : > { %4408 = vst [vmem:[%s9123_s15 + $0x98] sm:$0xff] %v4376_v31  ;;  %v4380_v30 = vmin.f32 %v4348_v53, 6.0  ;;  %v4316_v45 = vpop.f32.mrb[172].mxu1 }
 0x5f8   : > { %4411 = vst [vmem:[%s9123_s15 + $0xb0] sm:$0xff] %v4379_v43  ;;  %v4431_v46 = vpack.c.bf16 %v4379_v43, %v4375_v32  ;;  %v4317_v38 = vadd.f32 %v4316_v45, %v9155_v21  ;;  %v4318_v37 = vpop.f32.mrb[173].mxu1 }
 0x5f9   : > { %4412 = vst [vmem:[%s9123_s15 + $0xb8] sm:$0xff] %v4380_v30  ;;  %v4432_v41 = vpack.c.bf16 %v4380_v30, %v4376_v31  ;;  %v4319_v19 = vadd.f32 %v4318_v37, %v9159_v6  ;;  %v4320_v1 = vpop.f32.mrb[174].mxu1 }
 0x5fa   : > { %v4351_v9 = vmax.f32 %v4317_v38, 0.0  ;;  %v4321_v7 = vadd.f32 %v4320_v1, %v9155_v21  ;;  %v4322_v60 = vpop.f32.mrb[175].mxu1 }
 0x5fb   : > { %v4352_v13 = vmax.f32 %v4319_v19, 0.0  ;;  %v4323_v57 = vadd.f32 %v4322_v60, %v9159_v6  ;;  %4813 = vmatprep.mubr.bf16.mxu1 %v4432_v41  ;;  %v4846_v6 = vld [vmem:[%s8073_s30] sm:$0xff] }
 0x5fc   : > { %v4383_v33 = vmin.f32 %v4351_v9, 6.0  ;;  %v4355_v63 = vmax.f32 %v4321_v7, 0.0  ;;  %4814 = vmatmul.mubr.bf16.gmra.mrb[184].mxu1 %v4431_v46  ;;  %7016 = vmatprep.mubr.msk.f32.mxu0 %vm1960_vm0, %v4846_v6 }
 0x5fd   : > { %v4384_v55 = vmin.f32 %v4352_v13, 6.0  ;;  %v4356_v40 = vmax.f32 %v4323_v57, 0.0 }
 0x5fe   : > { %4415 = vst [vmem:[%s9123_s15 + $0xd0] sm:$0xff] %v4383_v33  ;;  %v4387_v18 = vmin.f32 %v4355_v63, 6.0 }
 0x5ff   : > { %4416 = vst [vmem:[%s9123_s15 + $0xd8] sm:$0xff] %v4384_v55  ;;  %v4388_v14 = vmin.f32 %v4356_v40, 6.0 }
 0x600   : > { %4419 = vst [vmem:[%s9123_s15 + $0xf0] sm:$0xff] %v4387_v18  ;;  %v4435_v62 = vpack.c.bf16 %v4387_v18, %v4383_v33 }
 0x601   : > { %4420 = vst [vmem:[%s9123_s15 + $0xf8] sm:$0xff] %v4388_v14  ;;  %v4436_v21 = vpack.c.bf16 %v4388_v14, %v4384_v55 }
 0x603   : > { %4821 = vmatprep.mubr.bf16.mxu1 %v4436_v21 }
 0x604   : > { %4822 = vmatmul.mubr.bf16.gmra.mrb[188].mxu1 %v4435_v62 }
 0x605   : > { %5299 = vmatprep.mubr.bf16.mxu1 %v7997_v8 }
 0x67f   : > { %v6851_v0 = vpop.f32.mrb[64].mxu0 }
 0x680   : > { %v6852_v22 = vpop.f32.mrb[65].mxu0 }
 0x681   : > { %v6853_v5 = vadd.f32 %v6852_v22, %v6851_v0  ;;  %v6854_v44 = vpop.f32.mrb[66].mxu0 }
 0x682   : > { %v6855_v23 = vpop.f32.mrb[67].mxu0 }
 0x683   : > { %v6856_v15 = vadd.f32 %v6855_v23, %v6854_v44  ;;  %v4735_v58 = vadd.f32 %v6853_v5, %v6692_v42 }
 0x685   : > { %v4738_v53 = vadd.f32 %v6856_v15, %v6692_v42 }
 0x687   : > { %v6857_v52 = vpop.f32.mrb[68].mxu0 }
 0x688   : > { %v6858_v26 = vpop.f32.mrb[69].mxu0 }
 0x689   : > { %v6859_v51 = vadd.f32 %v6858_v26, %v6857_v52  ;;  %v6860_v10 = vpop.f32.mrb[70].mxu0 }
 0x68a   : > { %v6861_v35 = vpop.f32.mrb[71].mxu0 }
 0x68b   : > { %v6862_v54 = vadd.f32 %v6861_v35, %v6860_v10  ;;  %v4743_v19 = vadd.f32 %v6859_v51, %v6692_v42 }
 0x68d   : > { %v4746_v57 = vadd.f32 %v6862_v54, %v6692_v42 }
 0x68f   : > { %v6863_v12 = vpop.f32.mrb[72].mxu0 }
 0x690   : > { %v6864_v4 = vpop.f32.mrb[73].mxu0 }
 0x691   : > { %v6865_v28 = vadd.f32 %v6864_v4, %v6863_v12  ;;  %v6866_v49 = vpop.f32.mrb[74].mxu0 }
 0x692   : > { %v6867_v48 = vpop.f32.mrb[75].mxu0 }
 0x693   : > { %v6868_v24 = vadd.f32 %v6867_v48, %v6866_v49  ;;  %v4751_v6 = vadd.f32 %v6865_v28, %v6692_v42 }
 0x695   : > { %v4754_v15 = vadd.f32 %v6868_v24, %v6692_v42 }
 0x697   : > { %v6869_v47 = vpop.f32.mrb[76].mxu0 }
 0x698   : > { %v6870_v11 = vpop.f32.mrb[77].mxu0 }
 0x699   : > { %v6871_v61 = vadd.f32 %v6870_v11, %v6869_v47  ;;  %v6872_v59 = vpop.f32.mrb[78].mxu0 }
 0x69a   : > { %v6873_v2 = vpop.f32.mrb[79].mxu0 }
 0x69b   : > { %v6874_v39 = vadd.f32 %v6873_v2, %v6872_v59  ;;  %v4759_v49 = vadd.f32 %v6871_v61, %v6692_v42 }
 0x69d   : > { %v4762_v2 = vadd.f32 %v6874_v39, %v6692_v42  ;;  %v4847_v39 = vld [vmem:[%s8073_s30 + $0x8] sm:$0xff]  ;;  %v4848_v42 = vld [vmem:[%s8073_s30 + $0x10] sm:$0xff] }
 0x6bf   : > { %v6891_v3 = vpop.f32.mrb[176].mxu1 }
 0x6c0   : > { %v6892_v16 = vpop.f32.mrb[177].mxu1 }
 0x6c1   : > { %v6893_v32 = vadd.f32 %v6892_v16, %v6891_v3  ;;  %v6894_v25 = vpop.f32.mrb[178].mxu1 }
 0x6c2   : > { %v6895_v31 = vpop.f32.mrb[179].mxu1 }
 0x6c3   : > { %v4800_v43 = vadd.f32 %v6893_v32, %v4735_v58  ;;  %v6896_v30 = vadd.f32 %v6895_v31, %v6894_v25 }
 0x6c5   : > { %v4830_v45 = vmax.f32 %v4800_v43, 0.0  ;;  %v4803_v46 = vadd.f32 %v6896_v30, %v4738_v53  ;;  %v4849_v43 = vld [vmem:[%s8073_s30 + $0x18] sm:$0xff]  ;;  %v4850_v30 = vld [vmem:[%s8073_s30 + $0x20] sm:$0xff] }
 0x6c7   : > { %v4831_v38 = vmax.f32 %v4803_v46, 0.0  ;;  %v6897_v37 = vpop.f32.mrb[180].mxu1  ;;  %v4838_v1 = vmin.f32 %v4830_v45, 6.0  ;;  %v4851_v45 = vld [vmem:[%s8073_s30 + $0x28] sm:$0xff]  ;;  %v4852_v46 = vld [vmem:[%s8073_s30 + $0x30] sm:$0xff] }
 0x6c8   : > { %v6898_v41 = vpop.f32.mrb[181].mxu1 }
 0x6c9   : > { %v4839_v9 = vmin.f32 %v4831_v38, 6.0  ;;  %v6899_v7 = vadd.f32 %v6898_v41, %v6897_v37  ;;  %v6900_v60 = vpop.f32.mrb[182].mxu1  ;;  %v4853_v38 = vld [vmem:[%s8073_s30 + $0x38] sm:$0xff]  ;;  %v4854_v37 = vld [vmem:[%s8073_s30 + $0x40] sm:$0xff]  ;;  %v4855_v41 = vld [vmem:[%s8073_s30 + $0x48] sm:$0xff] }
 0x6ca   : > { %v6901_v13 = vpop.f32.mrb[183].mxu1 }
 0x6cb   : > { %v4808_v33 = vadd.f32 %v6899_v7, %v4743_v19  ;;  %v6902_v63 = vadd.f32 %v6901_v13, %v6900_v60  ;;  %v7143_v55 = vpack.c.bf16 %v4839_v9, %v4838_v1  ;;  %v4856_v19 = vld [vmem:[%s8073_s30 + $0x50] sm:$0xff]  ;;  %v4857_v1 = vld [vmem:[%s8073_s30 + $0x58] sm:$0xff]  ;;  %v4858_v9 = vld [vmem:[%s8073_s30 + $0x60] sm:$0xff] }
 0x6cc   : > { %v4859_v7 = vld [vmem:[%s8073_s30 + $0x68] sm:$0xff]  ;;  %v4860_v60 = vld [vmem:[%s8073_s30 + $0x70] sm:$0xff]  ;;  %v4861_v13 = vld [vmem:[%s8073_s30 + $0x78] sm:$0xff] }
 0x6cd   : > { %v4832_v40 = vmax.f32 %v4808_v33, 0.0  ;;  %v4811_v18 = vadd.f32 %v6902_v63, %v4746_v57  ;;  %7144 = vmatprep.subr.bf16.mxu0 %v7143_v55  ;;  %v4862_v57 = vld [vmem:[%s8073_s30 + $0x80] sm:$0xff]  ;;  %v4863_v33 = vld [vmem:[%s8073_s30 + $0x88] sm:$0xff] }
 0x6ce   : > { %7146 = vmatpush3.bf16.msra.mxu0 %v7143_v55  ;;  %v7787_v63 = vld [vmem:[%s9480_s6 + $0x4] ss:$8 sps:$4 sm:$0xff]   ;;  %v7785_v55 = vld [vmem:[%s9480_s6] ss:$8 sps:$4 sm:$0xff]  }
 0x6cf   : > { %v4833_v14 = vmax.f32 %v4811_v18, 0.0  ;;  %v6903_v62 = vpop.f32.mrb[184].mxu1  ;;  %v4840_v0 = vmin.f32 %v4832_v40, 6.0  ;;  %5267 = vmatprep.subr.bf16.mxu1 %v7787_v63  ;;  %v7790_v40 = vld [vmem:[%s9480_s6 + $0x14] ss:$8 sps:$4 sm:$0xff]  }
 0x6d0   : > { %v6904_v21 = vpop.f32.mrb[185].mxu1  ;;  %5268 = vmatpush1.bf16.msra.mxu1 %v7785_v55  ;;  %v7788_v18 = vld [vmem:[%s9480_s6 + $0x10] ss:$8 sps:$4 sm:$0xff]  }
 0x6d1   : > { %v4841_v22 = vmin.f32 %v4833_v14, 6.0  ;;  %v6905_v5 = vadd.f32 %v6904_v21, %v6903_v62  ;;  %v6906_v44 = vpop.f32.mrb[186].mxu1  ;;  %5269 = vmatprep.subr.bf16.mxu1 %v7790_v40  ;;  %v7793_v14 = vld [vmem:[%s9480_s6 + $0x24] ss:$8 sps:$4 sm:$0xff]   ;;  %v7791_v62 = vld [vmem:[%s9480_s6 + $0x20] ss:$8 sps:$4 sm:$0xff]  }
 0x6d2   : > { %v6907_v23 = vpop.f32.mrb[187].mxu1  ;;  %v7796_v21 = vld [vmem:[%s9480_s6 + $0x34] ss:$8 sps:$4 sm:$0xff]  }
 0x6d3   : > { %v4816_v52 = vadd.f32 %v6905_v5, %v4751_v6  ;;  %v6908_v26 = vadd.f32 %v6907_v23, %v6906_v44  ;;  %v7147_v51 = vpack.c.bf16 %v4841_v22, %v4840_v0  ;;  %v7794_v6 = vld [vmem:[%s9480_s6 + $0x30] ss:$8 sps:$4 sm:$0xff]   ;;  %v7799_v0 = vld [vmem:[%s9480_s6 + $0x44] ss:$8 sps:$4 sm:$0xff]   ;;  %v7797_v22 = vld [vmem:[%s9480_s6 + $0x40] ss:$8 sps:$4 sm:$0xff]  }
 0x6d4   : > { %5270 = vmatpush1.bf16.msra.mxu1 %v7788_v18  ;;  %v7802_v5 = vld [vmem:[%s9480_s6 + $0x54] ss:$8 sps:$4 sm:$0xff]   ;;  %v7800_v44 = vld [vmem:[%s9480_s6 + $0x50] ss:$8 sps:$4 sm:$0xff]   ;;  %v7805_v23 = vld [vmem:[%s9480_s6 + $0x64] ss:$8 sps:$4 sm:$0xff]  }
 0x6d5   : > { %v4834_v10 = vmax.f32 %v4816_v52, 0.0  ;;  %v4819_v35 = vadd.f32 %v6908_v26, %v4754_v15  ;;  %7148 = vmatprep.subr.bf16.mxu0 %v7147_v51  ;;  %5271 = vmatprep.subr.bf16.mxu1 %v7793_v14  ;;  %v7803_v15 = vld [vmem:[%s9480_s6 + $0x60] ss:$8 sps:$4 sm:$0xff]   ;;  %v7808_v52 = vld [vmem:[%s9480_s6 + $0x74] ss:$8 sps:$4 sm:$0xff]  }
 0x6d6   : > { %7150 = vmatpush3.bf16.msra.mxu0 %v7147_v51  ;;  %v7806_v26 = vld [vmem:[%s9480_s6 + $0x70] ss:$8 sps:$4 sm:$0xff]   ;;  %v7809_v51 = vld [vmem:[%s8088_s20 + $0x40] sm:$0xff]   ;;  %s9490_s6 = sld [smem:[#allocation18_spill]] }
 0x6d7   : > { %v4835_v54 = vmax.f32 %v4819_v35, 0.0  ;;  %v6909_v12 = vpop.f32.mrb[188].mxu1  ;;  %v4842_v48 = vmin.f32 %v4834_v10, 6.0  ;;  %v5073_v10 = vld [vmem:[%s8063_s19] sm:$0xff] }
 0x6d8   : > { %v6910_v4 = vpop.f32.mrb[189].mxu1  ;;  %5272 = vmatpush1.bf16.msra.mxu1 %v7791_v62  ;;  %v5124_v63 = vrot.slane %v5073_v10, %v8870_v20 }
 0x6d9   : > { %v4843_v47 = vmin.f32 %v4835_v54, 6.0  ;;  %v6911_v28 = vadd.f32 %v6910_v4, %v6909_v12  ;;  %v6912_v11 = vpop.f32.mrb[190].mxu1  ;;  %5273 = vmatprep.subr.bf16.mxu1 %v7796_v21  ;;  %v5078_v54 = vrot.slane %v5073_v10, %v8418_v27  ;;  %v5084_v4 = vrot.slane %v5073_v10, %v8422_v29 }
 0x6da   : > { %v6913_v59 = vpop.f32.mrb[191].mxu1 }
 0x6db   : > { %v4824_v24 = vadd.f32 %v6911_v28, %v4759_v49  ;;  %v6914_v3 = vadd.f32 %v6913_v59, %v6912_v11  ;;  %v7151_v16 = vpack.c.bf16 %v4843_v47, %v4842_v48  ;;  %v5092_v11 = vrot.slane %v5073_v10, %v8771_v56 }
 0x6dc   : > { %5274 = vmatpush1.bf16.msra.mxu1 %v7794_v6  ;;  %v5132_v6 = vrot.slane %v5073_v10, %v8883_v50 }
 0x6dd   : > { %v4836_v58 = vmax.f32 %v4824_v24, 0.0  ;;  %v4827_v32 = vadd.f32 %v6914_v3, %v4762_v2  ;;  %7152 = vmatprep.subr.bf16.mxu0 %v7151_v16  ;;  %5275 = vmatprep.subr.bf16.mxu1 %v7799_v0 }
 0x6de   : > { %7154 = vmatpush3.bf16.msra.mxu0 %v7151_v16 }
 0x6df   : > { %v4837_v61 = vmax.f32 %v4827_v32, 0.0  ;;  %v4844_v25 = vmin.f32 %v4836_v58, 6.0 }
 0x6e0   : > { %5276 = vmatpush1.bf16.msra.mxu1 %v7797_v22 }
 0x6e1   : > { %v4845_v31 = vmin.f32 %v4837_v61, 6.0  ;;  %5277 = vmatprep.subr.bf16.mxu1 %v7802_v5  ;;  %v5100_v61 = vrot.slane %v5073_v10, %v8835_v17 }
 0x6e3   : > { %v7155_v53 = vpack.c.bf16 %v4845_v31, %v4844_v25 }
 0x6e4   : > { %5278 = vmatpush1.bf16.msra.mxu1 %v7800_v44 }
 0x6e5   : > { %7156 = vmatprep.subr.bf16.mxu0 %v7155_v53  ;;  %5279 = vmatprep.subr.bf16.mxu1 %v7805_v23 }
 0x6e6   : > { %7158 = vmatpush3.bf16.msra.mxu0 %v7155_v53 }
 0x6e8   : > { %5280 = vmatpush1.bf16.msra.mxu1 %v7803_v15 }
 0x6e9   : > { %7017 = vmatmul.mubr.msk.f32.vlgmr.msra.gmra.mrb[80].mxu0 %vm1960_vm0, %v4847_v39  ;;  %5281 = vmatprep.subr.bf16.mxu1 %v7808_v52 }
 0x6ea   : > { %7019 = vmatprep.mubr.msk.f32.mxu0 %vm1960_vm0, %v4848_v42 }
 0x6ec   : > { %5282 = vmatpush1.bf16.msra.mxu1 %v7806_v26  ;;  %v6743_v26 = vld [vmem:[%s8063_s19 + $0x8] ss:$0 sm:$0xff] }
 0x6ed   : > { %7020 = vmatmul.mubr.msk.f32.gmra.mrb[82].mxu0 %vm1960_vm0, %v4849_v43  ;;  %6941 = vmatprep.subr.bf16.mxu1 %v7809_v51 }
 0x6ee   : > { %7022 = vmatprep.mubr.msk.f32.mxu0 %vm1960_vm0, %v4850_v30  ;;  %v5108_v30 = vrot.slane %v5073_v10, %v8853_v34 }
 0x6f1   : > { %7023 = vmatmul.mubr.msk.f32.gmra.mrb[84].mxu0 %vm1960_vm0, %v4851_v45 }
 0x6f2   : > { %7025 = vmatprep.mubr.msk.f32.mxu0 %vm1960_vm0, %v4852_v46 }
 0x6f5   : > { %7026 = vmatmul.mubr.msk.f32.gmra.mrb[86].mxu0 %vm1960_vm0, %v4853_v38 }
 0x6f6   : > { %7028 = vmatprep.mubr.msk.f32.mxu0 %vm1960_vm0, %v4854_v37 }
 0x6f9   : > { %7029 = vmatmul.mubr.msk.f32.gmra.mrb[88].mxu0 %vm1960_vm0, %v4855_v41 }
 0x6fa   : > { %7031 = vmatprep.mubr.msk.f32.mxu0 %vm1960_vm0, %v4856_v19 }
 0x6fd   : > { %7032 = vmatmul.mubr.msk.f32.gmra.mrb[90].mxu0 %vm1960_vm0, %v4857_v1  ;;  %v5116_v1 = vrot.slane %v5073_v10, %v8863_v36 }
 0x6fe   : > { %7034 = vmatprep.mubr.msk.f32.mxu0 %vm1960_vm0, %v4858_v9 }
 0x701   : > { %7035 = vmatmul.mubr.msk.f32.gmra.mrb[92].mxu0 %vm1960_vm0, %v4859_v7 }
 0x702   : > { %7037 = vmatprep.mubr.msk.f32.mxu0 %vm1960_vm0, %v4860_v60 }
 0x705   : > { %7038 = vmatmul.mubr.msk.f32.gmra.mrb[94].mxu0 %vm1960_vm0, %v4861_v13 }
 0x706   : > { %7040 = vmatprep.mubr.msk.f32.mxu0 %vm1960_vm0, %v4862_v57 }
 0x709   : > { %7041 = vmatmul.mubr.msk.f32.gmra.mrb[96].mxu0 %vm1960_vm0, %v4863_v33 }
 0x7bc   : > { %v7018_v35 = vpop.f32.mrb[80].mxu0 }
 0x7bd   : > { %v4984_v12 = vpop.f32.mrb[81].mxu0  ;;  %v5080_v48 = vmul.f32 %v7018_v35, %v5078_v54 }
 0x7be   : > { %v5079_v59 = vmul.f32 %v5078_v54, %v4984_v12 }
 0x7c0   : > { %v7021_v49 = vpop.f32.mrb[82].mxu0 }
 0x7c1   : > { %v5086_v47 = vmul.f32 %v7021_v49, %v5084_v4  ;;  %v4994_v28 = vpop.f32.mrb[83].mxu0  ;;  %v6744_v49 = vld [vmem:[%s9485_s10] ss:$0 sm:$0xff]  ;;  %s9486_s10 = sld [smem:[#allocation14_spill]] }
 0x7c2   : > { %v5085_v2 = vmul.f32 %v5084_v4, %v4994_v28 }
 0x7c3   : > { %v5088_v24 = vadd.f32 %v5086_v47, %v5080_v48 }
 0x7c4   : > { %v5087_v3 = vadd.f32 %v5085_v2, %v5079_v59  ;;  %v7024_v16 = vpop.f32.mrb[84].mxu0 }
 0x7c5   : > { %v5094_v58 = vmul.f32 %v7024_v16, %v5092_v11  ;;  %v5004_v32 = vpop.f32.mrb[85].mxu0  ;;  %v7810_v16 = vld [vmem:[%s8088_s20] sm:$0xff]  }
 0x7c6   : > { %v5093_v25 = vmul.f32 %v5092_v11, %v5004_v32  ;;  %v7811_v32 = vld [vmem:[%s8088_s20 + $0x48] sm:$0xff]  }
 0x7c7   : > { %v5096_v31 = vadd.f32 %v5094_v58, %v5088_v24 }
 0x7c8   : > { %v5095_v53 = vadd.f32 %v5093_v25, %v5087_v3  ;;  %v7027_v39 = vpop.f32.mrb[86].mxu0  ;;  %v7813_v25 = vld [vmem:[%s8088_s20 + $0x50] sm:$0xff]  }
 0x7c9   : > { %v5102_v42 = vmul.f32 %v7027_v39, %v5100_v61  ;;  %v5014_v43 = vpop.f32.mrb[87].mxu0  ;;  %v7816_v39 = vld [vmem:[%s8088_s20 + $0x18] sm:$0xff]  }
 0x7ca   : > { %v5101_v45 = vmul.f32 %v5100_v61, %v5014_v43  ;;  %v7812_v61 = vld [vmem:[%s8088_s20 + $0x8] sm:$0xff]   ;;  %v7818_v43 = vld [vmem:[%s8088_s20 + $0x20] sm:$0xff]  }
 0x7cb   : > { %v5104_v46 = vadd.f32 %v5102_v42, %v5096_v31  ;;  %v7814_v31 = vld [vmem:[%s8088_s20 + $0x10] sm:$0xff]   ;;  %v7817_v42 = vld [vmem:[%s8088_s20 + $0x60] sm:$0xff]  }
 0x7cc   : > { %v5103_v38 = vadd.f32 %v5101_v45, %v5095_v53  ;;  %v7030_v37 = vpop.f32.mrb[88].mxu0  ;;  %v7815_v53 = vld [vmem:[%s8088_s20 + $0x58] sm:$0xff]   ;;  %v7820_v45 = vld [vmem:[%s8088_s20 + $0x28] sm:$0xff]  }
 0x7cd   : > { %v5110_v41 = vmul.f32 %v7030_v37, %v5108_v30  ;;  %v5024_v19 = vpop.f32.mrb[89].mxu0  ;;  %v7823_v37 = vld [vmem:[%s8088_s20 + $0x78] sm:$0xff]  }
 0x7ce   : > { %v5109_v9 = vmul.f32 %v5108_v30, %v5024_v19  ;;  %v7819_v30 = vld [vmem:[%s8088_s20 + $0x68] sm:$0xff]   ;;  %v5175_v19 = vld [vmem:[%s9486_s10] sm:$0x3]  ;;  %s9488_s10 = sld [smem:[#allocation15_spill]] }
 0x7cf   : > { %v5112_v7 = vadd.f32 %v5110_v41, %v5104_v46  ;;  %v7821_v46 = vld [vmem:[%s8088_s20 + $0x70] sm:$0xff]   ;;  %v7824_v41 = vld [vmem:[%s8088_s20 + $0x38] sm:$0xff]  }
 0x7d0   : > { %v5111_v60 = vadd.f32 %v5109_v9, %v5103_v38  ;;  %v7033_v13 = vpop.f32.mrb[90].mxu0  ;;  %v7822_v38 = vld [vmem:[%s8088_s20 + $0x30] sm:$0xff]   ;;  %v5184_v9 = vrot.slane %v5175_v19, %v8422_v29 }
 0x7d1   : > { %v5118_v57 = vmul.f32 %v7033_v13, %v5116_v1  ;;  %v5034_v33 = vpop.f32.mrb[91].mxu0 }
 0x7d2   : > { %v5117_v55 = vmul.f32 %v5116_v1, %v5034_v33  ;;  %v5180_v1 = vrot.slane %v5175_v19, %v8418_v27  ;;  %v7848_v19 = vld [vmem:[%s9489_s3 + $0x74] ss:$8 sps:$4 sm:$0xff]  }
 0x7d3   : > { %v5120_v40 = vadd.f32 %v5118_v57, %v5112_v7 }
 0x7d4   : > { %v5119_v18 = vadd.f32 %v5117_v55, %v5111_v60  ;;  %v7036_v14 = vpop.f32.mrb[92].mxu0 }
 0x7d5   : > { %v5126_v62 = vmul.f32 %v7036_v14, %v5124_v63  ;;  %v5044_v21 = vpop.f32.mrb[93].mxu0 }
 0x7d6   : > { %v5125_v0 = vmul.f32 %v5124_v63, %v5044_v21 }
 0x7d7   : > { %v5128_v22 = vadd.f32 %v5126_v62, %v5120_v40 }
 0x7d8   : > { %v5127_v5 = vadd.f32 %v5125_v0, %v5119_v18  ;;  %v7039_v44 = vpop.f32.mrb[94].mxu0 }
 0x7d9   : > { %v5134_v23 = vmul.f32 %v7039_v44, %v5132_v6  ;;  %v5054_v15 = vpop.f32.mrb[95].mxu0 }
 0x7da   : > { %v5133_v52 = vmul.f32 %v5132_v6, %v5054_v15  ;;  %v7998_v15 = vmov 0.0|0.0  }
 0x7db   : > { %v5136_v51 = vadd.f32 %v5134_v23, %v5128_v22 }
 0x7dc   : > { %v5135_v35 = vadd.f32 %v5133_v52, %v5127_v5  ;;  %v7042_v54 = vpop.f32.mrb[96].mxu0  ;;  %v8000_v52 = vmov 0.0  }
 0x7dd   : > { %v5142_v12 = vmul.f32 %v7042_v54, %v6743_v26  ;;  %v5064_v4 = vpop.f32.mrb[97].mxu0 }
 0x7de   : > { %v5141_v48 = vmul.f32 %v6743_v26, %v5064_v4 }
 0x7df   : > { %v5144_v10 = vadd.f32 %v5142_v12, %v5136_v51  ;;  %v6761_v51 = vld [vmem:[%s9488_s10] ss:$0 sm:$0xff]  ;;  %s9492_s10 = sld [smem:[#allocation16_spill]] }
 0x7e0   : > { %v5143_v47 = vadd.f32 %v5141_v48, %v5135_v35 }
 0x7e1   : > { %v5153_v28 = vadd.f32 %v6744_v49, %v5144_v10 }
 0x7e2   : > { %v5152_v11 = vadd.f32 %v6744_v49, %v5143_v47 }
 0x7e3   : > { %v5155_v59 = vmax.f32 %v5153_v28, 0.0 }
 0x7e4   : > { %v5154_v2 = vmax.f32 %v5152_v11, 0.0 }
 0x7e5   : > { %v5157_v24 = vmin.f32 %v5155_v59, 6.0 }
 0x7e6   : > { %v5156_v3 = vmin.f32 %v5154_v2, 6.0  ;;  %v7827_v2 = vld [vmem:[%s9489_s3 + $0x4] ss:$8 sps:$4 sm:$0xff]  }
 0x7e8   : > { %v5158_v58 = vpack.c.bf16 %v5157_v24, %v5156_v3  ;;  %v5504_v3 = vld [vmem:[%s9490_s6] sm:$0xff] }
 0x7ea   : > { %5300 = vmatmul.mubr.bf16.vlgmr.msra.gmra.mrb[192].mxu1 %v5158_v58  ;;  %v5505_v58 = vld [vmem:[%s9490_s6 + $0x8] sm:$0xff] }
 0x7eb   : > { %6942 = vmatpush3.bf16.msra.mxu1 %v7810_v16  ;;  %v7825_v16 = vld [vmem:[%s9489_s3] ss:$8 sps:$4 sm:$0xff]  }
 0x7ec   : > { %6943 = vmatprep.subr.bf16.mxu1 %v7811_v32  ;;  %v5506_v32 = vld [vmem:[%s9490_s6 + $0x10] sm:$0xff] }
 0x7ef   : > { %6944 = vmatpush3.bf16.msra.mxu1 %v7812_v61  ;;  %v5507_v61 = vld [vmem:[%s9490_s6 + $0x18] sm:$0xff] }
 0x7f0   : > { %6945 = vmatprep.subr.bf16.mxu1 %v7813_v25  ;;  %v5508_v25 = vld [vmem:[%s9490_s6 + $0x20] sm:$0xf]  ;;  %s9494_s6 = sld [smem:[#allocation20_spill]] }
 0x7f3   : > { %6946 = vmatpush3.bf16.msra.mxu1 %v7814_v31  ;;  %v7830_v31 = vld [vmem:[%s9489_s3 + $0x14] ss:$8 sps:$4 sm:$0xff]  }
 0x7f4   : > { %6947 = vmatprep.subr.bf16.mxu1 %v7815_v53  ;;  %v7828_v53 = vld [vmem:[%s9489_s3 + $0x10] ss:$8 sps:$4 sm:$0xff]  }
 0x7f7   : > { %6948 = vmatpush3.bf16.msra.mxu1 %v7816_v39  ;;  %v7833_v39 = vld [vmem:[%s9489_s3 + $0x24] ss:$8 sps:$4 sm:$0xff]  }
 0x7f8   : > { %6949 = vmatprep.subr.bf16.mxu1 %v7817_v42  ;;  %v7831_v42 = vld [vmem:[%s9489_s3 + $0x20] ss:$8 sps:$4 sm:$0xff]  }
 0x7fb   : > { %6950 = vmatpush3.bf16.msra.mxu1 %v7818_v43  ;;  %v7836_v43 = vld [vmem:[%s9489_s3 + $0x34] ss:$8 sps:$4 sm:$0xff]  }
 0x7fc   : > { %6951 = vmatprep.subr.bf16.mxu1 %v7819_v30  ;;  %v7834_v30 = vld [vmem:[%s9489_s3 + $0x30] ss:$8 sps:$4 sm:$0xff]  }
 0x7ff   : > { %6952 = vmatpush3.bf16.msra.mxu1 %v7820_v45  ;;  %v7839_v45 = vld [vmem:[%s9489_s3 + $0x44] ss:$8 sps:$4 sm:$0xff]  }
 0x800   : > { %6953 = vmatprep.subr.bf16.mxu1 %v7821_v46  ;;  %v7842_v46 = vld [vmem:[%s9489_s3 + $0x54] ss:$8 sps:$4 sm:$0xff]  }
 0x803   : > { %6954 = vmatpush3.bf16.msra.mxu1 %v7822_v38  ;;  %v7840_v38 = vld [vmem:[%s9489_s3 + $0x50] ss:$8 sps:$4 sm:$0xff]  }
 0x804   : > { %6955 = vmatprep.subr.bf16.mxu1 %v7823_v37  ;;  %v7845_v37 = vld [vmem:[%s9489_s3 + $0x64] ss:$8 sps:$4 sm:$0xff]  }
 0x807   : > { %6956 = vmatpush3.bf16.msra.mxu1 %v7824_v41  ;;  %v7843_v41 = vld [vmem:[%s9489_s3 + $0x60] ss:$8 sps:$4 sm:$0xff]  }
 0x808   : > { %7159 = vmatprep.subr.bf16.mxu1 %v7998_v15 }
 0x8bd   : > { %v5301_v7 = vpop.f32.mrb[192].mxu1 }
 0x8be   : > { %v5302_v60 = vadd.f32 %v5301_v7, %v5180_v1  ;;  %v5303_v13 = vpop.f32.mrb[193].mxu1 }
 0x8bf   : > { %v5304_v57 = vadd.f32 %v5303_v13, %v5184_v9  ;;  %v5305_v33 = vpop.f32.mrb[194].mxu1 }
 0x8c0   : > { %v5310_v63 = vmax.f32 %v5302_v60, 0.0  ;;  %v5306_v55 = vadd.f32 %v5305_v33, %v5180_v1  ;;  %v5307_v40 = vpop.f32.mrb[195].mxu1  ;;  %v7846_v1 = vld [vmem:[%s9489_s3 + $0x70] ss:$8 sps:$4 sm:$0xff]  }
 0x8c1   : > { %v5311_v18 = vmax.f32 %v5304_v57, 0.0  ;;  %v5308_v14 = vadd.f32 %v5307_v40, %v5184_v9 }
 0x8c2   : > { %v5314_v62 = vmin.f32 %v5310_v63, 6.0  ;;  %v5312_v21 = vmax.f32 %v5306_v55, 0.0 }
 0x8c3   : > { %v5315_v6 = vmin.f32 %v5311_v18, 6.0  ;;  %v5313_v0 = vmax.f32 %v5308_v14, 0.0 }
 0x8c4   : > { %5318 = vst [vmem:[%s1013_s5] sm:$0xff] %v5314_v62  ;;  %v5316_v22 = vmin.f32 %v5312_v21, 6.0 }
 0x8c5   : > { %5319 = vst [vmem:[%s1013_s5 + $0x8] sm:$0xff] %v5315_v6  ;;  %v5317_v5 = vmin.f32 %v5313_v0, 6.0 }
 0x8c6   : > { %5320 = vst [vmem:[%s1013_s5 + $0x10] sm:$0xff] %v5316_v22  ;;  %v5322_v44 = vpack.c.bf16 %v5316_v22, %v5314_v62  ;;  %v5615_v62 = vld [vmem:[%s9492_s10] sm:$0xff] }
 0x8c7   : > { %5321 = vst [vmem:[%s1013_s5 + $0x18] sm:$0xff] %v5317_v5  ;;  %v5323_v23 = vpack.c.bf16 %v5317_v5, %v5315_v6  ;;  %s9491_s5 = sld [smem:[#allocation21_spill]]  ;;  %v5625_v21 = vrot.slane %v5615_v62, %v8422_v29  ;;  %v5620_v6 = vrot.slane %v5615_v62, %v8418_v27 }
 0x8c9   : > { %5491 = vmatprep.mubr.bf16.mxu1 %v5323_v23  ;;  %v5640_v23 = vrot.slane %v5615_v62, %v8835_v17 }
 0x8ca   : > { %5492 = vmatmul.mubr.bf16.vlgmr.msra.gmra.mrb[196].mxu1 %v5322_v44  ;;  %v5634_v44 = vrot.slane %v5615_v62, %v8771_v56 }
 0x8cb   : > { %7047 = vmatprep.mubr.msk.f32.mxu1 %vm7999_vm1, %v8000_v52 }
 0x8cd   : > { %v7849_v9 = vld [vmem:[%s9491_s5 + $0x40] sm:$0xff]   ;;  %v7851_v60 = vld [vmem:[%s9491_s5 + $0x48] sm:$0xff]   ;;  %v7853_v57 = vld [vmem:[%s9491_s5 + $0x50] sm:$0xff]  }
 0x8ce   : > { %v7850_v7 = vld [vmem:[%s9491_s5] sm:$0xff]   ;;  %6970 = vmatprep.subr.bf16.mxu0 %v7849_v9  ;;  %v7852_v13 = vld [vmem:[%s9491_s5 + $0x8] sm:$0xff]   ;;  %v7854_v33 = vld [vmem:[%s9491_s5 + $0x10] sm:$0xff]  }
 0x8cf   : > { %6971 = vmatpush3.bf16.msra.mxu0 %v7850_v7  ;;  %v7855_v63 = vld [vmem:[%s9491_s5 + $0x58] sm:$0xff]   ;;  %v7857_v40 = vld [vmem:[%s9491_s5 + $0x60] sm:$0xff]   ;;  %v7859_v14 = vld [vmem:[%s9491_s5 + $0x68] sm:$0xff]  }
 0x8d0   : > { %6972 = vmatprep.subr.bf16.mxu0 %v7851_v60  ;;  %v7856_v55 = vld [vmem:[%s9491_s5 + $0x18] sm:$0xff]   ;;  %v7858_v18 = vld [vmem:[%s9491_s5 + $0x20] sm:$0xff]  }
 0x8d1   : > { %v7864_v9 = vld [vmem:[%s9491_s5 + $0x38] sm:$0xff]   ;;  %v5709_v7 = vld [vmem:[%s9494_s6] sm:$0x3]  ;;  %s9497_s6 = sld [smem:[#allocation26_spill]] }
 0x8d2   : > { %v5714_v60 = vrot.slane %v5709_v7, %v8418_v27 }
 0x8d3   : > { %6973 = vmatpush3.bf16.msra.mxu0 %v7852_v13  ;;  %v5718_v13 = vrot.slane %v5709_v7, %v8422_v29 }
 0x8d4   : > { %6974 = vmatprep.subr.bf16.mxu0 %v7853_v57 }
 0x8d7   : > { %6975 = vmatpush3.bf16.msra.mxu0 %v7854_v33 }
 0x8d8   : > { %6976 = vmatprep.subr.bf16.mxu0 %v7855_v63 }
 0x8db   : > { %6977 = vmatpush3.bf16.msra.mxu0 %v7856_v55 }
 0x8dc   : > { %6978 = vmatprep.subr.bf16.mxu0 %v7857_v40 }
 0x8df   : > { %6979 = vmatpush3.bf16.msra.mxu0 %v7858_v18 }
 0x8e0   : > { %6980 = vmatprep.subr.bf16.mxu0 %v7859_v14 }
 0x99d   : > { %v6957_v26 = vpop.f32.mrb[196].mxu1 }
 0x99e   : > { %v6958_v35 = vpop.f32.mrb[197].mxu1 }
 0x99f   : > { %v6959_v54 = vadd.f32 %v6958_v35, %v6957_v26  ;;  %v6960_v12 = vpop.f32.mrb[198].mxu1  ;;  %v5649_v35 = vrot.slane %v5615_v62, %v8853_v34 }
 0x9a0   : > { %v6961_v4 = vpop.f32.mrb[199].mxu1 }
 0x9a1   : > { %v5494_v49 = vadd.f32 %v6959_v54, %v6761_v51  ;;  %v6962_v48 = vadd.f32 %v6961_v4, %v6960_v12 }
 0x9a3   : > { %v5500_v10 = vmax.f32 %v5494_v49, 0.0  ;;  %v5497_v47 = vadd.f32 %v6962_v48, %v6761_v51  ;;  %v5655_v48 = vrot.slane %v5615_v62, %v8863_v36 }
 0x9a5   : > { %v5501_v28 = vmax.f32 %v5497_v47, 0.0  ;;  %v5502_v11 = vmin.f32 %v5500_v10, 6.0 }
 0x9a7   : > { %v5503_v59 = vmin.f32 %v5501_v28, 6.0 }
 0x9a9   : > { %v7160_v24 = vpack.c.bf16 %v5503_v59, %v5502_v11  ;;  %v5664_v11 = vrot.slane %v5615_v62, %v8870_v20 }
 0x9ab   : > { %7161 = vmatpush3.bf16.msra.mxu1 %v7160_v24  ;;  %v5670_v24 = vrot.slane %v5615_v62, %v8883_v50 }
 0x9ac   : > { %5801 = vmatprep.subr.bf16.mxu1 %v7827_v2 }
 0x9ae   : > { %7048 = vmatmul.mubr.msk.f32.vlgmr.msra.gmra.mrb[200].mxu1 %vm5509_vm2, %v5504_v3 }
 0x9af   : > { %7050 = vmatprep.mubr.msk.f32.mxu1 %vm7999_vm1, %v8000_v52  ;;  %5802 = vmatpush1.bf16.msra.mxu1 %v7825_v16 }
 0x9b0   : > { %5803 = vmatprep.subr.bf16.mxu1 %v7830_v31 }
 0x9b2   : > { %7051 = vmatmul.mubr.msk.f32.gmra.mrb[202].mxu1 %vm5509_vm2, %v5505_v58 }
 0x9b3   : > { %7053 = vmatprep.mubr.msk.f32.mxu1 %vm7999_vm1, %v8000_v52  ;;  %5804 = vmatpush1.bf16.msra.mxu1 %v7828_v53 }
 0x9b4   : > { %5805 = vmatprep.subr.bf16.mxu1 %v7833_v39 }
 0x9b6   : > { %7054 = vmatmul.mubr.msk.f32.gmra.mrb[204].mxu1 %vm5509_vm2, %v5506_v32 }
 0x9b7   : > { %7056 = vmatprep.mubr.msk.f32.mxu1 %vm7999_vm1, %v8000_v52  ;;  %5806 = vmatpush1.bf16.msra.mxu1 %v7831_v42 }
 0x9b8   : > { %5807 = vmatprep.subr.bf16.mxu1 %v7836_v43 }
 0x9ba   : > { %7057 = vmatmul.mubr.msk.f32.gmra.mrb[206].mxu1 %vm5509_vm2, %v5507_v61 }
 0x9bb   : > { %7059 = vmatprep.mubr.msk.f32.mxu1 %vm7999_vm1, %v8000_v52  ;;  %5808 = vmatpush1.bf16.msra.mxu1 %v7834_v30 }
 0x9bc   : > { %5809 = vmatprep.subr.bf16.mxu1 %v7839_v45 }
 0x9be   : > { %7060 = vmatmul.mubr.msk.f32.gmra.mrb[208].mxu1 %vm5509_vm2, %v5508_v25  ;;  %v6783_v25 = vld [vmem:[%s9492_s10 + $0x8] ss:$0 sm:$0xff] }
 0x9bf   : > { %5833 = vmatprep.mubr.bf16.mxu1 %v7997_v8  ;;  %v7837_v8 = vld [vmem:[%s9489_s3 + $0x40] ss:$8 sps:$4 sm:$0xff]   ;;  %s9493_s3 = sld [smem:[#allocation17_spill]] }
 0x9c0   : > { %5810 = vmatpush1.bf16.msra.mxu1 %v7837_v8 }
 0x9c1   : > { %5811 = vmatprep.subr.bf16.mxu1 %v7842_v46 }
 0x9c4   : > { %5812 = vmatpush1.bf16.msra.mxu1 %v7840_v38 }
 0x9c5   : > { %5813 = vmatprep.subr.bf16.mxu1 %v7845_v37  ;;  %v6784_v50 = vld [vmem:[%s9493_s3] ss:$0 sm:$0xff]  ;;  %v7860_v37 = vld [vmem:[%s9491_s5 + $0x28] sm:$0xff]   ;;  %s9495_s3 = sld [smem:[#allocation25_spill]] }
 0x9c6   : > { %6981 = vmatpush3.bf16.msra.mxu0 %v7860_v37 }
 0x9c8   : > { %5814 = vmatpush1.bf16.msra.mxu1 %v7843_v41  ;;  %v7861_v41 = vld [vmem:[%s9491_s5 + $0x70] sm:$0xff]  }
 0x9c9   : > { %5815 = vmatprep.subr.bf16.mxu1 %v7848_v19  ;;  %v7862_v19 = vld [vmem:[%s9491_s5 + $0x30] sm:$0xff]   ;;  %6982 = vmatprep.subr.bf16.mxu0 %v7861_v41 }
 0x9ca   : > { %6983 = vmatpush3.bf16.msra.mxu0 %v7862_v19 }
 0x9cb   : > { %v6030_v27 = vld [vmem:[%s9495_s3] sm:$0xff] }
 0x9cc   : > { %5816 = vmatpush1.bf16.msra.mxu1 %v7846_v1  ;;  %v7863_v1 = vld [vmem:[%s9491_s5 + $0x78] sm:$0xff]   ;;  %s1018_s5 = scalar_lea.vmem %s8168_s24, %s6833_s9  ;;  %s9498_s9 = sld [smem:[#allocation23_spill]] }
 0x9cd   : > { %6984 = vmatprep.subr.bf16.mxu0 %v7863_v1 }
 0x9ce   : > { %6985 = vmatpush3.bf16.msra.mxu0 %v7864_v9 }
 0xa81   : > { %v5591_v0 = vpop.f32.mrb[200].mxu1 }
 0xa82   : > { %v5626_v22 = vmul.f32 %v5625_v21, %v5591_v0  ;;  %v7049_v5 = vpop.f32.mrb[201].mxu1  ;;  %v5621_v15 = vmul.f32 %v5620_v6, %v5591_v0 }
 0xa84   : > { %v5628_v26 = vrot.slane %v5626_v22, 4 }
 0xa85   : > { %v5596_v51 = vpop.f32.mrb[202].mxu1 }
 0xa86   : > { %v5630_v54 = vadd.f32 %v5628_v26, %v5621_v15  ;;  %v5635_v12 = vmul.f32 %v5634_v44, %v5596_v51  ;;  %v5641_v4 = vmul.f32 %v5640_v23, %v5596_v51  ;;  %v7052_v49 = vpop.f32.mrb[203].mxu1  ;;  %v6801_v44 = vld [vmem:[%s9496_s8] ss:$0 sm:$0xff]  ;;  %s9499_s8 = sld [smem:[#allocation24_spill]] }
 0xa87   : > { %v7865_v49 = vld [vmem:[%s9497_s6] sm:$0xff]  }
 0xa88   : > { %v5636_v10 = vadd.f32 %v5635_v12, %v5630_v54  ;;  %v5643_v47 = vrot.slane %v5641_v4, 4  ;;  %v6031_v4 = vld [vmem:[%s9495_s3 + $0x8] sm:$0x1]  ;;  %s6257_s3 = sshll.u32 %s9123_s15, 4  ;;  %s9371_s3 = int_to_ptr.vmem [resolvable:$true] %s6257_s3 }
 0xa89   : > { %v5601_v28 = vpop.f32.mrb[204].mxu1 }
 0xa8a   : > { %v5645_v56 = vadd.f32 %v5643_v47, %v5636_v10  ;;  %v5650_v59 = vmul.f32 %v5649_v35, %v5601_v28  ;;  %v5656_v17 = vmul.f32 %v5655_v48, %v5601_v28  ;;  %v7055_v2 = vpop.f32.mrb[205].mxu1  ;;  %v7866_v48 = vld [vmem:[%s9497_s6 + $0x8] sm:$0xff]   ;;  %v7867_v10 = vld [vmem:[%s9497_s6 + $0x10] sm:$0xff]   ;;  %v7868_v47 = vld [vmem:[%s9497_s6 + $0x18] sm:$0xff]   ;;  %s6230_s6 = scalar_lea.sflag [#allocation3], %s9112_s16 }
 0xa8b   : > { %v6118_v28 = vld [vmem:[%s9498_s9] sm:$0xff] }
 0xa8c   : > { %v5651_v34 = vadd.f32 %v5650_v59, %v5645_v56  ;;  %v5658_v3 = vrot.slane %v5656_v17, 4 }
 0xa8d   : > { %v5606_v16 = vpop.f32.mrb[206].mxu1 }
 0xa8e   : > { %v5660_v58 = vadd.f32 %v5658_v3, %v5651_v34  ;;  %v5665_v32 = vmul.f32 %v5664_v11, %v5606_v16  ;;  %v5671_v61 = vmul.f32 %v5670_v24, %v5606_v16  ;;  %v7058_v36 = vpop.f32.mrb[207].mxu1 }
 0xa90   : > { %v5666_v31 = vadd.f32 %v5665_v32, %v5660_v58  ;;  %v5673_v20 = vrot.slane %v5671_v61, 4 }
 0xa91   : > { %v5611_v53 = vpop.f32.mrb[208].mxu1 }
 0xa92   : > { %v5675_v39 = vadd.f32 %v5673_v20, %v5666_v31  ;;  %v5680_v42 = vmul.f32 %v6783_v25, %v5611_v53  ;;  %v7061_v43 = vpop.f32.mrb[209].mxu1  ;;  %v6119_v25 = vld [vmem:[%s9498_s9 + $0x8] sm:$0x1]  ;;  %s7869_s9 = scalar_lea.vmem %s9371_s3, 4096 }
 0xa93   : > { %p7870_p11 = scmp.ne.s32.totalorder %s9371_s3, %s7869_s9 }
 0xa94   : > { %v5681_v30 = vadd.f32 %v5680_v42, %v5675_v39  ;;  %v6145_v42 = vld [vmem:[%s9499_s8] sm:$0x1]  ;;  %s8001_s8 = smov [#allocation2]  }
 0xa95   : > { %p7871_p12 = pnand %p7870_p11, %p8213_p5  ;;  %s7873_s10 = sshll.u32 %s8001_s8, 4  ;;  %s7874_s10 = int_to_ptr.vmem [resolvable:$false] %s7873_s10 }
 0xa96   : > { %v5689_v45 = vadd.f32 %v6784_v50, %v5681_v30  ;;  %s7875_s12 = scalar_lea.vmem %s7874_s10, 8192  ;;  %p7876_p0 = scmp.lt.s32.totalorder %s9371_s3, %s7874_s10 }
 0xa97   : > { %p7872_p13 = pneg %p7871_p12  ;;  %p7877_p1 = scmp.lt.s32.totalorder %s7875_s12, %s7869_s9 }
 0xa98   : > { %v5690_v8 = vmax.f32 %v5689_v45, 0.0 }
 0xa99   : > { %p7878_p2 = por %p7877_p1, %p7876_p0 }
 0xa9a   : > { %v5691_v46 = vmin.f32 %v5690_v8, 6.0 }
 0xa9b   : > { %p7879_p3 = pnand %p7878_p2, %p7872_p13 }
 0xa9c   : > { %v5692_v38 = vpack.c.bf16 %v5691_v46, %v5691_v46 }
 0xa9e   : > { %5834 = vmatmul.mubr.bf16.vlgmr.msra.gmra.mrb[212].mxu1 %v5692_v38 }
 0xb71   : > { %v5835_v57 = vpop.f32.mrb[212].mxu1 }
 0xb72   : > { %v5836_v33 = vadd.f32 %v5835_v57, %v5714_v60  ;;  %v5837_v63 = vpop.f32.mrb[213].mxu1 }
 0xb73   : > { %v5838_v55 = vadd.f32 %v5837_v63, %v5718_v13  ;;  %v5839_v40 = vpop.f32.mrb[214].mxu1 }
 0xb74   : > { %v5842_v18 = vmax.f32 %v5836_v33, 0.0  ;;  %v5840_v14 = vpop.f32.mrb[215].mxu1 }
 0xb75   : > { %v5843_v62 = vmax.f32 %v5838_v55, 0.0 }
 0xb76   : > { %v5844_v21 = vmin.f32 %v5842_v18, 6.0 }
 0xb77   : > { %v5845_v6 = vmin.f32 %v5843_v62, 6.0 }
 0xb78   : > { %v5851_v5 = vpack.c.bf16 %v5844_v21, %v5844_v21 }
 0xb79   : > { %v5848_v0 = vcombine.low %v5844_v21, %v5845_v6  ;;  %v5852_v22 = vpack.c.bf16 %v5845_v6, %v5845_v6 }
 0xb7b   : > { %5850 = vst [vmem:[%s1018_s5] sm:$0xff] %v5848_v0  ;;  %6020 = vmatprep.mubr.bf16.mxu0 %v5852_v22  ;;  %s9368_s5 = scalar_lea.hbm %s9477_s4, %s6834_s26 }
 0xb7c   : > { %6021 = vmatmul.mubr.bf16.vlgmr.msra.gmra.mrb[100].mxu0 %v5851_v5 }
 0xb7d   : > { %7064 = vmatprep.mubr.msk.f32.mxu0 %vm6032_vm3, %v6030_v27 }
 0xc4f   : > { %v6986_v29 = vpop.f32.mrb[100].mxu0 }
 0xc50   : > { %v6987_v23 = vpop.f32.mrb[101].mxu0 }
 0xc51   : > { %v6988_v15 = vadd.f32 %v6987_v23, %v6986_v29  ;;  %v6989_v26 = vpop.f32.mrb[102].mxu0 }
 0xc52   : > { %v6990_v51 = vpop.f32.mrb[103].mxu0 }
 0xc53   : > { %v6023_v35 = vadd.f32 %v6988_v15, %v6801_v44 }
 0xc55   : > { %v6028_v54 = vmax.f32 %v6023_v35, 0.0 }
 0xc57   : > { %v6029_v12 = vmin.f32 %v6028_v54, 6.0 }
 0xc59   : > { %7062 = vmatprep.subr.msk.mxu0 %vm6039_vm4, %v6029_v12 }
 0xc5a   : > { %7063 = vmatpush3.msk.msra.mxu0 %vm6039_vm4, %v6029_v12 }
 0xc5b   : > { %7065 = vmatmul.mubr.msk.f32.vlgmr.msra.gmra.mrb[98].mxu0 %vm6032_vm3, %v6031_v4  ;;  %7067 = vmatprep.subr.bf16.mxu0 %v8000_v52 }
 0xc5c   : > { %7075 = vmatprep.mubr.msk.bf16.mxu0 %vm7999_vm1, %v8000_v52  ;;  %7068 = vmatpush3.bf16.msra.mxu0 %v7865_v49 }
 0xc5d   : > { %7069 = vmatprep.subr.bf16.mxu0 %v8000_v52 }
 0xc60   : > { %7070 = vmatpush3.bf16.msra.mxu0 %v7866_v48 }
 0xc61   : > { %7071 = vmatprep.subr.bf16.mxu0 %v8000_v52 }
 0xc64   : > { %7072 = vmatpush3.bf16.msra.mxu0 %v7867_v10 }
 0xc65   : > { %7073 = vmatprep.subr.bf16.mxu0 %v8000_v52 }
 0xc68   : > { %7074 = vmatpush3.bf16.msra.mxu0 %v7868_v47 }
 0xd2e   : > { %v7066_v11 = vpop.f32.mrb[98].mxu0 }
 0xd2f   : > { %v6109_v56 = vpop.f32.mrb[99].mxu0  ;;  %v6143_v53 = vmul.f32 %v7066_v11, %v6119_v25 }
 0xd30   : > { %v6120_v59 = vmul.f32 %v6118_v28, %v6109_v56 }
 0xd32   : > { %v6122_v17 = vrot.slane %v6120_v59, 1  ;;  %v6125_v24 = vrot.slane %v6120_v59, 2  ;;  %v6128_v3 = vrot.slane %v6120_v59, 3  ;;  %v6131_v58 = vrot.slane %v6120_v59, 4 }
 0xd33   : > { %v6134_v61 = vrot.slane %v6120_v59, 5  ;;  %v6137_v52 = vrot.slane %v6120_v59, 6  ;;  %v6140_v20 = vrot.slane %v6120_v59, 7 }
 0xd34   : > { %v6124_v2 = vadd.f32 %v6122_v17, %v6120_v59 }
 0xd36   : > { %v6127_v34 = vadd.f32 %v6125_v24, %v6124_v2 }
 0xd38   : > { %v6130_v16 = vadd.f32 %v6128_v3, %v6127_v34 }
 0xd3a   : > { %v6133_v32 = vadd.f32 %v6131_v58, %v6130_v16 }
 0xd3c   : > { %v6136_v36 = vadd.f32 %v6134_v61, %v6133_v32 }
 0xd3e   : > { %v6139_v31 = vadd.f32 %v6137_v52, %v6136_v36 }
 0xd40   : > { %v6142_v39 = vadd.f32 %v6140_v20, %v6139_v31 }
 0xd42   : > { %v6144_v43 = vadd.f32 %v6143_v53, %v6142_v39 }
 0xd44   : > { %v6146_v50 = vadd.f32 %v6145_v42, %v6144_v43 }
 0xd46   : > { %v6147_v30 = vmax.f32 %v6146_v50, 0.0 }
 0xd48   : > { %v6148_v45 = vmin.f32 %v6147_v30, 6.0 }
 0xd4a   : > { %v6149_v8 = vpack.c.bf16 %v6148_v45, %v6148_v45 }
 0xd4c   : > { %7076 = vmatmul.mubr.msk.bf16.vlgmr.msra.gmra.mrb[104].mxu0 %vm1960_vm0, %v6149_v8 }
 0xd4d   : > { %7882 = shalt.err (!%p7879_p3)
}
 0xd4e   : > { %s7883_s15 = scalar_lea.hbm %s9368_s5, 4096  ;;  %s7887_s26 = scalar_lea.hbm %s9477_s4, 8192 }
 0xd4f   : > { %p7884_p4 = scmp.ne.s32.totalorder %s9368_s5, %s7883_s15  ;;  %p7888_p9 = scmp.lt.u32.totalorder %s9368_s5, %s9477_s4 }
 0xd50   : > { %p7889_p10 = scmp.lt.u32.totalorder %s7887_s26, %s7883_s15  ;;  %p7891_p12 = scmp.lt.u32.totalorder %s7883_s15, %s9368_s5 }
 0xd51   : > { %p7885_p7 = pnand %p7884_p4, %p8213_p5 }
 0xd52   : > { %p7890_p11 = por %p7889_p10, %p7888_p9 }
 0xd53   : > { %p7886_p8 = pneg %p7885_p7 }
 0xd54   : > { %p7892_p0 = por %p7891_p12, %p7890_p11 }
 0xd56   : > { %p7893_p13 = pnand %p7892_p0, %p7886_p8 }
 0xd58   : > { %7896 = shalt.err (!%p7893_p13)
}
 0xd59   : > { %s8002_s12 = smov 512   ;;  %s9500_s10 = sld [smem:[#allocation27_spill]] }
 0xd5a   : > { %s8003_s9 = smov 32   ;;  %s6829_s8 = sshll.u32 %s8196_s0, 4 }
 0xd5b   : > { %7355 = dma.vmem_to_hbm [thread:$0]  (%p8213_p5), %s9371_s3, 4096, %s9368_s5, %s6230_s6, %s8002_s12, %s8002_s12, %s8003_s9  }
 0xd5c   : > { %s1003_s15 = scalar_lea.vmem [#allocation4], %s9112_s16  ;;  %s9397_s4 = scalar_lea.hbm %s8173_s27, %s6829_s8 }
 0xd5d   : > { %s6279_s26 = sshll.u32 %s1003_s15, 4  ;;  %s6245_s3 = scalar_lea.sflag [#allocation5], %s9112_s16  ;;  %s9399_s26 = int_to_ptr.vmem [resolvable:$true] %s6279_s26 }
 0xd5e   : > { %s7897_s6 = scalar_lea.vmem %s9399_s26, 16  ;;  %s8004_s0 = smov [#allocation4]  }
 0xd5f   : > { %v6158_v46 = vld [vmem:[%s9500_s10] sm:$0x1]  ;;  %p7898_p1 = scmp.ne.s32.totalorder %s9399_s26, %s7897_s6  ;;  %s7901_s5 = sshll.u32 %s8004_s0, 4  ;;  %s7902_s5 = int_to_ptr.vmem [resolvable:$false] %s7901_s5 }
 0xd60   : > { %s7903_s12 = scalar_lea.vmem %s7902_s5, 32  ;;  %p7904_p4 = scmp.lt.s32.totalorder %s9399_s26, %s7902_s5 }
 0xd61   : > { %p7899_p2 = pnand %p7898_p1, %p8213_p5  ;;  %p7905_p7 = scmp.lt.s32.totalorder %s7903_s12, %s7897_s6 }
 0xd63   : > { %p7900_p3 = pneg %p7899_p2  ;;  %p7906_p8 = por %p7905_p7, %p7904_p4 }
 0xd65   : > { %p7907_p9 = pnand %p7906_p8, %p7900_p3 }
 0xe1f   : > { %v6220_v38 = vpop.f32.mrb[104].mxu0 }
 0xe20   : > { %v6221_v37 = vadd.f32 %v6220_v38, %v6158_v46  ;;  %v7077_v41 = vpop.f32.mrb[105].mxu0 }
 0xe21   : > { %v6223_v19 = vpop.f32.mrb[106].mxu0 }
 0xe22   : > { %v6226_v1 = vmax.f32 %v6221_v37, 0.0  ;;  %v7078_v9 = vpop.f32.mrb[107].mxu0 }
 0xe24   : > { %v6227_v7 = vmin.f32 %v6226_v1, 6.0 }
 0xe26   : > { %6228 = vst [vmem:[%s1003_s15] sm:$0x1] %v6227_v7 }
 0xe27   : > { %7910 = shalt.err (!%p7907_p9)
}
 0xe28   : > { %s7911_s16 = scalar_lea.hbm %s9397_s4, 16  ;;  %s7915_s10 = scalar_lea.hbm %s8173_s27, 32 }
 0xe29   : > { %p7912_p10 = scmp.ne.s32.totalorder %s9397_s4, %s7911_s16  ;;  %p7916_p0 = scmp.lt.u32.totalorder %s9397_s4, %s8173_s27 }
 0xe2a   : > { %p7917_p13 = scmp.lt.u32.totalorder %s7915_s10, %s7911_s16  ;;  %p7919_p2 = scmp.lt.u32.totalorder %s7911_s16, %s9397_s4 }
 0xe2b   : > { %p7913_p11 = pnand %p7912_p10, %p8213_p5 }
 0xe2c   : > { %p7918_p1 = por %p7917_p13, %p7916_p0 }
 0xe2d   : > { %p7914_p12 = pneg %p7913_p11 }
 0xe2e   : > { %p7920_p4 = por %p7919_p2, %p7918_p1 }
 0xe30   : > { %p7921_p3 = pnand %p7920_p4, %p7914_p12 }
 0xe32   : > { %7924 = shalt.err (!%p7921_p3)
}
 0xe33   : > { %7356 = dma.vmem_to_hbm [thread:$0]  (%p8213_p5), %s9399_s26, 16, %s9397_s4, %s6245_s3  }
 0xe34 PF: > { %p7366_p7 = scmp.ge.s32.totalorder %s7963_s7, 2  ;;  %s6291_s9 = sand.u32 1, %s7951_s28  }
 0xe35   : > { %s6292_s8 = scalar_lea.sflag [#allocation3], %s6291_s9 }
 0xe36   : > { %p7360_p8 = pnand %p7366_p7, %p8217_p6 }
 0xe38   : > { %7942 = dma.done.wait (!%p7360_p8), %s6292_s8, 4096  }
 0xe39   : > { %7944 = vsyncadd (!%p7360_p8), %s6292_s8, 4294963200  ;;  %s6317_s15 = scalar_lea.sflag [#allocation5], %s6291_s9 }
 0xe3a   : > { %7946 = dma.done.wait (!%p7360_p8), %s6317_s15, 16  }
 0xe3b   : > { %7948 = vsyncadd (!%p7360_p8), %s6317_s15, 4294967280  ;;  %p79_p5 = scmp.ge.s32.totalorder %s8200_s11, 4   ;;  %s9501_s28 = smov %s7955_s1 }
 0xe3c   : > { %s9502_s1 = smov %s7959_s2  ;;  %s9503_s2 = smov %s8211_s18 }
 0xe3d   : > { %s9504_s7 = smov %s8200_s11  ;;  %81 = sbr.rel (!%p79_p5) target bundleno = 62 (0x3e), region = 244 }
 0xe44   :  { %6321 = vsyncpa [#allocation3], 1 }
 0xe45   :  { %6323 = vsyncpa [#allocation3 + $0x1], 1 }
 0xe46   :  { %6324 = vsyncpa [#allocation5], 1 }
 0xe47   :  { %6326 = vsyncpa [#allocation5 + $0x1], 1 }

</bundles_post_ra>
